<compile_context>
chip_gen: v7x
topology: tpu7x:2x2x1
jax: 0.10.0
libtpu: 0.0.40
codegen_flags: <defaults>
</compile_context>

<pallas_src>
import functools

import jax
import jax.numpy as jnp
from jax.experimental import pallas as pl
from jax.experimental.pallas import tpu as pltpu

INNER = 32 * 32          # inner_layer_size = 1024
LANE = 128               # TPU lane width
SUBLANE = 8              # f32 sublane count
MIN_SPLIT_B = 256        # force >=2 grid steps above this batch (2nd TC on v7x)


def _round_up(x: int, m: int) -> int:
    return (x + m - 1) // m * m


def _select_tiling():
    """Per-generation batch-tile cap and VMEM limit (queried once at import)."""
    try:
        vmem = getattr(pltpu.get_tpu_info(), "vmem_capacity_bytes", None)
    except Exception:
        vmem = None
    if vmem is not None and vmem >= (100 << 20):
        # v5e / v6e: 128 MiB VMEM per TensorCore -> big tiles, high limit.
        return 2048, 100 << 20
    # v7x (64 MiB per TC) or unknown: conservative but still MXU-friendly.
    return 1024, 48 << 20


MAX_TB, VMEM_LIMIT = _select_tiling()


def _mlp_kernel(x_ref, w1_ref, b1_ref, w2_ref, b2_ref, w3_ref, b3_ref, o_ref):
    # fc1 + ReLU  (bf16 MXU inputs, f32 accumulation, f32 epilogue)
    h1 = jnp.dot(x_ref[...], w1_ref[...], preferred_element_type=jnp.float32)
    h1 = jnp.maximum(h1 + b1_ref[...], 0.0)
    # fc2 + ReLU
    h2 = jnp.dot(h1.astype(jnp.bfloat16), w2_ref[...],
                 preferred_element_type=jnp.float32)
    h2 = jnp.maximum(h2 + b2_ref[...], 0.0)
    # fc3 (no activation)
    o = jnp.dot(h2.astype(jnp.bfloat16), w3_ref[...],
                preferred_element_type=jnp.float32)
    o_ref[...] = (o + b3_ref[...]).astype(o_ref.dtype)


def prepare_params(w1, b1, w2, b2, w3, b3):
    """One-time cast/pad of weights into kernel layout (bf16, lane-aligned).

    Weights are (in, out); biases (1, out) or (out,). Run this once outside
    the hot path -- the jitted forward takes the already-padded arrays.
    """
    d_in = w1.shape[0]
    n_out = w3.shape[1]
    d_in_p = _round_up(d_in, LANE)
    n_out_p = _round_up(n_out, LANE)

    w1p = jnp.zeros((d_in_p, INNER), jnp.bfloat16).at[:d_in, :].set(
        w1.astype(jnp.bfloat16))
    w2p = w2.astype(jnp.bfloat16)
    w3p = jnp.zeros((INNER, n_out_p), jnp.bfloat16).at[:, :n_out].set(
        w3.astype(jnp.bfloat16))
    b1p = jnp.reshape(b1, (1, INNER)).astype(jnp.float32)
    b2p = jnp.reshape(b2, (1, INNER)).astype(jnp.float32)
    b3p = jnp.zeros((1, n_out_p), jnp.float32).at[:, :n_out].set(
        jnp.reshape(b3, (1, n_out)).astype(jnp.float32))

    params = tuple(jax.block_until_ready(p)
                   for p in (w1p, b1p, w2p, b2p, w3p, b3p))
    return params, n_out


@functools.partial(jax.jit, static_argnames=("n_out",))
def augmented_relu_network_forward(x_nchw, w1p, b1p, w2p, b2p, w3p, b3p, *,
                                   n_out):
    """x_nchw: [B, C, H, W] f32. w*/b* are the pre-padded bf16/f32 params."""
    B = x_nchw.shape[0]
    x = x_nchw.reshape(B, -1)           # nn.Flatten() on NCHW, row-major
    d_in = x.shape[1]
    d_in_p = w1p.shape[0]
    n_out_p = w3p.shape[1]
    assert d_in <= d_in_p, (d_in, d_in_p)

    # Balanced batch tiling: pick the number of tiles first, then a tile size
    # that just covers B (<= 8 wasted rows per tile), instead of padding B up
    # to a full MAX_TB multiple. Force >=2 tiles for moderately large batches
    # so the "parallel" grid axis can use the 2nd TensorCore on v7x.
    n_tiles = max(pl.cdiv(B, MAX_TB), 2 if B >= MIN_SPLIT_B else 1)
    tb = _round_up(pl.cdiv(B, n_tiles), SUBLANE)
    b_p = tb * n_tiles

    # Pad + cast activations only (weights were padded once in prepare_params).
    # Zero-padded input columns pair with zero-padded w1 rows -> no effect;
    # padded batch rows / output lanes are sliced off below.
    xb = jnp.zeros((b_p, d_in_p), jnp.bfloat16).at[:B, :d_in].set(
        x.astype(jnp.bfloat16))

    flops = 2 * b_p * (d_in_p * INNER + INNER * INNER + INNER * n_out_p)
    bytes_accessed = (xb.size * 2 + w1p.size * 2 + w2p.size * 2 + w3p.size * 2
                      + b1p.size * 4 + b2p.size * 4 + b3p.size * 4
                      + b_p * n_out_p * 4)
    cost = pl.CostEstimate(flops=flops, transcendentals=0,
                           bytes_accessed=bytes_accessed)

    # Constant-index blocks never re-DMA across the batch grid; single-buffer
    # them so they don't pay 2x VMEM for nothing.
    resident = pl.Buffered(1)

    out = pl.pallas_call(
        _mlp_kernel,
        out_shape=jax.ShapeDtypeStruct((b_p, n_out_p), jnp.float32),
        grid_spec=pltpu.PrefetchScalarGridSpec(
            num_scalar_prefetch=0,
            grid=(n_tiles,),
            in_specs=[
                # x tile: software-pipelined along the batch grid axis.
                pl.BlockSpec((tb, d_in_p), lambda i: (i, 0)),
                # Weights / biases: constant index_map -> VMEM-resident,
                # single-buffered.
                pl.BlockSpec((d_in_p, INNER), lambda i: (0, 0),
                             pipeline_mode=resident),
                pl.BlockSpec((1, INNER), lambda i: (0, 0),
                             pipeline_mode=resident),
                pl.BlockSpec((INNER, INNER), lambda i: (0, 0),
                             pipeline_mode=resident),
                pl.BlockSpec((1, INNER), lambda i: (0, 0),
                             pipeline_mode=resident),
                pl.BlockSpec((INNER, n_out_p), lambda i: (0, 0),
                             pipeline_mode=resident),
                pl.BlockSpec((1, n_out_p), lambda i: (0, 0),
                             pipeline_mode=resident),
            ],
            out_specs=pl.BlockSpec((tb, n_out_p), lambda i: (i, 0)),
        ),
        compiler_params=pltpu.CompilerParams(
            dimension_semantics=("parallel",),
            vmem_limit_bytes=VMEM_LIMIT,
        ),
        cost_estimate=cost,
    )(xb, w1p, b1p, w2p, b2p, w3p, b3p)

    return out[:B, :n_out]


def _init_linear(key, fan_in, fan_out):
    """Deterministic init matching torch.nn.Linear's default distribution:
    U(-1/sqrt(fan_in), 1/sqrt(fan_in)) for both weight and bias."""
    kw, kb = jax.random.split(key)
    bound = 1.0 / jnp.sqrt(jnp.float32(fan_in))
    # stored as (in, out) so the kernel can do x @ W directly
    w = jax.random.uniform(kw, (fan_in, fan_out), jnp.float32, -bound, bound)
    bvec = jax.random.uniform(kb, (1, fan_out), jnp.float32, -bound, bound)
    return w, bvec


def reference_forward(x_nchw, w1, b1, w2, b2, w3, b3):
    """Pure-JAX reference with identical bf16-weight / f32-accumulation math."""
    x = x_nchw.reshape(x_nchw.shape[0], -1).astype(jnp.bfloat16)
    h1 = jnp.dot(x, w1.astype(jnp.bfloat16),
                 preferred_element_type=jnp.float32) + b1
    h1 = jnp.maximum(h1, 0.0)
    h2 = jnp.dot(h1.astype(jnp.bfloat16), w2.astype(jnp.bfloat16),
                 preferred_element_type=jnp.float32) + b2
    h2 = jnp.maximum(h2, 0.0)
    return jnp.dot(h2.astype(jnp.bfloat16), w3.astype(jnp.bfloat16),
                   preferred_element_type=jnp.float32) + b3


if __name__ == "__main__":
    key = jax.random.PRNGKey(0)
    k_x, k1, k2, k3 = jax.random.split(key, 4)

    # Small NCHW input: batch=2, channels=4, spatial=16x16 -> inputs_count=1024
    B, C, H, W = 2, 4, 16, 16
    inputs_count = C * H * W
    outputs_count = 10

    x = jax.random.normal(k_x, (B, C, H, W), jnp.float32)

    w1, b1 = _init_linear(k1, inputs_count, INNER)
    w2, b2 = _init_linear(k2, INNER, INNER)
    w3, b3 = _init_linear(k3, INNER, outputs_count)

    # One-time weight preparation (pad + bf16 cast), reused across calls.
    params, n_out = prepare_params(w1, b1, w2, b2, w3, b3)

    out = augmented_relu_network_forward(x, *params, n_out=n_out)
    out = jax.block_until_ready(out)

    ref = reference_forward(x, w1, b1, w2, b2, w3, b3)
    assert out.shape == (B, outputs_count), out.shape
    assert jnp.allclose(out, ref, atol=2e-2, rtol=2e-2), "mismatch vs reference"

    print("KERNEL_OK")
</pallas_src>

<mosaic_0001>
module attributes {stable_mosaic.version = 11 : i64} {
  func.func @_mlp_kernel(%arg0: i32, %arg1: memref<8x1024xbf16, #tpu.memory_space<vmem>>, %arg2: memref<1024x1024xbf16, #tpu.memory_space<vmem>>, %arg3: memref<1x1024xf32, #tpu.memory_space<vmem>>, %arg4: memref<1024x1024xbf16, #tpu.memory_space<vmem>>, %arg5: memref<1x1024xf32, #tpu.memory_space<vmem>>, %arg6: memref<1024x128xbf16, #tpu.memory_space<vmem>>, %arg7: memref<1x128xf32, #tpu.memory_space<vmem>>, %arg8: memref<8x128xf32, #tpu.memory_space<vmem>>) attributes {dimension_semantics = [#tpu.dimension_semantics<parallel>], iteration_bounds = array<i64: 1>, scalar_prefetch = 0 : i64, scratch_operands = 0 : i64, tpu.core_type = #tpu.core_type<tc>, window_params = [{transform_indices = @transform_0, window_bounds = array<i64: 8, 1024>}, {pipeline_mode = #tpu.pipeline_mode<synchronous>, transform_indices = @transform_1, window_bounds = array<i64: 1024, 1024>}, {pipeline_mode = #tpu.pipeline_mode<synchronous>, transform_indices = @transform_2, window_bounds = array<i64: 1, 1024>}, {pipeline_mode = #tpu.pipeline_mode<synchronous>, transform_indices = @transform_3, window_bounds = array<i64: 1024, 1024>}, {pipeline_mode = #tpu.pipeline_mode<synchronous>, transform_indices = @transform_4, window_bounds = array<i64: 1, 1024>}, {pipeline_mode = #tpu.pipeline_mode<synchronous>, transform_indices = @transform_5, window_bounds = array<i64: 1024, 128>}, {pipeline_mode = #tpu.pipeline_mode<synchronous>, transform_indices = @transform_6, window_bounds = array<i64: 1, 128>}, {transform_indices = @transform_7, window_bounds = array<i64: 8, 128>}]} {
    %c0 = arith.constant 0 : index
    %c0_0 = arith.constant 0 : index
    %0 = vector.load %arg1[%c0, %c0_0] : memref<8x1024xbf16, #tpu.memory_space<vmem>>, vector<8x1024xbf16>
    %c0_1 = arith.constant 0 : index
    %c0_2 = arith.constant 0 : index
    %1 = vector.load %arg2[%c0_1, %c0_2] : memref<1024x1024xbf16, #tpu.memory_space<vmem>>, vector<1024x1024xbf16>
    %cst = arith.constant dense<0.000000e+00> : vector<8x1024xf32>
    %2 = tpu.matmul %0, %1, %cst {dimension_numbers = #tpu.dot_dimension_numbers<[1], [0], [0], [1], [0, 0, 1, 1], [], []>} : vector<8x1024xbf16>, vector<1024x1024xbf16>, vector<8x1024xf32> -> vector<8x1024xf32>
    %c0_3 = arith.constant 0 : index
    %c0_4 = arith.constant 0 : index
    %3 = vector.load %arg3[%c0_3, %c0_4] : memref<1x1024xf32, #tpu.memory_space<vmem>>, vector<1x1024xf32>
    %4 = vector.broadcast %3 : vector<1x1024xf32> to vector<8x1024xf32>
    %5 = arith.addf %2, %4 : vector<8x1024xf32>
    %cst_5 = arith.constant 0.000000e+00 : f32
    %6 = vector.broadcast %cst_5 : f32 to vector<8x1024xf32>
    %7 = arith.maximumf %5, %6 : vector<8x1024xf32>
    %8 = arith.truncf %7 : vector<8x1024xf32> to vector<8x1024xbf16>
    %c0_6 = arith.constant 0 : index
    %c0_7 = arith.constant 0 : index
    %9 = vector.load %arg4[%c0_6, %c0_7] : memref<1024x1024xbf16, #tpu.memory_space<vmem>>, vector<1024x1024xbf16>
    %cst_8 = arith.constant dense<0.000000e+00> : vector<8x1024xf32>
    %10 = tpu.matmul %8, %9, %cst_8 {dimension_numbers = #tpu.dot_dimension_numbers<[1], [0], [0], [1], [0, 0, 1, 1], [], []>} : vector<8x1024xbf16>, vector<1024x1024xbf16>, vector<8x1024xf32> -> vector<8x1024xf32>
    %c0_9 = arith.constant 0 : index
    %c0_10 = arith.constant 0 : index
    %11 = vector.load %arg5[%c0_9, %c0_10] : memref<1x1024xf32, #tpu.memory_space<vmem>>, vector<1x1024xf32>
    %12 = vector.broadcast %11 : vector<1x1024xf32> to vector<8x1024xf32>
    %13 = arith.addf %10, %12 : vector<8x1024xf32>
    %cst_11 = arith.constant 0.000000e+00 : f32
    %14 = vector.broadcast %cst_11 : f32 to vector<8x1024xf32>
    %15 = arith.maximumf %13, %14 : vector<8x1024xf32>
    %16 = arith.truncf %15 : vector<8x1024xf32> to vector<8x1024xbf16>
    %c0_12 = arith.constant 0 : index
    %c0_13 = arith.constant 0 : index
    %17 = vector.load %arg6[%c0_12, %c0_13] : memref<1024x128xbf16, #tpu.memory_space<vmem>>, vector<1024x128xbf16>
    %cst_14 = arith.constant dense<0.000000e+00> : vector<8x128xf32>
    %18 = tpu.matmul %16, %17, %cst_14 {dimension_numbers = #tpu.dot_dimension_numbers<[1], [0], [0], [1], [0, 0, 1, 1], [], []>} : vector<8x1024xbf16>, vector<1024x128xbf16>, vector<8x128xf32> -> vector<8x128xf32>
    %c0_15 = arith.constant 0 : index
    %c0_16 = arith.constant 0 : index
    %19 = vector.load %arg7[%c0_15, %c0_16] : memref<1x128xf32, #tpu.memory_space<vmem>>, vector<1x128xf32>
    %20 = vector.broadcast %19 : vector<1x128xf32> to vector<8x128xf32>
    %21 = arith.addf %18, %20 : vector<8x128xf32>
    %c0_17 = arith.constant 0 : index
    %c0_18 = arith.constant 0 : index
    %22 = vector.load %arg8[%c0_17, %c0_18] : memref<8x128xf32, #tpu.memory_space<vmem>>, vector<8x128xf32>
    tpu.vector_store %arg8[%c0_17, %c0_18], %21 {strides = array<i32>} : memref<8x128xf32, #tpu.memory_space<vmem>>, vector<8x128xf32>,
    return
  }
  func.func @transform_0(%arg0: i32) -> (i32, i32) {
    %c0_i32 = arith.constant 0 : i32
    %c0_i32_0 = arith.constant 0 : i32
    return %arg0, %c0_i32 : i32, i32
  }
  func.func @transform_1(%arg0: i32) -> (i32, i32) {
    %c0_i32 = arith.constant 0 : i32
    %c0_i32_0 = arith.constant 0 : i32
    %c0_i32_1 = arith.constant 0 : i32
    return %c0_i32, %c0_i32_0 : i32, i32
  }
  func.func @transform_2(%arg0: i32) -> (i32, i32) {
    %c0_i32 = arith.constant 0 : i32
    %c0_i32_0 = arith.constant 0 : i32
    %c0_i32_1 = arith.constant 0 : i32
    return %c0_i32, %c0_i32_0 : i32, i32
  }
  func.func @transform_3(%arg0: i32) -> (i32, i32) {
    %c0_i32 = arith.constant 0 : i32
    %c0_i32_0 = arith.constant 0 : i32
    %c0_i32_1 = arith.constant 0 : i32
    return %c0_i32, %c0_i32_0 : i32, i32
  }
  func.func @transform_4(%arg0: i32) -> (i32, i32) {
    %c0_i32 = arith.constant 0 : i32
    %c0_i32_0 = arith.constant 0 : i32
    %c0_i32_1 = arith.constant 0 : i32
    return %c0_i32, %c0_i32_0 : i32, i32
  }
  func.func @transform_5(%arg0: i32) -> (i32, i32) {
    %c0_i32 = arith.constant 0 : i32
    %c0_i32_0 = arith.constant 0 : i32
    %c0_i32_1 = arith.constant 0 : i32
    return %c0_i32, %c0_i32_0 : i32, i32
  }
  func.func @transform_6(%arg0: i32) -> (i32, i32) {
    %c0_i32 = arith.constant 0 : i32
    %c0_i32_0 = arith.constant 0 : i32
    %c0_i32_1 = arith.constant 0 : i32
    return %c0_i32, %c0_i32_0 : i32, i32
  }
  func.func @transform_7(%arg0: i32) -> (i32, i32) {
    %c0_i32 = arith.constant 0 : i32
    %c0_i32_0 = arith.constant 0 : i32
    return %arg0, %c0_i32 : i32, i32
  }
}

</mosaic_0001>

<bundles_post_ra>
// kernel: augmented_relu_network_forward.1
= control target key start
LH: loop header
LB: loop body
LE: loop exit
PB: predicated region body
PF: predicated region fallthrough
CT: control target
= control target key end

     0   :  { %12 = vsyncpa [#allocation3], 0  ;;  %s10263_s0 = inlined_call_operand.vmem [shape: bf16[8,1024], index: 0, kind: input, shape index: {}]   ;;  %s10264_s1 = inlined_call_operand.hbm [shape: bf16[1024,1024], index: 1, kind: input, shape index: {}]   ;;  %s10265_s2 = inlined_call_operand.hbm [shape: f32[1,1024], index: 2, kind: input, shape index: {}]   ;;  %s10266_s3 = inlined_call_operand.hbm [shape: bf16[1024,1024], index: 3, kind: input, shape index: {}]   ;;  %s10267_s4 = inlined_call_operand.hbm [shape: f32[1,1024], index: 4, kind: input, shape index: {}]   ;;  %s10268_s5 = inlined_call_operand.hbm [shape: bf16[1024,128], index: 5, kind: input, shape index: {}]   ;;  %s10269_s6 = inlined_call_operand.hbm [shape: f32[1,128], index: 6, kind: input, shape index: {}]   ;;  %s10270_s7 = inlined_call_operand.vmem [shape: f32[8,128], index: 7, kind: output, shape index: {}]  }
   0x1   :  { %13 = vsyncpa [#allocation5], 0 }
   0x2   :  { %14 = vsyncpa [#allocation8], 0 }
   0x3   :  { %15 = vsyncpa [#allocation11], 0  ;;  %s9915_s24 = smov [#allocation4]   ;;  %s9916_s26 = smov [#allocation7]  }
   0x4   :  { %s36_s25 = sshll.u32 %s9915_s24, 4  ;;  %s58_s27 = sshll.u32 %s9916_s26, 4  ;;  %s37_s25 = int_to_ptr.vmem [resolvable:$true] %s36_s25  ;;  %s59_s27 = int_to_ptr.vmem [resolvable:$true] %s58_s27 }
   0x5   :  { %s9775_s30 = scalar_lea.hbm %s10265_s2, 128 }
   0x6   :  { %p9776_p0 = scmp.ne.s32.totalorder %s10265_s2, %s9775_s30  ;;  %p9779_p1 = scmp.lt.u32.totalorder %s9775_s30, %s10265_s2 }
   0x8   :  { %p9781_p2 = pnand %p9779_p1, %p9776_p0 }
   0xa   :  { %9784 = shalt.err (!%p9781_p2)
}
   0xb   :  { %s9785_s12 = scalar_lea.vmem %s37_s25, 128  ;;  %p9790_p4 = scmp.lt.s32.totalorder %s37_s25, %s37_s25 }
   0xc   :  { %p9786_p3 = scmp.ne.s32.totalorder %s37_s25, %s9785_s12  ;;  %p9791_p5 = scmp.lt.s32.totalorder %s9785_s12, %s9785_s12 }
   0xe   :  { %p9792_p6 = por %p9791_p5, %p9790_p4 }
  0x10   :  { %p9793_p7 = pnand %p9792_p6, %p9786_p3 }
  0x12   :  { %9796 = shalt.err (!%p9793_p7)
}
  0x13   :  { %39 = dma.hbm_to_vmem [thread:$0]  %s10265_s2, 128, %s37_s25, [#allocation5]  }
  0x14   :  { %s9797_s17 = scalar_lea.hbm %s10267_s4, 128 }
  0x15   :  { %p9798_p8 = scmp.ne.s32.totalorder %s10267_s4, %s9797_s17  ;;  %p9801_p9 = scmp.lt.u32.totalorder %s9797_s17, %s10267_s4 }
  0x17   :  { %p9803_p10 = pnand %p9801_p9, %p9798_p8 }
  0x19   :  { %9806 = shalt.err (!%p9803_p10)
}
  0x1a   :  { %s9807_s22 = scalar_lea.vmem %s59_s27, 128  ;;  %p9812_p12 = scmp.lt.s32.totalorder %s59_s27, %s59_s27 }
  0x1b   :  { %p9808_p11 = scmp.ne.s32.totalorder %s59_s27, %s9807_s22  ;;  %p9813_p13 = scmp.lt.s32.totalorder %s9807_s22, %s9807_s22 }
  0x1d   :  { %p9814_p0 = por %p9813_p13, %p9812_p12 }
  0x1f   :  { %p9815_p1 = pnand %p9814_p0, %p9808_p11 }
  0x21   :  { %9818 = shalt.err (!%p9815_p1)
}
  0x22   :  { %61 = dma.hbm_to_vmem [thread:$0]  %s10267_s4, 128, %s59_s27, [#allocation8]  }
  0x23   :  { %s9917_s24 = smov [#allocation2]   ;;  %s9819_s29 = scalar_lea.hbm %s10264_s1, 65536 }
  0x24   :  { %s23_s25 = sshll.u32 %s9917_s24, 4  ;;  %p9820_p2 = scmp.ne.s32.totalorder %s10264_s1, %s9819_s29  ;;  %s24_s25 = int_to_ptr.vmem [resolvable:$true] %s23_s25 }
  0x25   :  { %p9823_p3 = scmp.lt.u32.totalorder %s9819_s29, %s10264_s1 }
  0x27   :  { %p9825_p4 = pnand %p9823_p3, %p9820_p2 }
  0x29   :  { %9828 = shalt.err (!%p9825_p4)
}
  0x2a   :  { %s9829_s11 = scalar_lea.vmem %s24_s25, 65536  ;;  %p9834_p6 = scmp.lt.s32.totalorder %s24_s25, %s24_s25 }
  0x2b   :  { %p9830_p5 = scmp.ne.s32.totalorder %s24_s25, %s9829_s11  ;;  %p9835_p7 = scmp.lt.s32.totalorder %s9829_s11, %s9829_s11 }
  0x2d   :  { %p9836_p8 = por %p9835_p7, %p9834_p6 }
  0x2f   :  { %p9837_p9 = pnand %p9836_p8, %p9830_p5 }
  0x31   :  { %9840 = shalt.err (!%p9837_p9)
}
  0x32   :  { %s9918_s4 = smov 512   ;;  %s9919_s27 = smov 32  }
  0x33   :  { %29 = dma.hbm_to_vmem [thread:$0]  %s10264_s1, 65536, %s24_s25, [#allocation3], %s9918_s4, %s9918_s4, %s9919_s27  }
  0x34   :  { %s9920_s14 = smov [#allocation6]   ;;  %s9921_s16 = smov [#allocation9]  }
  0x35   :  { %s45_s15 = sshll.u32 %s9920_s14, 4  ;;  %s67_s17 = sshll.u32 %s9921_s16, 4  ;;  %s46_s15 = int_to_ptr.vmem [resolvable:$true] %s45_s15  ;;  %s68_s17 = int_to_ptr.vmem [resolvable:$true] %s67_s17 }
  0x36   :  { %s9841_s20 = scalar_lea.hbm %s10266_s3, 65536 }
  0x37   :  { %p9842_p10 = scmp.ne.s32.totalorder %s10266_s3, %s9841_s20  ;;  %p9845_p11 = scmp.lt.u32.totalorder %s9841_s20, %s10266_s3 }
  0x39   :  { %p9847_p12 = pnand %p9845_p11, %p9842_p10 }
  0x3b   :  { %9850 = shalt.err (!%p9847_p12)
}
  0x3c   :  { %s9851_s1 = scalar_lea.vmem %s46_s15, 65536  ;;  %p9856_p0 = scmp.lt.s32.totalorder %s46_s15, %s46_s15 }
  0x3d   :  { %p9852_p13 = scmp.ne.s32.totalorder %s46_s15, %s9851_s1  ;;  %p9857_p1 = scmp.lt.s32.totalorder %s9851_s1, %s9851_s1 }
  0x3f   :  { %p9858_p2 = por %p9857_p1, %p9856_p0 }
  0x41   :  { %p9859_p3 = pnand %p9858_p2, %p9852_p13 }
  0x43   :  { %9862 = shalt.err (!%p9859_p3)
}
  0x44   :  { %51 = dma.hbm_to_vmem [thread:$0]  %s10266_s3, 65536, %s46_s15, [#allocation5], %s9918_s4, %s9918_s4, %s9919_s27  }
  0x45   :  { %s9863_s29 = scalar_lea.hbm %s10268_s5, 8192 }
  0x46   :  { %p9864_p4 = scmp.ne.s32.totalorder %s10268_s5, %s9863_s29  ;;  %p9867_p5 = scmp.lt.u32.totalorder %s9863_s29, %s10268_s5 }
  0x48   :  { %p9869_p6 = pnand %p9867_p5, %p9864_p4 }
  0x4a   :  { %9872 = shalt.err (!%p9869_p6)
}
  0x4b   :  { %s9873_s11 = scalar_lea.vmem %s68_s17, 8192  ;;  %p9878_p8 = scmp.lt.s32.totalorder %s68_s17, %s68_s17 }
  0x4c   :  { %p9874_p7 = scmp.ne.s32.totalorder %s68_s17, %s9873_s11  ;;  %p9879_p9 = scmp.lt.s32.totalorder %s9873_s11, %s9873_s11 }
  0x4e   :  { %p9880_p10 = por %p9879_p9, %p9878_p8 }
  0x50   :  { %p9881_p11 = pnand %p9880_p10, %p9874_p7 }
  0x52   :  { %9884 = shalt.err (!%p9881_p11)
}
  0x53   :  { %s9922_s3 = smov 64   ;;  %s9923_s4 = smov 4  }
  0x54   :  { %73 = dma.hbm_to_vmem [thread:$0]  %s10268_s5, 8192, %s68_s17, [#allocation8], %s9922_s3, %s9922_s3, %s9923_s4  }
  0x55   :  { %s9924_s13 = smov [#allocation10]   ;;  %s9885_s18 = scalar_lea.hbm %s10269_s6, 16 }
  0x56   :  { %s80_s14 = sshll.u32 %s9924_s13, 4  ;;  %p9886_p12 = scmp.ne.s32.totalorder %s10269_s6, %s9885_s18  ;;  %s81_s14 = int_to_ptr.vmem [resolvable:$true] %s80_s14 }
  0x57   :  { %p9889_p13 = scmp.lt.u32.totalorder %s9885_s18, %s10269_s6 }
  0x59   :  { %p9891_p0 = pnand %p9889_p13, %p9886_p12 }
  0x5b   :  { %9894 = shalt.err (!%p9891_p0)
}
  0x5c   :  { %s9895_s2 = scalar_lea.vmem %s81_s14, 16  ;;  %s9899_s5 = scalar_lea.vmem %s81_s14, 32 }
  0x5d   :  { %p9896_p1 = scmp.ne.s32.totalorder %s81_s14, %s9895_s2  ;;  %p9900_p2 = scmp.lt.s32.totalorder %s81_s14, %s81_s14 }
  0x5e   :  { %p9901_p3 = scmp.lt.s32.totalorder %s9899_s5, %s9895_s2 }
  0x60   :  { %p9902_p4 = por %p9901_p3, %p9900_p2 }
  0x62   :  { %p9903_p5 = pnand %p9902_p4, %p9896_p1 }
  0x64   :  { %9906 = shalt.err (!%p9903_p5)
}
  0x65   :  { %83 = dma.hbm_to_vmem [thread:$0]  %s10269_s6, 16, %s81_s14, [#allocation11]  }
  0x66   :  { %9907 = dma.done.wait [#allocation3], 65536  }
  0x67   :  { %9908 = vsyncadd [#allocation3], 4294901760 }
  0x68   :  { %9909 = dma.done.wait [#allocation5], 65664  }
  0x69   :  { %9910 = vsyncadd [#allocation5], 4294901632 }
  0x6a   :  { %9911 = dma.done.wait [#allocation8], 8320  }
  0x6b   :  { %9912 = vsyncadd [#allocation8], 4294958976 }
  0x6c   :  { %9913 = dma.done.wait [#allocation11], 16  }
  0x6d   :  { %9914 = vsyncadd [#allocation11], 4294967280  ;;  %v107_v0 = vld [vmem:[#allocation2] sm:$0xff]  ;;  %v108_v2 = vld [vmem:[#allocation2 + $0x8] sm:$0xff] }
  0x6e   :  { %v111_v1 = vld [vmem:[#allocation2 + $0x20] sm:$0xff]  ;;  %v112_v4 = vld [vmem:[#allocation2 + $0x28] sm:$0xff] }
  0x6f   :  { %v8404_v3 = vcombine.high %v107_v0, %v111_v1  ;;  %v8403_v5 = vcombine.low %v107_v0, %v111_v1  ;;  %v115_v6 = vld [vmem:[#allocation2 + $0x40] sm:$0xff]  ;;  %v8406_v8 = vcombine.high %v108_v2, %v112_v4  ;;  %v8405_v9 = vcombine.low %v108_v2, %v112_v4  ;;  %v116_v11 = vld [vmem:[#allocation2 + $0x48] sm:$0xff] }
  0x70   :  { %v119_v7 = vld [vmem:[#allocation2 + $0x60] sm:$0xff]  ;;  %v120_v12 = vld [vmem:[#allocation2 + $0x68] sm:$0xff] }
  0x71   :  { %v8412_v10 = vcombine.high %v115_v6, %v119_v7  ;;  %v123_v13 = vld [vmem:[#allocation2 + $0x80] sm:$0xff]  ;;  %3249 = vmatprep.subr.bf16.mxu0 %v8404_v3  ;;  %v8414_v14 = vcombine.high %v116_v11, %v120_v12  ;;  %v124_v16 = vld [vmem:[#allocation2 + $0x88] sm:$0xff]  ;;  %3413 = vmatprep.subr.bf16.mxu1 %v8406_v8  ;;  %v8411_v18 = vcombine.low %v115_v6, %v119_v7 }
  0x72   :  { %v127_v15 = vld [vmem:[#allocation2 + $0xa0] sm:$0xff]  ;;  %v128_v17 = vld [vmem:[#allocation2 + $0xa8] sm:$0xff]  ;;  %3250 = vmatpush1.bf16.msra.mxu0 %v8403_v5  ;;  %3414 = vmatpush1.bf16.msra.mxu1 %v8405_v9  ;;  %v8413_v19 = vcombine.low %v116_v11, %v120_v12 }
  0x73   :  { %3251 = vmatprep.subr.bf16.mxu0 %v8412_v10  ;;  %v8420_v20 = vcombine.high %v123_v13, %v127_v15  ;;  %3415 = vmatprep.subr.bf16.mxu1 %v8414_v14  ;;  %v8422_v21 = vcombine.high %v124_v16, %v128_v17  ;;  %v131_v22 = vld [vmem:[#allocation2 + $0xc0] sm:$0xff]  ;;  %v132_v24 = vld [vmem:[#allocation2 + $0xc8] sm:$0xff]  ;;  %v8419_v26 = vcombine.low %v123_v13, %v127_v15 }
  0x74   :  { %v135_v23 = vld [vmem:[#allocation2 + $0xe0] sm:$0xff]  ;;  %v136_v25 = vld [vmem:[#allocation2 + $0xe8] sm:$0xff]  ;;  %v8421_v27 = vcombine.low %v124_v16, %v128_v17 }
  0x75   :  { %v8428_v28 = vcombine.high %v131_v22, %v135_v23  ;;  %v8430_v29 = vcombine.high %v132_v24, %v136_v25  ;;  %v139_v30 = vld [vmem:[#allocation2 + $0x100] sm:$0xff]  ;;  %v140_v32 = vld [vmem:[#allocation2 + $0x108] sm:$0xff]  ;;  %v8427_v34 = vcombine.low %v131_v22, %v135_v23  ;;  %v8429_v35 = vcombine.low %v132_v24, %v136_v25 }
  0x76   :  { %3252 = vmatpush1.bf16.msra.mxu0 %v8411_v18  ;;  %3416 = vmatpush1.bf16.msra.mxu1 %v8413_v19  ;;  %v143_v31 = vld [vmem:[#allocation2 + $0x120] sm:$0xff]  ;;  %v144_v33 = vld [vmem:[#allocation2 + $0x128] sm:$0xff] }
  0x77   :  { %3253 = vmatprep.subr.bf16.mxu0 %v8420_v20  ;;  %3417 = vmatprep.subr.bf16.mxu1 %v8422_v21  ;;  %v8436_v36 = vcombine.high %v139_v30, %v143_v31  ;;  %v8438_v37 = vcombine.high %v140_v32, %v144_v33  ;;  %v147_v38 = vld [vmem:[#allocation2 + $0x140] sm:$0xff]  ;;  %v148_v40 = vld [vmem:[#allocation2 + $0x148] sm:$0xff]  ;;  %v8435_v42 = vcombine.low %v139_v30, %v143_v31 }
  0x78   :  { %v151_v39 = vld [vmem:[#allocation2 + $0x160] sm:$0xff]  ;;  %v152_v41 = vld [vmem:[#allocation2 + $0x168] sm:$0xff]  ;;  %v8437_v43 = vcombine.low %v140_v32, %v144_v33 }
  0x79   :  { %v8444_v44 = vcombine.high %v147_v38, %v151_v39  ;;  %v8446_v45 = vcombine.high %v148_v40, %v152_v41  ;;  %v155_v46 = vld [vmem:[#allocation2 + $0x180] sm:$0xff]  ;;  %v156_v48 = vld [vmem:[#allocation2 + $0x188] sm:$0xff]  ;;  %v8443_v50 = vcombine.low %v147_v38, %v151_v39  ;;  %v8445_v51 = vcombine.low %v148_v40, %v152_v41 }
  0x7a   :  { %3254 = vmatpush1.bf16.msra.mxu0 %v8419_v26  ;;  %3418 = vmatpush1.bf16.msra.mxu1 %v8421_v27  ;;  %v159_v47 = vld [vmem:[#allocation2 + $0x1a0] sm:$0xff]  ;;  %v160_v49 = vld [vmem:[#allocation2 + $0x1a8] sm:$0xff] }
  0x7b   :  { %3255 = vmatprep.subr.bf16.mxu0 %v8428_v28  ;;  %3419 = vmatprep.subr.bf16.mxu1 %v8430_v29  ;;  %v8452_v52 = vcombine.high %v155_v46, %v159_v47  ;;  %v10040_v53 = vld [vmem:[%s10263_s0] sm:$0xff]  ;;  %v8454_v54 = vcombine.high %v156_v48, %v160_v49  ;;  %v164_v58 = vld [vmem:[#allocation2 + $0x1c8] sm:$0xff]  ;;  %v8451_v60 = vcombine.low %v155_v46, %v159_v47 }
  0x7c   :  { %v163_v55 = vld [vmem:[#allocation2 + $0x1c0] sm:$0xff]  ;;  %v10044_v57 = vcombine.high %v10040_v53, %v10040_v53  ;;  %v168_v59 = vld [vmem:[#allocation2 + $0x1e8] sm:$0xff]  ;;  %v8453_v61 = vcombine.low %v156_v48, %v160_v49 }
  0x7d   :  { %v167_v56 = vld [vmem:[#allocation2 + $0x1e0] sm:$0xff]  ;;  %v8462_v63 = vcombine.high %v164_v58, %v168_v59  ;;  %v172_v2 = vld [vmem:[#allocation2 + $0x208] sm:$0xff]  ;;  %v8461_v5 = vcombine.low %v164_v58, %v168_v59 }
  0x7e   :  { %3256 = vmatpush1.bf16.msra.mxu0 %v8427_v34  ;;  %3420 = vmatpush1.bf16.msra.mxu1 %v8429_v35  ;;  %v8460_v62 = vcombine.high %v163_v55, %v167_v56  ;;  %v171_v0 = vld [vmem:[#allocation2 + $0x200] sm:$0xff]  ;;  %v176_v3 = vld [vmem:[#allocation2 + $0x228] sm:$0xff]  ;;  %v8459_v4 = vcombine.low %v163_v55, %v167_v56 }
  0x7f   :  { %3257 = vmatprep.subr.bf16.mxu0 %v8436_v36  ;;  %3421 = vmatprep.subr.bf16.mxu1 %v8438_v37  ;;  %v175_v1 = vld [vmem:[#allocation2 + $0x220] sm:$0xff]  ;;  %v8470_v7 = vcombine.high %v172_v2, %v176_v3  ;;  %v180_v10 = vld [vmem:[#allocation2 + $0x248] sm:$0xff]  ;;  %v8469_v13 = vcombine.low %v172_v2, %v176_v3 }
  0x80   :  { %3281 = vmatprep.mubr.bf16.mxu0 %v10044_v57  ;;  %3445 = vmatprep.mubr.bf16.mxu1 %v10044_v57  ;;  %v8468_v6 = vcombine.high %v171_v0, %v175_v1  ;;  %v179_v8 = vld [vmem:[#allocation2 + $0x240] sm:$0xff]  ;;  %v184_v11 = vld [vmem:[#allocation2 + $0x268] sm:$0xff]  ;;  %v8467_v12 = vcombine.low %v171_v0, %v175_v1 }
  0x81   :  { %v183_v9 = vld [vmem:[#allocation2 + $0x260] sm:$0xff]  ;;  %v8478_v15 = vcombine.high %v180_v10, %v184_v11  ;;  %v188_v18 = vld [vmem:[#allocation2 + $0x288] sm:$0xff]  ;;  %v8477_v21 = vcombine.low %v180_v10, %v184_v11 }
  0x82   :  { %3258 = vmatpush1.bf16.msra.mxu0 %v8435_v42  ;;  %3422 = vmatpush1.bf16.msra.mxu1 %v8437_v43  ;;  %v8476_v14 = vcombine.high %v179_v8, %v183_v9  ;;  %v187_v16 = vld [vmem:[#allocation2 + $0x280] sm:$0xff]  ;;  %v192_v19 = vld [vmem:[#allocation2 + $0x2a8] sm:$0xff]  ;;  %v8475_v20 = vcombine.low %v179_v8, %v183_v9 }
  0x83   :  { %3259 = vmatprep.subr.bf16.mxu0 %v8444_v44  ;;  %3423 = vmatprep.subr.bf16.mxu1 %v8446_v45  ;;  %v191_v17 = vld [vmem:[#allocation2 + $0x2a0] sm:$0xff]  ;;  %v8486_v23 = vcombine.high %v188_v18, %v192_v19  ;;  %v196_v26 = vld [vmem:[#allocation2 + $0x2c8] sm:$0xff]  ;;  %v8485_v29 = vcombine.low %v188_v18, %v192_v19 }
  0x84   :  { %v8484_v22 = vcombine.high %v187_v16, %v191_v17  ;;  %v195_v24 = vld [vmem:[#allocation2 + $0x2c0] sm:$0xff]  ;;  %v200_v27 = vld [vmem:[#allocation2 + $0x2e8] sm:$0xff]  ;;  %v8483_v28 = vcombine.low %v187_v16, %v191_v17 }
  0x85   :  { %v199_v25 = vld [vmem:[#allocation2 + $0x2e0] sm:$0xff]  ;;  %v8494_v31 = vcombine.high %v196_v26, %v200_v27  ;;  %v204_v34 = vld [vmem:[#allocation2 + $0x308] sm:$0xff]  ;;  %v8493_v37 = vcombine.low %v196_v26, %v200_v27 }
  0x86   :  { %3260 = vmatpush1.bf16.msra.mxu0 %v8443_v50  ;;  %3424 = vmatpush1.bf16.msra.mxu1 %v8445_v51  ;;  %v8492_v30 = vcombine.high %v195_v24, %v199_v25  ;;  %v203_v32 = vld [vmem:[#allocation2 + $0x300] sm:$0xff]  ;;  %v208_v35 = vld [vmem:[#allocation2 + $0x328] sm:$0xff]  ;;  %v8491_v36 = vcombine.low %v195_v24, %v199_v25 }
  0x87   :  { %3261 = vmatprep.subr.bf16.mxu0 %v8452_v52  ;;  %3425 = vmatprep.subr.bf16.mxu1 %v8454_v54  ;;  %v207_v33 = vld [vmem:[#allocation2 + $0x320] sm:$0xff]  ;;  %v8502_v39 = vcombine.high %v204_v34, %v208_v35  ;;  %v212_v42 = vld [vmem:[#allocation2 + $0x348] sm:$0xff]  ;;  %v8501_v45 = vcombine.low %v204_v34, %v208_v35 }
  0x88   :  { %v8500_v38 = vcombine.high %v203_v32, %v207_v33  ;;  %v211_v40 = vld [vmem:[#allocation2 + $0x340] sm:$0xff]  ;;  %v216_v43 = vld [vmem:[#allocation2 + $0x368] sm:$0xff]  ;;  %v8499_v44 = vcombine.low %v203_v32, %v207_v33 }
  0x89   :  { %v215_v41 = vld [vmem:[#allocation2 + $0x360] sm:$0xff]  ;;  %v8510_v47 = vcombine.high %v212_v42, %v216_v43  ;;  %v220_v50 = vld [vmem:[#allocation2 + $0x388] sm:$0xff]  ;;  %v8509_v54 = vcombine.low %v212_v42, %v216_v43 }
  0x8a   :  { %3262 = vmatpush1.bf16.msra.mxu0 %v8451_v60  ;;  %3426 = vmatpush1.bf16.msra.mxu1 %v8453_v61  ;;  %v8508_v46 = vcombine.high %v211_v40, %v215_v41  ;;  %v219_v48 = vld [vmem:[#allocation2 + $0x380] sm:$0xff]  ;;  %v224_v51 = vld [vmem:[#allocation2 + $0x3a8] sm:$0xff]  ;;  %v8507_v52 = vcombine.low %v211_v40, %v215_v41 }
  0x8b   :  { %3263 = vmatprep.subr.bf16.mxu0 %v8460_v62  ;;  %3427 = vmatprep.subr.bf16.mxu1 %v8462_v63  ;;  %v223_v49 = vld [vmem:[#allocation2 + $0x3a0] sm:$0xff]  ;;  %v8518_v56 = vcombine.high %v220_v50, %v224_v51  ;;  %v228_v60 = vld [vmem:[#allocation2 + $0x3c8] sm:$0xff]  ;;  %v8517_v63 = vcombine.low %v220_v50, %v224_v51 }
  0x8c   :  { %v8516_v55 = vcombine.high %v219_v48, %v223_v49  ;;  %v227_v58 = vld [vmem:[#allocation2 + $0x3c0] sm:$0xff]  ;;  %v232_v61 = vld [vmem:[#allocation2 + $0x3e8] sm:$0xff]  ;;  %v8515_v62 = vcombine.low %v219_v48, %v223_v49 }
  0x8d   :  { %v231_v59 = vld [vmem:[#allocation2 + $0x3e0] sm:$0xff]  ;;  %v8526_v1 = vcombine.high %v228_v60, %v232_v61 }
  0x8e   :  { %3264 = vmatpush1.bf16.msra.mxu0 %v8459_v4  ;;  %3428 = vmatpush1.bf16.msra.mxu1 %v8461_v5  ;;  %v8524_v0 = vcombine.high %v227_v58, %v231_v59  ;;  %v235_v2 = vld [vmem:[#allocation2 + $0x400] sm:$0xff]  ;;  %v236_v4 = vld [vmem:[#allocation2 + $0x408] sm:$0xff] }
  0x8f   :  { %3265 = vmatprep.subr.bf16.mxu0 %v8468_v6  ;;  %3429 = vmatprep.subr.bf16.mxu1 %v8470_v7  ;;  %v239_v3 = vld [vmem:[#allocation2 + $0x420] sm:$0xff]  ;;  %v240_v5 = vld [vmem:[#allocation2 + $0x428] sm:$0xff]  ;;  %v8523_v6 = vcombine.low %v227_v58, %v231_v59  ;;  %v8525_v7 = vcombine.low %v228_v60, %v232_v61 }
  0x90   :  { %v8532_v8 = vcombine.high %v235_v2, %v239_v3  ;;  %v8534_v9 = vcombine.high %v236_v4, %v240_v5  ;;  %v243_v10 = vld [vmem:[#allocation2 + $0x440] sm:$0xff]  ;;  %v8531_v16 = vcombine.low %v235_v2, %v239_v3  ;;  %v8533_v17 = vcombine.low %v236_v4, %v240_v5 }
  0x91   :  { %v247_v11 = vld [vmem:[#allocation2 + $0x460] sm:$0xff] }
  0x92   :  { %3266 = vmatpush1.bf16.msra.mxu0 %v8467_v12  ;;  %3430 = vmatpush1.bf16.msra.mxu1 %v8469_v13  ;;  %v10050_v12 = vcombine.low %v10040_v53, %v10040_v53  ;;  %v244_v13 = vld [vmem:[#allocation2 + $0x448] sm:$0xff]  ;;  %v8540_v18 = vcombine.high %v243_v10, %v247_v11  ;;  %v251_v19 = vld [vmem:[#allocation2 + $0x480] sm:$0xff]  ;;  %v8539_v24 = vcombine.low %v243_v10, %v247_v11 }
  0x93   :  { %3267 = vmatprep.subr.bf16.mxu0 %v8476_v14  ;;  %3431 = vmatprep.subr.bf16.mxu1 %v8478_v15  ;;  %v248_v14 = vld [vmem:[#allocation2 + $0x468] sm:$0xff]  ;;  %v259_v27 = vld [vmem:[#allocation2 + $0x4c0] sm:$0xff] }
  0x94   :  { %v10055_v15 = vld [vmem:[%s10263_s0 + $0x8] sm:$0xff]  ;;  %v8541_v25 = vcombine.low %v244_v13, %v248_v14  ;;  %v267_v35 = vld [vmem:[#allocation2 + $0x500] sm:$0xff] }
  0x95   :  { %v256_v53 = vld [vmem:[#allocation2 + $0x4a8] sm:$0xff]  ;;  %v275_v43 = vld [vmem:[#allocation2 + $0x540] sm:$0xff] }
  0x96   :  { %3268 = vmatpush1.bf16.msra.mxu0 %v8475_v20  ;;  %3432 = vmatpush1.bf16.msra.mxu1 %v8477_v21  ;;  %v255_v20 = vld [vmem:[#allocation2 + $0x4a0] sm:$0xff]  ;;  %v8542_v21 = vcombine.high %v244_v13, %v248_v14 }
  0x97   :  { %3269 = vmatprep.subr.bf16.mxu0 %v8484_v22  ;;  %3433 = vmatprep.subr.bf16.mxu1 %v8486_v23  ;;  %v252_v22 = vld [vmem:[#allocation2 + $0x488] sm:$0xff]  ;;  %v10059_v23 = vcombine.high %v10055_v15, %v10055_v15  ;;  %v8548_v26 = vcombine.high %v251_v19, %v255_v20  ;;  %v8547_v32 = vcombine.low %v251_v19, %v255_v20  ;;  %v283_v51 = vld [vmem:[#allocation2 + $0x580] sm:$0xff] }
  0x98   :  { %v8549_v33 = vcombine.low %v252_v22, %v256_v53  ;;  %v291_v61 = vld [vmem:[#allocation2 + $0x5c0] sm:$0xff]  ;;  %v312_v19 = vld [vmem:[#allocation2 + $0x668] sm:$0xff] }
  0x99   :  { %v299_v5 = vld [vmem:[#allocation2 + $0x600] sm:$0xff] }
  0x9a   :  { %3270 = vmatpush1.bf16.msra.mxu0 %v8483_v28  ;;  %3434 = vmatpush1.bf16.msra.mxu1 %v8485_v29  ;;  %v263_v28 = vld [vmem:[#allocation2 + $0x4e0] sm:$0xff]  ;;  %v260_v29 = vld [vmem:[#allocation2 + $0x4c8] sm:$0xff] }
  0x9b   :  { %3271 = vmatprep.subr.bf16.mxu0 %v8492_v30  ;;  %3435 = vmatprep.subr.bf16.mxu1 %v8494_v31  ;;  %v8550_v30 = vcombine.high %v252_v22, %v256_v53  ;;  %v264_v31 = vld [vmem:[#allocation2 + $0x4e8] sm:$0xff]  ;;  %v8556_v34 = vcombine.high %v259_v27, %v263_v28  ;;  %v8555_v40 = vcombine.low %v259_v27, %v263_v28  ;;  %v307_v14 = vld [vmem:[#allocation2 + $0x640] sm:$0xff] }
  0x9c   :  { %v8557_v41 = vcombine.low %v260_v29, %v264_v31  ;;  %v315_v53 = vld [vmem:[#allocation2 + $0x680] sm:$0xff]  ;;  %v320_v27 = vld [vmem:[#allocation2 + $0x6a8] sm:$0xff] }
  0x9e   :  { %3272 = vmatpush1.bf16.msra.mxu0 %v8491_v36  ;;  %3436 = vmatpush1.bf16.msra.mxu1 %v8493_v37  ;;  %v271_v36 = vld [vmem:[#allocation2 + $0x520] sm:$0xff]  ;;  %v268_v37 = vld [vmem:[#allocation2 + $0x508] sm:$0xff] }
  0x9f   :  { %3273 = vmatprep.subr.bf16.mxu0 %v8500_v38  ;;  %3437 = vmatprep.subr.bf16.mxu1 %v8502_v39  ;;  %v8558_v38 = vcombine.high %v260_v29, %v264_v31  ;;  %v272_v39 = vld [vmem:[#allocation2 + $0x528] sm:$0xff]  ;;  %v8564_v42 = vcombine.high %v267_v35, %v271_v36  ;;  %v8563_v48 = vcombine.low %v267_v35, %v271_v36  ;;  %v323_v31 = vld [vmem:[#allocation2 + $0x6c0] sm:$0xff] }
  0xa0   :  { %v8565_v49 = vcombine.low %v268_v37, %v272_v39  ;;  %v328_v35 = vld [vmem:[#allocation2 + $0x6e8] sm:$0xff] }
  0xa2   :  { %3274 = vmatpush1.bf16.msra.mxu0 %v8499_v44  ;;  %3438 = vmatpush1.bf16.msra.mxu1 %v8501_v45  ;;  %v279_v44 = vld [vmem:[#allocation2 + $0x560] sm:$0xff]  ;;  %v276_v45 = vld [vmem:[#allocation2 + $0x548] sm:$0xff] }
  0xa3   :  { %3275 = vmatprep.subr.bf16.mxu0 %v8508_v46  ;;  %3439 = vmatprep.subr.bf16.mxu1 %v8510_v47  ;;  %v8566_v46 = vcombine.high %v268_v37, %v272_v39  ;;  %v280_v47 = vld [vmem:[#allocation2 + $0x568] sm:$0xff]  ;;  %v8572_v50 = vcombine.high %v275_v43, %v279_v44  ;;  %v8571_v58 = vcombine.low %v275_v43, %v279_v44  ;;  %v331_v39 = vld [vmem:[#allocation2 + $0x700] sm:$0xff] }
  0xa4   :  { %v8573_v59 = vcombine.low %v276_v45, %v280_v47  ;;  %v336_v43 = vld [vmem:[#allocation2 + $0x728] sm:$0xff] }
  0xa6   :  { %3276 = vmatpush1.bf16.msra.mxu0 %v8507_v52  ;;  %3440 = vmatpush1.bf16.msra.mxu1 %v8509_v54  ;;  %v287_v52 = vld [vmem:[#allocation2 + $0x5a0] sm:$0xff]  ;;  %v284_v54 = vld [vmem:[#allocation2 + $0x588] sm:$0xff] }
  0xa7   :  { %3277 = vmatprep.subr.bf16.mxu0 %v8516_v55  ;;  %3441 = vmatprep.subr.bf16.mxu1 %v8518_v56  ;;  %v8574_v55 = vcombine.high %v276_v45, %v280_v47  ;;  %v288_v56 = vld [vmem:[#allocation2 + $0x5a8] sm:$0xff]  ;;  %v8580_v60 = vcombine.high %v283_v51, %v287_v52  ;;  %v8579_v2 = vcombine.low %v283_v51, %v287_v52  ;;  %v339_v47 = vld [vmem:[#allocation2 + $0x740] sm:$0xff] }
  0xa8   :  { %v8581_v3 = vcombine.low %v284_v54, %v288_v56  ;;  %v344_v51 = vld [vmem:[#allocation2 + $0x768] sm:$0xff] }
  0xaa   :  { %3278 = vmatpush1.bf16.msra.mxu0 %v8515_v62  ;;  %3442 = vmatpush1.bf16.msra.mxu1 %v8517_v63  ;;  %v295_v62 = vld [vmem:[#allocation2 + $0x5e0] sm:$0xff]  ;;  %v292_v63 = vld [vmem:[#allocation2 + $0x5c8] sm:$0xff] }
  0xab   :  { %3279 = vmatprep.subr.bf16.mxu0 %v8524_v0  ;;  %3443 = vmatprep.subr.bf16.mxu1 %v8526_v1  ;;  %v8582_v0 = vcombine.high %v284_v54, %v288_v56  ;;  %v296_v1 = vld [vmem:[#allocation2 + $0x5e8] sm:$0xff]  ;;  %v8588_v4 = vcombine.high %v291_v61, %v295_v62  ;;  %v8587_v10 = vcombine.low %v291_v61, %v295_v62  ;;  %v347_v56 = vld [vmem:[#allocation2 + $0x780] sm:$0xff] }
  0xac   :  { %v8589_v11 = vcombine.low %v292_v63, %v296_v1  ;;  %v352_v61 = vld [vmem:[#allocation2 + $0x7a8] sm:$0xff] }
  0xae   :  { %3280 = vmatpush1.bf16.msra.mxu0 %v8523_v6  ;;  %3444 = vmatpush1.bf16.msra.mxu1 %v8525_v7  ;;  %v303_v6 = vld [vmem:[#allocation2 + $0x620] sm:$0xff]  ;;  %v300_v7 = vld [vmem:[#allocation2 + $0x608] sm:$0xff] }
  0xaf   :  { %3290 = vmatprep.subr.bf16.mxu0 %v8532_v8  ;;  %3454 = vmatprep.subr.bf16.mxu1 %v8534_v9  ;;  %v8590_v8 = vcombine.high %v292_v63, %v296_v1  ;;  %v304_v9 = vld [vmem:[#allocation2 + $0x628] sm:$0xff]  ;;  %v8596_v13 = vcombine.high %v299_v5, %v303_v6  ;;  %v8595_v20 = vcombine.low %v299_v5, %v303_v6  ;;  %v355_v1 = vld [vmem:[#allocation2 + $0x7c0] sm:$0xff] }
  0xb0   :  { %v360_v5 = vld [vmem:[#allocation2 + $0x7e8] sm:$0xff] }
  0xb1   :  { %3282 = vmatmul.mubr.bf16.vlgmr.msra.gmra.mrb[0].mxu0 %v10050_v12  ;;  %3446 = vmatmul.mubr.bf16.vlgmr.msra.gmra.mrb[0].mxu1 %v10050_v12 }
  0xb2   :  { %3291 = vmatpush1.bf16.msra.mxu0 %v8531_v16  ;;  %3455 = vmatpush1.bf16.msra.mxu1 %v8533_v17  ;;  %v311_v16 = vld [vmem:[#allocation2 + $0x660] sm:$0xff]  ;;  %v308_v17 = vld [vmem:[#allocation2 + $0x648] sm:$0xff] }
  0xb3   :  { %3292 = vmatprep.subr.bf16.mxu0 %v8540_v18  ;;  %3456 = vmatprep.subr.bf16.mxu1 %v8542_v21  ;;  %v8598_v18 = vcombine.high %v300_v7, %v304_v9  ;;  %v8597_v21 = vcombine.low %v300_v7, %v304_v9  ;;  %v8604_v22 = vcombine.high %v307_v14, %v311_v16  ;;  %v363_v9 = vld [vmem:[#allocation2 + $0x800] sm:$0xff] }
  0xb4   :  { %3322 = vmatprep.mubr.bf16.mxu0 %v10059_v23  ;;  %3486 = vmatprep.mubr.bf16.mxu1 %v10059_v23  ;;  %v8603_v28 = vcombine.low %v307_v14, %v311_v16  ;;  %v8605_v29 = vcombine.low %v308_v17, %v312_v19  ;;  %v368_v14 = vld [vmem:[#allocation2 + $0x828] sm:$0xff] }
  0xb6   :  { %3293 = vmatpush1.bf16.msra.mxu0 %v8539_v24  ;;  %3457 = vmatpush1.bf16.msra.mxu1 %v8541_v25  ;;  %v319_v24 = vld [vmem:[#allocation2 + $0x6a0] sm:$0xff]  ;;  %v316_v25 = vld [vmem:[#allocation2 + $0x688] sm:$0xff] }
  0xb7   :  { %3294 = vmatprep.subr.bf16.mxu0 %v8548_v26  ;;  %3458 = vmatprep.subr.bf16.mxu1 %v8550_v30  ;;  %v8606_v26 = vcombine.high %v308_v17, %v312_v19  ;;  %v8612_v30 = vcombine.high %v315_v53, %v319_v24  ;;  %v8611_v36 = vcombine.low %v315_v53, %v319_v24  ;;  %v371_v17 = vld [vmem:[#allocation2 + $0x840] sm:$0xff]  ;;  %v10068_v24 = vld [vmem:[%s10263_s0 + $0x10] sm:$0xff] }
  0xb8   :  { %v8613_v37 = vcombine.low %v316_v25, %v320_v27 }
  0xba   :  { %3295 = vmatpush1.bf16.msra.mxu0 %v8547_v32  ;;  %3459 = vmatpush1.bf16.msra.mxu1 %v8549_v33  ;;  %v327_v32 = vld [vmem:[#allocation2 + $0x6e0] sm:$0xff]  ;;  %v324_v33 = vld [vmem:[#allocation2 + $0x6c8] sm:$0xff] }
  0xbb   :  { %3296 = vmatprep.subr.bf16.mxu0 %v8556_v34  ;;  %3460 = vmatprep.subr.bf16.mxu1 %v8558_v38  ;;  %v8614_v34 = vcombine.high %v316_v25, %v320_v27  ;;  %v8620_v38 = vcombine.high %v323_v31, %v327_v32  ;;  %v8619_v44 = vcombine.low %v323_v31, %v327_v32  ;;  %v383_v31 = vld [vmem:[#allocation2 + $0x8a0] sm:$0xff] }
  0xbc   :  { %v8621_v45 = vcombine.low %v324_v33, %v328_v35  ;;  %v10072_v25 = vcombine.low %v10055_v15, %v10055_v15  ;;  %v10076_v32 = vcombine.high %v10068_v24, %v10068_v24 }
  0xbe   :  { %3297 = vmatpush1.bf16.msra.mxu0 %v8555_v40  ;;  %3461 = vmatpush1.bf16.msra.mxu1 %v8557_v41  ;;  %v335_v40 = vld [vmem:[#allocation2 + $0x720] sm:$0xff]  ;;  %v332_v41 = vld [vmem:[#allocation2 + $0x708] sm:$0xff] }
  0xbf   :  { %3298 = vmatprep.subr.bf16.mxu0 %v8564_v42  ;;  %3462 = vmatprep.subr.bf16.mxu1 %v8566_v46  ;;  %v8622_v42 = vcombine.high %v324_v33, %v328_v35  ;;  %v8628_v46 = vcombine.high %v331_v39, %v335_v40  ;;  %v8627_v52 = vcombine.low %v331_v39, %v335_v40  ;;  %v380_v33 = vld [vmem:[#allocation2 + $0x888] sm:$0xff]  ;;  %v391_v39 = vld [vmem:[#allocation2 + $0x8e0] sm:$0xff] }
  0xc0   :  { %v8629_v54 = vcombine.low %v332_v41, %v336_v43  ;;  %v388_v40 = vld [vmem:[#allocation2 + $0x8c8] sm:$0xff] }
  0xc2   :  { %3299 = vmatpush1.bf16.msra.mxu0 %v8563_v48  ;;  %3463 = vmatpush1.bf16.msra.mxu1 %v8565_v49  ;;  %v343_v48 = vld [vmem:[#allocation2 + $0x760] sm:$0xff]  ;;  %v340_v49 = vld [vmem:[#allocation2 + $0x748] sm:$0xff] }
  0xc3   :  { %3300 = vmatprep.subr.bf16.mxu0 %v8572_v50  ;;  %3464 = vmatprep.subr.bf16.mxu1 %v8574_v55  ;;  %v8630_v50 = vcombine.high %v332_v41, %v336_v43  ;;  %v8636_v55 = vcombine.high %v339_v47, %v343_v48  ;;  %v8635_v62 = vcombine.low %v339_v47, %v343_v48  ;;  %v392_v41 = vld [vmem:[#allocation2 + $0x8e8] sm:$0xff]  ;;  %v399_v47 = vld [vmem:[#allocation2 + $0x920] sm:$0xff] }
  0xc4   :  { %v8637_v63 = vcombine.low %v340_v49, %v344_v51  ;;  %v396_v48 = vld [vmem:[#allocation2 + $0x908] sm:$0xff] }
  0xc6   :  { %3301 = vmatpush1.bf16.msra.mxu0 %v8571_v58  ;;  %3465 = vmatpush1.bf16.msra.mxu1 %v8573_v59  ;;  %v351_v58 = vld [vmem:[#allocation2 + $0x7a0] sm:$0xff]  ;;  %v348_v59 = vld [vmem:[#allocation2 + $0x788] sm:$0xff] }
  0xc7   :  { %3302 = vmatprep.subr.bf16.mxu0 %v8580_v60  ;;  %3466 = vmatprep.subr.bf16.mxu1 %v8582_v0  ;;  %v8638_v60 = vcombine.high %v340_v49, %v344_v51  ;;  %v8644_v0 = vcombine.high %v347_v56, %v351_v58  ;;  %v8643_v6 = vcombine.low %v347_v56, %v351_v58  ;;  %v400_v49 = vld [vmem:[#allocation2 + $0x928] sm:$0xff]  ;;  %v407_v56 = vld [vmem:[#allocation2 + $0x960] sm:$0xff] }
  0xc8   :  { %v8645_v7 = vcombine.low %v348_v59, %v352_v61  ;;  %v8685_v51 = vcombine.low %v388_v40, %v392_v41  ;;  %v404_v58 = vld [vmem:[#allocation2 + $0x948] sm:$0xff] }
  0xca   :  { %3303 = vmatpush1.bf16.msra.mxu0 %v8579_v2  ;;  %3467 = vmatpush1.bf16.msra.mxu1 %v8581_v3  ;;  %v359_v2 = vld [vmem:[#allocation2 + $0x7e0] sm:$0xff]  ;;  %v356_v3 = vld [vmem:[#allocation2 + $0x7c8] sm:$0xff] }
  0xcb   :  { %3304 = vmatprep.subr.bf16.mxu0 %v8588_v4  ;;  %3468 = vmatprep.subr.bf16.mxu1 %v8590_v8  ;;  %v8646_v4 = vcombine.high %v348_v59, %v352_v61  ;;  %v8652_v8 = vcombine.high %v355_v1, %v359_v2  ;;  %v8651_v16 = vcombine.low %v355_v1, %v359_v2  ;;  %v408_v59 = vld [vmem:[#allocation2 + $0x968] sm:$0xff]  ;;  %v415_v1 = vld [vmem:[#allocation2 + $0x9a0] sm:$0xff] }
  0xcc   :  { %v8693_v61 = vcombine.low %v396_v48, %v400_v49  ;;  %v412_v2 = vld [vmem:[#allocation2 + $0x988] sm:$0xff] }
  0xce   :  { %3305 = vmatpush1.bf16.msra.mxu0 %v8587_v10  ;;  %3469 = vmatpush1.bf16.msra.mxu1 %v8589_v11  ;;  %v367_v10 = vld [vmem:[#allocation2 + $0x820] sm:$0xff]  ;;  %v364_v11 = vld [vmem:[#allocation2 + $0x808] sm:$0xff] }
  0xcf   :  { %3306 = vmatprep.subr.bf16.mxu0 %v8596_v13  ;;  %3470 = vmatprep.subr.bf16.mxu1 %v8598_v18  ;;  %v8654_v13 = vcombine.high %v356_v3, %v360_v5  ;;  %v8653_v18 = vcombine.low %v356_v3, %v360_v5  ;;  %v8660_v19 = vcombine.high %v363_v9, %v367_v10  ;;  %v416_v3 = vld [vmem:[#allocation2 + $0x9a8] sm:$0xff] }
  0xd0   :  { %v8662_v53 = vcombine.high %v364_v11, %v368_v14  ;;  %v8661_v27 = vcombine.low %v364_v11, %v368_v14  ;;  %v8701_v5 = vcombine.low %v404_v58, %v408_v59  ;;  %v424_v11 = vld [vmem:[#allocation2 + $0x9e8] sm:$0xff]  ;;  %v8709_v14 = vcombine.low %v412_v2, %v416_v3 }
  0xd2   :  { %3307 = vmatpush1.bf16.msra.mxu0 %v8595_v20  ;;  %3471 = vmatpush1.bf16.msra.mxu1 %v8597_v21  ;;  %v375_v20 = vld [vmem:[#allocation2 + $0x860] sm:$0xff]  ;;  %v372_v21 = vld [vmem:[#allocation2 + $0x848] sm:$0xff] }
  0xd3   :  { %3308 = vmatprep.subr.bf16.mxu0 %v8604_v22  ;;  %3472 = vmatprep.subr.bf16.mxu1 %v8606_v26  ;;  %v376_v22 = vld [vmem:[#allocation2 + $0x868] sm:$0xff]  ;;  %v8659_v26 = vcombine.low %v363_v9, %v367_v10  ;;  %v8667_v15 = vcombine.low %v371_v17, %v375_v20  ;;  %v423_v9 = vld [vmem:[#allocation2 + $0x9e0] sm:$0xff] }
  0xd4   :  { %v8669_v35 = vcombine.low %v372_v21, %v376_v22  ;;  %v420_v10 = vld [vmem:[#allocation2 + $0x9c8] sm:$0xff] }
  0xd6   :  { %3309 = vmatpush1.bf16.msra.mxu0 %v8603_v28  ;;  %3473 = vmatpush1.bf16.msra.mxu1 %v8605_v29  ;;  %v8668_v28 = vcombine.high %v371_v17, %v375_v20  ;;  %v8670_v29 = vcombine.high %v372_v21, %v376_v22  ;;  %v8718_v17 = vcombine.high %v420_v10, %v424_v11  ;;  %v428_v20 = vld [vmem:[#allocation2 + $0xa08] sm:$0xff] }
  0xd7   :  { %3310 = vmatprep.subr.bf16.mxu0 %v8612_v30  ;;  %3474 = vmatprep.subr.bf16.mxu1 %v8614_v34  ;;  %v379_v30 = vld [vmem:[#allocation2 + $0x880] sm:$0xff]  ;;  %v384_v34 = vld [vmem:[#allocation2 + $0x8a8] sm:$0xff] }
  0xd8   :  { %v8677_v43 = vcombine.low %v380_v33, %v384_v34  ;;  %v432_v21 = vld [vmem:[#allocation2 + $0xa28] sm:$0xff] }
  0xda   :  { %3311 = vmatpush1.bf16.msra.mxu0 %v8611_v36  ;;  %3475 = vmatpush1.bf16.msra.mxu1 %v8613_v37  ;;  %v8676_v36 = vcombine.high %v379_v30, %v383_v31  ;;  %v8678_v37 = vcombine.high %v380_v33, %v384_v34  ;;  %v8725_v34 = vcombine.low %v428_v20, %v432_v21 }
  0xdb   :  { %3312 = vmatprep.subr.bf16.mxu0 %v8620_v38  ;;  %3476 = vmatprep.subr.bf16.mxu1 %v8622_v42  ;;  %v387_v38 = vld [vmem:[#allocation2 + $0x8c0] sm:$0xff]  ;;  %v8675_v42 = vcombine.low %v379_v30, %v383_v31  ;;  %v436_v30 = vld [vmem:[#allocation2 + $0xa48] sm:$0xff] }
  0xdc   :  { %v440_v31 = vld [vmem:[#allocation2 + $0xa68] sm:$0xff] }
  0xde   :  { %3313 = vmatpush1.bf16.msra.mxu0 %v8619_v44  ;;  %3477 = vmatpush1.bf16.msra.mxu1 %v8621_v45  ;;  %v8684_v44 = vcombine.high %v387_v38, %v391_v39  ;;  %v8686_v45 = vcombine.high %v388_v40, %v392_v41  ;;  %v8733_v41 = vcombine.low %v436_v30, %v440_v31 }
  0xdf   :  { %3314 = vmatprep.subr.bf16.mxu0 %v8628_v46  ;;  %3478 = vmatprep.subr.bf16.mxu1 %v8630_v50  ;;  %v395_v46 = vld [vmem:[#allocation2 + $0x900] sm:$0xff]  ;;  %v8683_v50 = vcombine.low %v387_v38, %v391_v39  ;;  %v444_v38 = vld [vmem:[#allocation2 + $0xa88] sm:$0xff] }
  0xe0   :  { %v448_v39 = vld [vmem:[#allocation2 + $0xaa8] sm:$0xff] }
  0xe2   :  { %3315 = vmatpush1.bf16.msra.mxu0 %v8627_v52  ;;  %3479 = vmatpush1.bf16.msra.mxu1 %v8629_v54  ;;  %v8692_v52 = vcombine.high %v395_v46, %v399_v47  ;;  %v8694_v54 = vcombine.high %v396_v48, %v400_v49  ;;  %v8741_v49 = vcombine.low %v444_v38, %v448_v39 }
  0xe3   :  { %3316 = vmatprep.subr.bf16.mxu0 %v8636_v55  ;;  %3480 = vmatprep.subr.bf16.mxu1 %v8638_v60  ;;  %v403_v55 = vld [vmem:[#allocation2 + $0x940] sm:$0xff]  ;;  %v8691_v60 = vcombine.low %v395_v46, %v399_v47  ;;  %v452_v46 = vld [vmem:[#allocation2 + $0xac8] sm:$0xff] }
  0xe4   :  { %v456_v47 = vld [vmem:[#allocation2 + $0xae8] sm:$0xff] }
  0xe6   :  { %3317 = vmatpush1.bf16.msra.mxu0 %v8635_v62  ;;  %3481 = vmatpush1.bf16.msra.mxu1 %v8637_v63  ;;  %v8700_v62 = vcombine.high %v403_v55, %v407_v56  ;;  %v8702_v63 = vcombine.high %v404_v58, %v408_v59  ;;  %v8749_v59 = vcombine.low %v452_v46, %v456_v47 }
  0xe7   :  { %3318 = vmatprep.subr.bf16.mxu0 %v8644_v0  ;;  %3482 = vmatprep.subr.bf16.mxu1 %v8646_v4  ;;  %v411_v0 = vld [vmem:[#allocation2 + $0x980] sm:$0xff]  ;;  %v8699_v4 = vcombine.low %v403_v55, %v407_v56  ;;  %v460_v55 = vld [vmem:[#allocation2 + $0xb08] sm:$0xff] }
  0xe8   :  { %v464_v56 = vld [vmem:[#allocation2 + $0xb28] sm:$0xff] }
  0xea   :  { %3319 = vmatpush1.bf16.msra.mxu0 %v8643_v6  ;;  %3483 = vmatpush1.bf16.msra.mxu1 %v8645_v7  ;;  %v8708_v6 = vcombine.high %v411_v0, %v415_v1  ;;  %v8710_v7 = vcombine.high %v412_v2, %v416_v3  ;;  %v8757_v3 = vcombine.low %v460_v55, %v464_v56 }
  0xeb   :  { %3320 = vmatprep.subr.bf16.mxu0 %v8652_v8  ;;  %3484 = vmatprep.subr.bf16.mxu1 %v8654_v13  ;;  %v419_v8 = vld [vmem:[#allocation2 + $0x9c0] sm:$0xff]  ;;  %v8707_v13 = vcombine.low %v411_v0, %v415_v1  ;;  %v468_v0 = vld [vmem:[#allocation2 + $0xb48] sm:$0xff] }
  0xec   :  { %v8715_v22 = vcombine.low %v419_v8, %v423_v9  ;;  %v472_v1 = vld [vmem:[#allocation2 + $0xb68] sm:$0xff] }
  0xee   :  { %3321 = vmatpush1.bf16.msra.mxu0 %v8651_v16  ;;  %3485 = vmatpush1.bf16.msra.mxu1 %v8653_v18  ;;  %v8716_v16 = vcombine.high %v419_v8, %v423_v9  ;;  %v427_v18 = vld [vmem:[#allocation2 + $0xa00] sm:$0xff]  ;;  %v476_v8 = vld [vmem:[#allocation2 + $0xb88] sm:$0xff] }
  0xef   :  { %3331 = vmatprep.subr.bf16.mxu0 %v8660_v19  ;;  %3495 = vmatprep.subr.bf16.mxu1 %v8662_v53  ;;  %v431_v19 = vld [vmem:[#allocation2 + $0xa20] sm:$0xff]  ;;  %v8717_v53 = vcombine.low %v420_v10, %v424_v11  ;;  %v480_v9 = vld [vmem:[#allocation2 + $0xba8] sm:$0xff]  ;;  %v8765_v11 = vcombine.low %v468_v0, %v472_v1 }
  0xf0   :  { %v8723_v33 = vcombine.low %v427_v18, %v431_v19 }
  0xf1   :  { %3323 = vmatmul.mubr.bf16.vlgmr.msra.gmra.mrb[0].mxu0 %v10072_v25  ;;  %3487 = vmatmul.mubr.bf16.vlgmr.msra.gmra.mrb[0].mxu1 %v10072_v25 }
  0xf2   :  { %3332 = vmatpush1.bf16.msra.mxu0 %v8659_v26  ;;  %3496 = vmatpush1.bf16.msra.mxu1 %v8661_v27  ;;  %v8724_v26 = vcombine.high %v427_v18, %v431_v19  ;;  %v8726_v27 = vcombine.high %v428_v20, %v432_v21  ;;  %v484_v18 = vld [vmem:[#allocation2 + $0xbc8] sm:$0xff]  ;;  %v8773_v21 = vcombine.low %v476_v8, %v480_v9 }
  0xf3   :  { %3333 = vmatprep.subr.bf16.mxu0 %v8668_v28  ;;  %3497 = vmatprep.subr.bf16.mxu1 %v8670_v29  ;;  %v435_v28 = vld [vmem:[#allocation2 + $0xa40] sm:$0xff]  ;;  %v488_v19 = vld [vmem:[#allocation2 + $0xbe8] sm:$0xff] }
  0xf4   :  { %3363 = vmatprep.mubr.bf16.mxu0 %v10076_v32  ;;  %3527 = vmatprep.mubr.bf16.mxu1 %v10076_v32  ;;  %v439_v29 = vld [vmem:[#allocation2 + $0xa60] sm:$0xff] }
  0xf5   :  { %v8731_v40 = vcombine.low %v435_v28, %v439_v29 }
  0xf6   :  { %3334 = vmatpush1.bf16.msra.mxu0 %v8667_v15  ;;  %3498 = vmatpush1.bf16.msra.mxu1 %v8669_v35  ;;  %v8732_v15 = vcombine.high %v435_v28, %v439_v29  ;;  %v8734_v35 = vcombine.high %v436_v30, %v440_v31  ;;  %v492_v28 = vld [vmem:[#allocation2 + $0xc08] sm:$0xff]  ;;  %v8781_v31 = vcombine.low %v484_v18, %v488_v19 }
  0xf7   :  { %3335 = vmatprep.subr.bf16.mxu0 %v8676_v36  ;;  %3499 = vmatprep.subr.bf16.mxu1 %v8678_v37  ;;  %v443_v36 = vld [vmem:[#allocation2 + $0xa80] sm:$0xff]  ;;  %v496_v29 = vld [vmem:[#allocation2 + $0xc28] sm:$0xff] }
  0xf8   :  { %v447_v37 = vld [vmem:[#allocation2 + $0xaa0] sm:$0xff] }
  0xf9   :  { %v8739_v48 = vcombine.low %v443_v36, %v447_v37 }
  0xfa   :  { %3336 = vmatpush1.bf16.msra.mxu0 %v8675_v42  ;;  %3500 = vmatpush1.bf16.msra.mxu1 %v8677_v43  ;;  %v8740_v42 = vcombine.high %v443_v36, %v447_v37  ;;  %v8742_v43 = vcombine.high %v444_v38, %v448_v39  ;;  %v10084_v36 = vcombine.low %v10068_v24, %v10068_v24  ;;  %v500_v37 = vld [vmem:[#allocation2 + $0xc48] sm:$0xff]  ;;  %v10089_v39 = vld [vmem:[%s10263_s0 + $0x18] sm:$0xff] }
  0xfb   :  { %3337 = vmatprep.subr.bf16.mxu0 %v8684_v44  ;;  %3501 = vmatprep.subr.bf16.mxu1 %v8686_v45  ;;  %v451_v44 = vld [vmem:[#allocation2 + $0xac0] sm:$0xff]  ;;  %v504_v38 = vld [vmem:[#allocation2 + $0xc68] sm:$0xff]  ;;  %v10093_v24 = vcombine.high %v10089_v39, %v10089_v39 }
  0xfc   :  { %v455_v45 = vld [vmem:[#allocation2 + $0xae0] sm:$0xff] }
  0xfd   :  { %v8747_v58 = vcombine.low %v451_v44, %v455_v45 }
  0xfe   :  { %3338 = vmatpush1.bf16.msra.mxu0 %v8683_v50  ;;  %3502 = vmatpush1.bf16.msra.mxu1 %v8685_v51  ;;  %v8748_v50 = vcombine.high %v451_v44, %v455_v45  ;;  %v8750_v51 = vcombine.high %v452_v46, %v456_v47  ;;  %v507_v44 = vld [vmem:[#allocation2 + $0xc80] sm:$0xff]  ;;  %v508_v46 = vld [vmem:[#allocation2 + $0xc88] sm:$0xff] }
  0xff   :  { %3339 = vmatprep.subr.bf16.mxu0 %v8692_v52  ;;  %3503 = vmatprep.subr.bf16.mxu1 %v8694_v54  ;;  %v459_v52 = vld [vmem:[#allocation2 + $0xb00] sm:$0xff]  ;;  %v512_v47 = vld [vmem:[#allocation2 + $0xca8] sm:$0xff] }
 0x100   :  { %v463_v54 = vld [vmem:[#allocation2 + $0xb20] sm:$0xff] }
 0x101   :  { %v8755_v2 = vcombine.low %v459_v52, %v463_v54  ;;  %v511_v45 = vld [vmem:[#allocation2 + $0xca0] sm:$0xff] }
 0x102   :  { %3340 = vmatpush1.bf16.msra.mxu0 %v8691_v60  ;;  %3504 = vmatpush1.bf16.msra.mxu1 %v8693_v61  ;;  %v8756_v60 = vcombine.high %v459_v52, %v463_v54  ;;  %v8758_v61 = vcombine.high %v460_v55, %v464_v56  ;;  %v515_v52 = vld [vmem:[#allocation2 + $0xcc0] sm:$0xff]  ;;  %v516_v55 = vld [vmem:[#allocation2 + $0xcc8] sm:$0xff] }
 0x103   :  { %3341 = vmatprep.subr.bf16.mxu0 %v8700_v62  ;;  %3505 = vmatprep.subr.bf16.mxu1 %v8702_v63  ;;  %v467_v62 = vld [vmem:[#allocation2 + $0xb40] sm:$0xff]  ;;  %v520_v56 = vld [vmem:[#allocation2 + $0xce8] sm:$0xff] }
 0x104   :  { %v471_v63 = vld [vmem:[#allocation2 + $0xb60] sm:$0xff] }
 0x105   :  { %v8763_v10 = vcombine.low %v467_v62, %v471_v63  ;;  %v519_v54 = vld [vmem:[#allocation2 + $0xce0] sm:$0xff] }
 0x106   :  { %3342 = vmatpush1.bf16.msra.mxu0 %v8699_v4  ;;  %3506 = vmatpush1.bf16.msra.mxu1 %v8701_v5  ;;  %v8764_v4 = vcombine.high %v467_v62, %v471_v63  ;;  %v8766_v5 = vcombine.high %v468_v0, %v472_v1  ;;  %v523_v62 = vld [vmem:[#allocation2 + $0xd00] sm:$0xff]  ;;  %v524_v0 = vld [vmem:[#allocation2 + $0xd08] sm:$0xff] }
 0x107   :  { %3343 = vmatprep.subr.bf16.mxu0 %v8708_v6  ;;  %3507 = vmatprep.subr.bf16.mxu1 %v8710_v7  ;;  %v475_v6 = vld [vmem:[#allocation2 + $0xb80] sm:$0xff]  ;;  %v528_v1 = vld [vmem:[#allocation2 + $0xd28] sm:$0xff] }
 0x108   :  { %v479_v7 = vld [vmem:[#allocation2 + $0xba0] sm:$0xff] }
 0x109   :  { %v8771_v20 = vcombine.low %v475_v6, %v479_v7  ;;  %v527_v63 = vld [vmem:[#allocation2 + $0xd20] sm:$0xff] }
 0x10a   :  { %3344 = vmatpush1.bf16.msra.mxu0 %v8707_v13  ;;  %3508 = vmatpush1.bf16.msra.mxu1 %v8709_v14  ;;  %v8772_v13 = vcombine.high %v475_v6, %v479_v7  ;;  %v8774_v14 = vcombine.high %v476_v8, %v480_v9  ;;  %v531_v6 = vld [vmem:[#allocation2 + $0xd40] sm:$0xff]  ;;  %v532_v8 = vld [vmem:[#allocation2 + $0xd48] sm:$0xff] }
 0x10b   :  { %3345 = vmatprep.subr.bf16.mxu0 %v8716_v16  ;;  %3509 = vmatprep.subr.bf16.mxu1 %v8718_v17  ;;  %v483_v16 = vld [vmem:[#allocation2 + $0xbc0] sm:$0xff]  ;;  %v536_v9 = vld [vmem:[#allocation2 + $0xd68] sm:$0xff] }
 0x10c   :  { %v487_v17 = vld [vmem:[#allocation2 + $0xbe0] sm:$0xff] }
 0x10d   :  { %v8779_v30 = vcombine.low %v483_v16, %v487_v17  ;;  %v535_v7 = vld [vmem:[#allocation2 + $0xd60] sm:$0xff] }
 0x10e   :  { %3346 = vmatpush1.bf16.msra.mxu0 %v8715_v22  ;;  %3510 = vmatpush1.bf16.msra.mxu1 %v8717_v53  ;;  %v8780_v22 = vcombine.high %v483_v16, %v487_v17  ;;  %v8782_v53 = vcombine.high %v484_v18, %v488_v19  ;;  %v539_v16 = vld [vmem:[#allocation2 + $0xd80] sm:$0xff]  ;;  %v540_v18 = vld [vmem:[#allocation2 + $0xd88] sm:$0xff] }
 0x10f   :  { %3347 = vmatprep.subr.bf16.mxu0 %v8724_v26  ;;  %3511 = vmatprep.subr.bf16.mxu1 %v8726_v27  ;;  %v491_v26 = vld [vmem:[#allocation2 + $0xc00] sm:$0xff]  ;;  %v544_v19 = vld [vmem:[#allocation2 + $0xda8] sm:$0xff] }
 0x110   :  { %v495_v27 = vld [vmem:[#allocation2 + $0xc20] sm:$0xff] }
 0x111   :  { %v543_v17 = vld [vmem:[#allocation2 + $0xda0] sm:$0xff] }
 0x112   :  { %3348 = vmatpush1.bf16.msra.mxu0 %v8723_v33  ;;  %3512 = vmatpush1.bf16.msra.mxu1 %v8725_v34  ;;  %v8788_v33 = vcombine.high %v491_v26, %v495_v27  ;;  %v8790_v34 = vcombine.high %v492_v28, %v496_v29 }
 0x113   :  { %3349 = vmatprep.subr.bf16.mxu0 %v8732_v15  ;;  %3513 = vmatprep.subr.bf16.mxu1 %v8734_v35  ;;  %v499_v15 = vld [vmem:[#allocation2 + $0xc40] sm:$0xff] }
 0x114   :  { %v503_v35 = vld [vmem:[#allocation2 + $0xc60] sm:$0xff] }
 0x116   :  { %3350 = vmatpush1.bf16.msra.mxu0 %v8731_v40  ;;  %3514 = vmatpush1.bf16.msra.mxu1 %v8733_v41  ;;  %v8787_v40 = vcombine.low %v491_v26, %v495_v27  ;;  %v8789_v41 = vcombine.low %v492_v28, %v496_v29  ;;  %v547_v26 = vld [vmem:[#allocation2 + $0xdc0] sm:$0xff]  ;;  %v548_v28 = vld [vmem:[#allocation2 + $0xdc8] sm:$0xff] }
 0x117   :  { %3351 = vmatprep.subr.bf16.mxu0 %v8740_v42  ;;  %3515 = vmatprep.subr.bf16.mxu1 %v8742_v43  ;;  %v8796_v42 = vcombine.high %v499_v15, %v503_v35  ;;  %v8798_v43 = vcombine.high %v500_v37, %v504_v38  ;;  %v551_v27 = vld [vmem:[#allocation2 + $0xde0] sm:$0xff]  ;;  %v552_v29 = vld [vmem:[#allocation2 + $0xde8] sm:$0xff] }
 0x11a   :  { %3352 = vmatpush1.bf16.msra.mxu0 %v8739_v48  ;;  %3516 = vmatpush1.bf16.msra.mxu1 %v8741_v49  ;;  %v8795_v48 = vcombine.low %v499_v15, %v503_v35  ;;  %v8797_v49 = vcombine.low %v500_v37, %v504_v38  ;;  %v555_v15 = vld [vmem:[#allocation2 + $0xe00] sm:$0xff]  ;;  %v556_v37 = vld [vmem:[#allocation2 + $0xe08] sm:$0xff] }
 0x11b   :  { %3353 = vmatprep.subr.bf16.mxu0 %v8748_v50  ;;  %3517 = vmatprep.subr.bf16.mxu1 %v8750_v51  ;;  %v8804_v50 = vcombine.high %v507_v44, %v511_v45  ;;  %v8806_v51 = vcombine.high %v508_v46, %v512_v47  ;;  %v559_v35 = vld [vmem:[#allocation2 + $0xe20] sm:$0xff]  ;;  %v560_v38 = vld [vmem:[#allocation2 + $0xe28] sm:$0xff] }
 0x11e   :  { %3354 = vmatpush1.bf16.msra.mxu0 %v8747_v58  ;;  %3518 = vmatpush1.bf16.msra.mxu1 %v8749_v59  ;;  %v8803_v58 = vcombine.low %v507_v44, %v511_v45  ;;  %v8805_v59 = vcombine.low %v508_v46, %v512_v47  ;;  %v563_v44 = vld [vmem:[#allocation2 + $0xe40] sm:$0xff]  ;;  %v564_v46 = vld [vmem:[#allocation2 + $0xe48] sm:$0xff] }
 0x11f   :  { %3355 = vmatprep.subr.bf16.mxu0 %v8756_v60  ;;  %3519 = vmatprep.subr.bf16.mxu1 %v8758_v61  ;;  %v8812_v60 = vcombine.high %v515_v52, %v519_v54  ;;  %v8814_v61 = vcombine.high %v516_v55, %v520_v56  ;;  %v567_v45 = vld [vmem:[#allocation2 + $0xe60] sm:$0xff]  ;;  %v568_v47 = vld [vmem:[#allocation2 + $0xe68] sm:$0xff] }
 0x122   :  { %3356 = vmatpush1.bf16.msra.mxu0 %v8755_v2  ;;  %3520 = vmatpush1.bf16.msra.mxu1 %v8757_v3  ;;  %v8811_v2 = vcombine.low %v515_v52, %v519_v54  ;;  %v8813_v3 = vcombine.low %v516_v55, %v520_v56  ;;  %v571_v52 = vld [vmem:[#allocation2 + $0xe80] sm:$0xff]  ;;  %v572_v55 = vld [vmem:[#allocation2 + $0xe88] sm:$0xff] }
 0x123   :  { %3357 = vmatprep.subr.bf16.mxu0 %v8764_v4  ;;  %3521 = vmatprep.subr.bf16.mxu1 %v8766_v5  ;;  %v8820_v4 = vcombine.high %v523_v62, %v527_v63  ;;  %v8822_v5 = vcombine.high %v524_v0, %v528_v1  ;;  %v575_v54 = vld [vmem:[#allocation2 + $0xea0] sm:$0xff]  ;;  %v576_v56 = vld [vmem:[#allocation2 + $0xea8] sm:$0xff] }
 0x126   :  { %3358 = vmatpush1.bf16.msra.mxu0 %v8763_v10  ;;  %3522 = vmatpush1.bf16.msra.mxu1 %v8765_v11  ;;  %v8819_v10 = vcombine.low %v523_v62, %v527_v63  ;;  %v8821_v11 = vcombine.low %v524_v0, %v528_v1  ;;  %v579_v62 = vld [vmem:[#allocation2 + $0xec0] sm:$0xff]  ;;  %v580_v0 = vld [vmem:[#allocation2 + $0xec8] sm:$0xff] }
 0x127   :  { %3359 = vmatprep.subr.bf16.mxu0 %v8772_v13  ;;  %3523 = vmatprep.subr.bf16.mxu1 %v8774_v14  ;;  %v8828_v13 = vcombine.high %v531_v6, %v535_v7  ;;  %v8830_v14 = vcombine.high %v532_v8, %v536_v9  ;;  %v583_v63 = vld [vmem:[#allocation2 + $0xee0] sm:$0xff]  ;;  %v584_v1 = vld [vmem:[#allocation2 + $0xee8] sm:$0xff] }
 0x12a   :  { %3360 = vmatpush1.bf16.msra.mxu0 %v8771_v20  ;;  %3524 = vmatpush1.bf16.msra.mxu1 %v8773_v21  ;;  %v8827_v20 = vcombine.low %v531_v6, %v535_v7  ;;  %v8829_v21 = vcombine.low %v532_v8, %v536_v9  ;;  %v587_v6 = vld [vmem:[#allocation2 + $0xf00] sm:$0xff]  ;;  %v588_v8 = vld [vmem:[#allocation2 + $0xf08] sm:$0xff] }
 0x12b   :  { %3361 = vmatprep.subr.bf16.mxu0 %v8780_v22  ;;  %3525 = vmatprep.subr.bf16.mxu1 %v8782_v53  ;;  %v8836_v22 = vcombine.high %v539_v16, %v543_v17  ;;  %v8838_v53 = vcombine.high %v540_v18, %v544_v19  ;;  %v591_v7 = vld [vmem:[#allocation2 + $0xf20] sm:$0xff]  ;;  %v592_v9 = vld [vmem:[#allocation2 + $0xf28] sm:$0xff] }
 0x12e   :  { %3362 = vmatpush1.bf16.msra.mxu0 %v8779_v30  ;;  %3526 = vmatpush1.bf16.msra.mxu1 %v8781_v31  ;;  %v8835_v30 = vcombine.low %v539_v16, %v543_v17  ;;  %v8837_v31 = vcombine.low %v540_v18, %v544_v19  ;;  %v595_v16 = vld [vmem:[#allocation2 + $0xf40] sm:$0xff]  ;;  %v596_v18 = vld [vmem:[#allocation2 + $0xf48] sm:$0xff] }
 0x12f   :  { %3372 = vmatprep.subr.bf16.mxu0 %v8788_v33  ;;  %3536 = vmatprep.subr.bf16.mxu1 %v8790_v34  ;;  %v8844_v33 = vcombine.high %v547_v26, %v551_v27  ;;  %v8846_v34 = vcombine.high %v548_v28, %v552_v29  ;;  %v599_v17 = vld [vmem:[#allocation2 + $0xf60] sm:$0xff]  ;;  %v600_v19 = vld [vmem:[#allocation2 + $0xf68] sm:$0xff] }
 0x131   :  { %3364 = vmatmul.mubr.bf16.vlgmr.msra.gmra.mrb[0].mxu0 %v10084_v36  ;;  %3528 = vmatmul.mubr.bf16.vlgmr.msra.gmra.mrb[0].mxu1 %v10084_v36 }
 0x132   :  { %3373 = vmatpush1.bf16.msra.mxu0 %v8787_v40  ;;  %3537 = vmatpush1.bf16.msra.mxu1 %v8789_v41  ;;  %v8843_v40 = vcombine.low %v547_v26, %v551_v27  ;;  %v8845_v41 = vcombine.low %v548_v28, %v552_v29  ;;  %v603_v26 = vld [vmem:[#allocation2 + $0xf80] sm:$0xff]  ;;  %v604_v28 = vld [vmem:[#allocation2 + $0xf88] sm:$0xff] }
 0x133   :  { %3374 = vmatprep.subr.bf16.mxu0 %v8796_v42  ;;  %3538 = vmatprep.subr.bf16.mxu1 %v8798_v43  ;;  %v8852_v42 = vcombine.high %v555_v15, %v559_v35  ;;  %v8854_v43 = vcombine.high %v556_v37, %v560_v38  ;;  %v607_v27 = vld [vmem:[#allocation2 + $0xfa0] sm:$0xff]  ;;  %v608_v29 = vld [vmem:[#allocation2 + $0xfa8] sm:$0xff] }
 0x134   :  { %3404 = vmatprep.mubr.bf16.mxu0 %v10093_v24  ;;  %3568 = vmatprep.mubr.bf16.mxu1 %v10093_v24 }
 0x136   :  { %3375 = vmatpush1.bf16.msra.mxu0 %v8795_v48  ;;  %3539 = vmatpush1.bf16.msra.mxu1 %v8797_v49  ;;  %v8851_v48 = vcombine.low %v555_v15, %v559_v35  ;;  %v8853_v49 = vcombine.low %v556_v37, %v560_v38  ;;  %v611_v15 = vld [vmem:[#allocation2 + $0xfc0] sm:$0xff]  ;;  %v612_v37 = vld [vmem:[#allocation2 + $0xfc8] sm:$0xff] }
 0x137   :  { %3376 = vmatprep.subr.bf16.mxu0 %v8804_v50  ;;  %3540 = vmatprep.subr.bf16.mxu1 %v8806_v51  ;;  %v8860_v50 = vcombine.high %v563_v44, %v567_v45  ;;  %v8862_v51 = vcombine.high %v564_v46, %v568_v47  ;;  %v615_v35 = vld [vmem:[#allocation2 + $0xfe0] sm:$0xff]  ;;  %v616_v38 = vld [vmem:[#allocation2 + $0xfe8] sm:$0xff] }
 0x13a   :  { %3377 = vmatpush1.bf16.msra.mxu0 %v8803_v58  ;;  %3541 = vmatpush1.bf16.msra.mxu1 %v8805_v59  ;;  %v8859_v58 = vcombine.low %v563_v44, %v567_v45  ;;  %v8861_v59 = vcombine.low %v564_v46, %v568_v47  ;;  %v109_v44 = vld [vmem:[#allocation2 + $0x10] sm:$0xff]  ;;  %v110_v46 = vld [vmem:[#allocation2 + $0x18] sm:$0xff] }
 0x13b   :  { %3378 = vmatprep.subr.bf16.mxu0 %v8812_v60  ;;  %3542 = vmatprep.subr.bf16.mxu1 %v8814_v61  ;;  %v8868_v60 = vcombine.high %v571_v52, %v575_v54  ;;  %v8870_v61 = vcombine.high %v572_v55, %v576_v56  ;;  %v113_v45 = vld [vmem:[#allocation2 + $0x30] sm:$0xff]  ;;  %v114_v47 = vld [vmem:[#allocation2 + $0x38] sm:$0xff] }
 0x13e   :  { %3379 = vmatpush1.bf16.msra.mxu0 %v8811_v2  ;;  %3543 = vmatpush1.bf16.msra.mxu1 %v8813_v3  ;;  %v8867_v2 = vcombine.low %v571_v52, %v575_v54  ;;  %v8869_v3 = vcombine.low %v572_v55, %v576_v56  ;;  %v117_v52 = vld [vmem:[#allocation2 + $0x50] sm:$0xff]  ;;  %v10101_v55 = vcombine.low %v10089_v39, %v10089_v39  ;;  %v118_v56 = vld [vmem:[#allocation2 + $0x58] sm:$0xff] }
 0x13f   :  { %3380 = vmatprep.subr.bf16.mxu0 %v8820_v4  ;;  %3544 = vmatprep.subr.bf16.mxu1 %v8822_v5  ;;  %v8876_v4 = vcombine.high %v579_v62, %v583_v63  ;;  %v8878_v5 = vcombine.high %v580_v0, %v584_v1  ;;  %v121_v54 = vld [vmem:[#allocation2 + $0x70] sm:$0xff] }
 0x140   :  { %v8415_v39 = vcombine.low %v117_v52, %v121_v54 }
 0x142   :  { %3381 = vmatpush1.bf16.msra.mxu0 %v8819_v10  ;;  %3545 = vmatpush1.bf16.msra.mxu1 %v8821_v11  ;;  %v8875_v10 = vcombine.low %v579_v62, %v583_v63  ;;  %v8877_v11 = vcombine.low %v580_v0, %v584_v1  ;;  %v125_v63 = vld [vmem:[#allocation2 + $0x90] sm:$0xff]  ;;  %v126_v1 = vld [vmem:[#allocation2 + $0x98] sm:$0xff] }
 0x143   :  { %3382 = vmatprep.subr.bf16.mxu0 %v8828_v13  ;;  %3546 = vmatprep.subr.bf16.mxu1 %v8830_v14  ;;  %v8884_v13 = vcombine.high %v587_v6, %v591_v7  ;;  %v8886_v14 = vcombine.high %v588_v8, %v592_v9  ;;  %v129_v0 = vld [vmem:[#allocation2 + $0xb0] sm:$0xff] }
 0x146   :  { %3383 = vmatpush1.bf16.msra.mxu0 %v8827_v20  ;;  %3547 = vmatpush1.bf16.msra.mxu1 %v8829_v21  ;;  %v8883_v20 = vcombine.low %v587_v6, %v591_v7  ;;  %v8885_v21 = vcombine.low %v588_v8, %v592_v9  ;;  %v133_v6 = vld [vmem:[#allocation2 + $0xd0] sm:$0xff]  ;;  %v134_v8 = vld [vmem:[#allocation2 + $0xd8] sm:$0xff] }
 0x147   :  { %3384 = vmatprep.subr.bf16.mxu0 %v8836_v22  ;;  %3548 = vmatprep.subr.bf16.mxu1 %v8838_v53  ;;  %v8892_v22 = vcombine.high %v595_v16, %v599_v17  ;;  %v8894_v53 = vcombine.high %v596_v18, %v600_v19  ;;  %v137_v7 = vld [vmem:[#allocation2 + $0xf0] sm:$0xff]  ;;  %v138_v9 = vld [vmem:[#allocation2 + $0xf8] sm:$0xff] }
 0x14a   :  { %3385 = vmatpush1.bf16.msra.mxu0 %v8835_v30  ;;  %3549 = vmatpush1.bf16.msra.mxu1 %v8837_v31  ;;  %v8891_v30 = vcombine.low %v595_v16, %v599_v17  ;;  %v8893_v31 = vcombine.low %v596_v18, %v600_v19  ;;  %v141_v16 = vld [vmem:[#allocation2 + $0x110] sm:$0xff]  ;;  %v142_v18 = vld [vmem:[#allocation2 + $0x118] sm:$0xff] }
 0x14b   :  { %3386 = vmatprep.subr.bf16.mxu0 %v8844_v33  ;;  %3550 = vmatprep.subr.bf16.mxu1 %v8846_v34  ;;  %v8900_v33 = vcombine.high %v603_v26, %v607_v27  ;;  %v8902_v34 = vcombine.high %v604_v28, %v608_v29  ;;  %v145_v17 = vld [vmem:[#allocation2 + $0x130] sm:$0xff]  ;;  %v146_v19 = vld [vmem:[#allocation2 + $0x138] sm:$0xff] }
 0x14e   :  { %3387 = vmatpush1.bf16.msra.mxu0 %v8843_v40  ;;  %3551 = vmatpush1.bf16.msra.mxu1 %v8845_v41  ;;  %v8899_v40 = vcombine.low %v603_v26, %v607_v27  ;;  %v8901_v41 = vcombine.low %v604_v28, %v608_v29  ;;  %v153_v26 = vld [vmem:[#allocation2 + $0x170] sm:$0xff]  ;;  %v150_v27 = vld [vmem:[#allocation2 + $0x158] sm:$0xff]  ;;  %v8439_v29 = vcombine.low %v141_v16, %v145_v17 }
 0x14f   :  { %3388 = vmatprep.subr.bf16.mxu0 %v8852_v42  ;;  %3552 = vmatprep.subr.bf16.mxu1 %v8854_v43  ;;  %v8908_v42 = vcombine.high %v611_v15, %v615_v35  ;;  %v8910_v43 = vcombine.high %v612_v37, %v616_v38  ;;  %v154_v28 = vld [vmem:[#allocation2 + $0x178] sm:$0xff] }
 0x152   :  { %3389 = vmatpush1.bf16.msra.mxu0 %v8851_v48  ;;  %3553 = vmatpush1.bf16.msra.mxu1 %v8853_v49  ;;  %v8907_v48 = vcombine.low %v611_v15, %v615_v35  ;;  %v8909_v49 = vcombine.low %v612_v37, %v616_v38  ;;  %v161_v15 = vld [vmem:[#allocation2 + $0x1b0] sm:$0xff]  ;;  %v158_v35 = vld [vmem:[#allocation2 + $0x198] sm:$0xff] }
 0x153   :  { %3390 = vmatprep.subr.bf16.mxu0 %v8860_v50  ;;  %3554 = vmatprep.subr.bf16.mxu1 %v8862_v51  ;;  %v8408_v50 = vcombine.high %v109_v44, %v113_v45  ;;  %v8410_v51 = vcombine.high %v110_v46, %v114_v47  ;;  %v162_v37 = vld [vmem:[#allocation2 + $0x1b8] sm:$0xff] }
 0x156   :  { %3391 = vmatpush1.bf16.msra.mxu0 %v8859_v58  ;;  %3555 = vmatpush1.bf16.msra.mxu1 %v8861_v59  ;;  %v122_v58 = vld [vmem:[#allocation2 + $0x78] sm:$0xff]  ;;  %v8407_v59 = vcombine.low %v109_v44, %v113_v45  ;;  %v169_v44 = vld [vmem:[#allocation2 + $0x1f0] sm:$0xff] }
 0x157   :  { %3392 = vmatprep.subr.bf16.mxu0 %v8868_v60  ;;  %3556 = vmatprep.subr.bf16.mxu1 %v8870_v61  ;;  %v8409_v60 = vcombine.low %v110_v46, %v114_v47  ;;  %v8416_v61 = vcombine.high %v117_v52, %v121_v54  ;;  %v8418_v62 = vcombine.high %v118_v56, %v122_v58  ;;  %v166_v45 = vld [vmem:[#allocation2 + $0x1d8] sm:$0xff]  ;;  %v177_v52 = vld [vmem:[#allocation2 + $0x230] sm:$0xff] }
 0x158   :  { %v170_v46 = vld [vmem:[#allocation2 + $0x1f8] sm:$0xff] }
 0x159   :  { %v174_v54 = vld [vmem:[#allocation2 + $0x218] sm:$0xff] }
 0x15a   :  { %3393 = vmatpush1.bf16.msra.mxu0 %v8867_v2  ;;  %3557 = vmatpush1.bf16.msra.mxu1 %v8869_v3  ;;  %v130_v2 = vld [vmem:[#allocation2 + $0xb8] sm:$0xff]  ;;  %v8417_v3 = vcombine.low %v118_v56, %v122_v58 }
 0x15b   :  { %3394 = vmatprep.subr.bf16.mxu0 %v8876_v4  ;;  %3558 = vmatprep.subr.bf16.mxu1 %v8878_v5  ;;  %v8424_v4 = vcombine.high %v125_v63, %v129_v0  ;;  %v8426_v5 = vcombine.high %v126_v1, %v130_v2  ;;  %v178_v56 = vld [vmem:[#allocation2 + $0x238] sm:$0xff] }
 0x15e   :  { %3395 = vmatpush1.bf16.msra.mxu0 %v8875_v10  ;;  %3559 = vmatpush1.bf16.msra.mxu1 %v8877_v11  ;;  %v8423_v10 = vcombine.low %v125_v63, %v129_v0  ;;  %v8425_v11 = vcombine.low %v126_v1, %v130_v2  ;;  %v185_v63 = vld [vmem:[#allocation2 + $0x270] sm:$0xff]  ;;  %v182_v0 = vld [vmem:[#allocation2 + $0x258] sm:$0xff] }
 0x15f   :  { %3396 = vmatprep.subr.bf16.mxu0 %v8884_v13  ;;  %3560 = vmatprep.subr.bf16.mxu1 %v8886_v14  ;;  %v8432_v13 = vcombine.high %v133_v6, %v137_v7  ;;  %v8434_v14 = vcombine.high %v134_v8, %v138_v9  ;;  %v186_v1 = vld [vmem:[#allocation2 + $0x278] sm:$0xff] }
 0x162   :  { %3397 = vmatpush1.bf16.msra.mxu0 %v8883_v20  ;;  %3561 = vmatpush1.bf16.msra.mxu1 %v8885_v21  ;;  %v8431_v20 = vcombine.low %v133_v6, %v137_v7  ;;  %v8433_v21 = vcombine.low %v134_v8, %v138_v9  ;;  %v193_v6 = vld [vmem:[#allocation2 + $0x2b0] sm:$0xff]  ;;  %v190_v7 = vld [vmem:[#allocation2 + $0x298] sm:$0xff] }
 0x163   :  { %3398 = vmatprep.subr.bf16.mxu0 %v8892_v22  ;;  %3562 = vmatprep.subr.bf16.mxu1 %v8894_v53  ;;  %v8440_v22 = vcombine.high %v141_v16, %v145_v17  ;;  %v149_v53 = vld [vmem:[#allocation2 + $0x150] sm:$0xff]  ;;  %v194_v8 = vld [vmem:[#allocation2 + $0x2b8] sm:$0xff] }
 0x164   :  { %v8447_v38 = vcombine.low %v149_v53, %v153_v26  ;;  %v201_v16 = vld [vmem:[#allocation2 + $0x2f0] sm:$0xff]  ;;  %v198_v17 = vld [vmem:[#allocation2 + $0x2d8] sm:$0xff] }
 0x166   :  { %3399 = vmatpush1.bf16.msra.mxu0 %v8891_v30  ;;  %3563 = vmatpush1.bf16.msra.mxu1 %v8893_v31  ;;  %v8441_v30 = vcombine.low %v142_v18, %v146_v19  ;;  %v8448_v31 = vcombine.high %v149_v53, %v153_v26  ;;  %v209_v53 = vld [vmem:[#allocation2 + $0x330] sm:$0xff]  ;;  %v206_v26 = vld [vmem:[#allocation2 + $0x318] sm:$0xff] }
 0x167   :  { %3400 = vmatprep.subr.bf16.mxu0 %v8900_v33  ;;  %3564 = vmatprep.subr.bf16.mxu1 %v8902_v34  ;;  %v8450_v33 = vcombine.high %v150_v27, %v154_v28  ;;  %v157_v34 = vld [vmem:[#allocation2 + $0x190] sm:$0xff] }
 0x168   :  { %v8455_v47 = vcombine.low %v157_v34, %v161_v15 }
 0x16a   :  { %3401 = vmatpush1.bf16.msra.mxu0 %v8899_v40  ;;  %3565 = vmatpush1.bf16.msra.mxu1 %v8901_v41  ;;  %v8449_v40 = vcombine.low %v150_v27, %v154_v28  ;;  %v8456_v41 = vcombine.high %v157_v34, %v161_v15  ;;  %v210_v27 = vld [vmem:[#allocation2 + $0x338] sm:$0xff]  ;;  %v217_v34 = vld [vmem:[#allocation2 + $0x370] sm:$0xff] }
 0x16b   :  { %3402 = vmatprep.subr.bf16.mxu0 %v8908_v42  ;;  %3566 = vmatprep.subr.bf16.mxu1 %v8910_v43  ;;  %v8458_v42 = vcombine.high %v158_v35, %v162_v37  ;;  %v165_v43 = vld [vmem:[#allocation2 + $0x1d0] sm:$0xff]  ;;  %v214_v15 = vld [vmem:[#allocation2 + $0x358] sm:$0xff] }
 0x16c   :  { %v8463_v58 = vcombine.low %v165_v43, %v169_v44 }
 0x16e   :  { %3403 = vmatpush1.bf16.msra.mxu0 %v8907_v48  ;;  %3567 = vmatpush1.bf16.msra.mxu1 %v8909_v49  ;;  %v8457_v48 = vcombine.low %v158_v35, %v162_v37  ;;  %v8464_v49 = vcombine.high %v165_v43, %v169_v44  ;;  %v218_v35 = vld [vmem:[#allocation2 + $0x378] sm:$0xff]  ;;  %v225_v43 = vld [vmem:[#allocation2 + $0x3b0] sm:$0xff] }
 0x16f   :  { %3577 = vmatprep.subr.bf16.mxu0 %v8408_v50  ;;  %3741 = vmatprep.subr.bf16.mxu1 %v8410_v51  ;;  %v8466_v50 = vcombine.high %v166_v45, %v170_v46  ;;  %v173_v51 = vld [vmem:[#allocation2 + $0x210] sm:$0xff]  ;;  %v222_v44 = vld [vmem:[#allocation2 + $0x398] sm:$0xff] }
 0x170   :  { %v8471_v2 = vcombine.low %v173_v51, %v177_v52 }
 0x171   :  { %3405 = vmatmul.mubr.bf16.vlgmr.msra.gmra.mrb[0].mxu0 %v10101_v55  ;;  %3569 = vmatmul.mubr.bf16.vlgmr.msra.gmra.mrb[0].mxu1 %v10101_v55 }
 0x172   :  { %3578 = vmatpush1.bf16.msra.mxu0 %v8407_v59  ;;  %3742 = vmatpush1.bf16.msra.mxu1 %v8409_v60  ;;  %v8465_v59 = vcombine.low %v166_v45, %v170_v46  ;;  %v8472_v60 = vcombine.high %v173_v51, %v177_v52  ;;  %v226_v45 = vld [vmem:[#allocation2 + $0x3b8] sm:$0xff]  ;;  %v233_v51 = vld [vmem:[#allocation2 + $0x3f0] sm:$0xff] }
 0x173   :  { %3579 = vmatprep.subr.bf16.mxu0 %v8416_v61  ;;  %3743 = vmatprep.subr.bf16.mxu1 %v8418_v62  ;;  %v8474_v61 = vcombine.high %v174_v54, %v178_v56  ;;  %v181_v62 = vld [vmem:[#allocation2 + $0x250] sm:$0xff]  ;;  %v230_v52 = vld [vmem:[#allocation2 + $0x3d8] sm:$0xff] }
 0x174   :  { %3609 = vmatprep.mubr.bf16.mxu0 %v10044_v57  ;;  %3773 = vmatprep.mubr.bf16.mxu1 %v10044_v57  ;;  %v8442_v57 = vcombine.high %v142_v18, %v146_v19  ;;  %v8479_v9 = vcombine.low %v181_v62, %v185_v63  ;;  %v202_v18 = vld [vmem:[#allocation2 + $0x2f8] sm:$0xff] }
 0x176   :  { %3580 = vmatpush1.bf16.msra.mxu0 %v8415_v39  ;;  %3744 = vmatpush1.bf16.msra.mxu1 %v8417_v3  ;;  %v8473_v39 = vcombine.low %v174_v54, %v178_v56  ;;  %v8480_v3 = vcombine.high %v181_v62, %v185_v63  ;;  %v234_v54 = vld [vmem:[#allocation2 + $0x3f8] sm:$0xff]  ;;  %v241_v62 = vld [vmem:[#allocation2 + $0x430] sm:$0xff] }
 0x177   :  { %3581 = vmatprep.subr.bf16.mxu0 %v8424_v4  ;;  %3745 = vmatprep.subr.bf16.mxu1 %v8426_v5  ;;  %v8482_v4 = vcombine.high %v182_v0, %v186_v1  ;;  %v189_v5 = vld [vmem:[#allocation2 + $0x290] sm:$0xff]  ;;  %v238_v63 = vld [vmem:[#allocation2 + $0x418] sm:$0xff] }
 0x178   :  { %v8487_v19 = vcombine.low %v189_v5, %v193_v6 }
 0x17a   :  { %3582 = vmatpush1.bf16.msra.mxu0 %v8423_v10  ;;  %3746 = vmatpush1.bf16.msra.mxu1 %v8425_v11  ;;  %v8481_v10 = vcombine.low %v182_v0, %v186_v1  ;;  %v8488_v11 = vcombine.high %v189_v5, %v193_v6  ;;  %v242_v0 = vld [vmem:[#allocation2 + $0x438] sm:$0xff]  ;;  %v249_v5 = vld [vmem:[#allocation2 + $0x470] sm:$0xff] }
 0x17b   :  { %3583 = vmatprep.subr.bf16.mxu0 %v8432_v13  ;;  %3747 = vmatprep.subr.bf16.mxu1 %v8434_v14  ;;  %v8490_v13 = vcombine.high %v190_v7, %v194_v8  ;;  %v197_v14 = vld [vmem:[#allocation2 + $0x2d0] sm:$0xff]  ;;  %v246_v6 = vld [vmem:[#allocation2 + $0x458] sm:$0xff] }
 0x17c   :  { %v8495_v28 = vcombine.low %v197_v14, %v201_v16 }
 0x17e   :  { %3584 = vmatpush1.bf16.msra.mxu0 %v8431_v20  ;;  %3748 = vmatpush1.bf16.msra.mxu1 %v8433_v21  ;;  %v8489_v20 = vcombine.low %v190_v7, %v194_v8  ;;  %v8496_v21 = vcombine.high %v197_v14, %v201_v16  ;;  %v250_v7 = vld [vmem:[#allocation2 + $0x478] sm:$0xff]  ;;  %v257_v14 = vld [vmem:[#allocation2 + $0x4b0] sm:$0xff] }
 0x17f   :  { %3585 = vmatprep.subr.bf16.mxu0 %v8440_v22  ;;  %3749 = vmatprep.subr.bf16.mxu1 %v8442_v57  ;;  %v8498_v22 = vcombine.high %v198_v17, %v202_v18  ;;  %v205_v57 = vld [vmem:[#allocation2 + $0x310] sm:$0xff]  ;;  %v254_v16 = vld [vmem:[#allocation2 + $0x498] sm:$0xff] }
 0x180   :  { %v8503_v37 = vcombine.low %v205_v57, %v209_v53 }
 0x182   :  { %3586 = vmatpush1.bf16.msra.mxu0 %v8439_v29  ;;  %3750 = vmatpush1.bf16.msra.mxu1 %v8441_v30  ;;  %v8497_v29 = vcombine.low %v198_v17, %v202_v18  ;;  %v8504_v30 = vcombine.high %v205_v57, %v209_v53  ;;  %v258_v17 = vld [vmem:[#allocation2 + $0x4b8] sm:$0xff]  ;;  %v265_v57 = vld [vmem:[#allocation2 + $0x4f0] sm:$0xff] }
 0x183   :  { %3587 = vmatprep.subr.bf16.mxu0 %v8448_v31  ;;  %3751 = vmatprep.subr.bf16.mxu1 %v8450_v33  ;;  %v8506_v31 = vcombine.high %v206_v26, %v210_v27  ;;  %v213_v33 = vld [vmem:[#allocation2 + $0x350] sm:$0xff]  ;;  %v262_v53 = vld [vmem:[#allocation2 + $0x4d8] sm:$0xff] }
 0x184   :  { %v8511_v46 = vcombine.low %v213_v33, %v217_v34 }
 0x186   :  { %3588 = vmatpush1.bf16.msra.mxu0 %v8447_v38  ;;  %3752 = vmatpush1.bf16.msra.mxu1 %v8449_v40  ;;  %v8505_v38 = vcombine.low %v206_v26, %v210_v27  ;;  %v8512_v40 = vcombine.high %v213_v33, %v217_v34  ;;  %v266_v26 = vld [vmem:[#allocation2 + $0x4f8] sm:$0xff] }
 0x187   :  { %3589 = vmatprep.subr.bf16.mxu0 %v8456_v41  ;;  %3753 = vmatprep.subr.bf16.mxu1 %v8458_v42  ;;  %v8514_v41 = vcombine.high %v214_v15, %v218_v35  ;;  %v221_v42 = vld [vmem:[#allocation2 + $0x390] sm:$0xff]  ;;  %v270_v33 = vld [vmem:[#allocation2 + $0x518] sm:$0xff] }
 0x188   :  { %v8519_v56 = vcombine.low %v221_v42, %v225_v43  ;;  %v274_v34 = vld [vmem:[#allocation2 + $0x538] sm:$0xff] }
 0x18a   :  { %3590 = vmatpush1.bf16.msra.mxu0 %v8455_v47  ;;  %3754 = vmatpush1.bf16.msra.mxu1 %v8457_v48  ;;  %v8513_v47 = vcombine.low %v214_v15, %v218_v35  ;;  %v8520_v48 = vcombine.high %v221_v42, %v225_v43  ;;  %v8561_v35 = vcombine.low %v262_v53, %v266_v26  ;;  %v282_v42 = vld [vmem:[#allocation2 + $0x578] sm:$0xff] }
 0x18b   :  { %3591 = vmatprep.subr.bf16.mxu0 %v8464_v49  ;;  %3755 = vmatprep.subr.bf16.mxu1 %v8466_v50  ;;  %v8522_v49 = vcombine.high %v222_v44, %v226_v45  ;;  %v229_v50 = vld [vmem:[#allocation2 + $0x3d0] sm:$0xff] }
 0x18c   :  { %v8527_v1 = vcombine.low %v229_v50, %v233_v51 }
 0x18e   :  { %3592 = vmatpush1.bf16.msra.mxu0 %v8463_v58  ;;  %3756 = vmatpush1.bf16.msra.mxu1 %v8465_v59  ;;  %v8521_v58 = vcombine.low %v222_v44, %v226_v45  ;;  %v8528_v59 = vcombine.high %v229_v50, %v233_v51  ;;  %v8569_v44 = vcombine.low %v270_v33, %v274_v34  ;;  %v290_v50 = vld [vmem:[#allocation2 + $0x5b8] sm:$0xff] }
 0x18f   :  { %3593 = vmatprep.subr.bf16.mxu0 %v8472_v60  ;;  %3757 = vmatprep.subr.bf16.mxu1 %v8474_v61  ;;  %v8530_v60 = vcombine.high %v230_v52, %v234_v54  ;;  %v237_v61 = vld [vmem:[#allocation2 + $0x410] sm:$0xff] }
 0x190   :  { %v8535_v8 = vcombine.low %v237_v61, %v241_v62 }
 0x192   :  { %3594 = vmatpush1.bf16.msra.mxu0 %v8471_v2  ;;  %3758 = vmatpush1.bf16.msra.mxu1 %v8473_v39  ;;  %v8529_v2 = vcombine.low %v230_v52, %v234_v54  ;;  %v8536_v39 = vcombine.high %v237_v61, %v241_v62  ;;  %v298_v61 = vld [vmem:[#allocation2 + $0x5f8] sm:$0xff] }
 0x193   :  { %3595 = vmatprep.subr.bf16.mxu0 %v8480_v3  ;;  %3759 = vmatprep.subr.bf16.mxu1 %v8482_v4  ;;  %v8538_v3 = vcombine.high %v238_v63, %v242_v0  ;;  %v245_v4 = vld [vmem:[#allocation2 + $0x450] sm:$0xff] }
 0x194   :  { %v8543_v18 = vcombine.low %v245_v4, %v249_v5 }
 0x196   :  { %3596 = vmatpush1.bf16.msra.mxu0 %v8479_v9  ;;  %3760 = vmatpush1.bf16.msra.mxu1 %v8481_v10  ;;  %v8537_v9 = vcombine.low %v238_v63, %v242_v0  ;;  %v8544_v10 = vcombine.high %v245_v4, %v249_v5  ;;  %v306_v4 = vld [vmem:[#allocation2 + $0x638] sm:$0xff] }
 0x197   :  { %3597 = vmatprep.subr.bf16.mxu0 %v8488_v11  ;;  %3761 = vmatprep.subr.bf16.mxu1 %v8490_v13  ;;  %v8546_v11 = vcombine.high %v246_v6, %v250_v7  ;;  %v253_v13 = vld [vmem:[#allocation2 + $0x490] sm:$0xff] }
 0x198   :  { %v8551_v27 = vcombine.low %v253_v13, %v257_v14 }
 0x19a   :  { %3598 = vmatpush1.bf16.msra.mxu0 %v8487_v19  ;;  %3762 = vmatpush1.bf16.msra.mxu1 %v8489_v20  ;;  %v8545_v19 = vcombine.low %v246_v6, %v250_v7  ;;  %v8552_v20 = vcombine.high %v253_v13, %v257_v14  ;;  %v314_v13 = vld [vmem:[#allocation2 + $0x678] sm:$0xff] }
 0x19b   :  { %3599 = vmatprep.subr.bf16.mxu0 %v8496_v21  ;;  %3763 = vmatprep.subr.bf16.mxu1 %v8498_v22  ;;  %v8554_v21 = vcombine.high %v254_v16, %v258_v17  ;;  %v261_v22 = vld [vmem:[#allocation2 + $0x4d0] sm:$0xff] }
 0x19c   :  { %v8559_v15 = vcombine.low %v261_v22, %v265_v57 }
 0x19e   :  { %3600 = vmatpush1.bf16.msra.mxu0 %v8495_v28  ;;  %3764 = vmatpush1.bf16.msra.mxu1 %v8497_v29  ;;  %v8560_v28 = vcombine.high %v261_v22, %v265_v57  ;;  %v8562_v29 = vcombine.high %v262_v53, %v266_v26  ;;  %v322_v22 = vld [vmem:[#allocation2 + $0x6b8] sm:$0xff] }
 0x19f   :  { %3601 = vmatprep.subr.bf16.mxu0 %v8504_v30  ;;  %3765 = vmatprep.subr.bf16.mxu1 %v8506_v31  ;;  %v269_v30 = vld [vmem:[#allocation2 + $0x510] sm:$0xff] }
 0x1a0   :  { %v273_v31 = vld [vmem:[#allocation2 + $0x530] sm:$0xff] }
 0x1a1   :  { %v8567_v43 = vcombine.low %v269_v30, %v273_v31 }
 0x1a2   :  { %3602 = vmatpush1.bf16.msra.mxu0 %v8503_v37  ;;  %3766 = vmatpush1.bf16.msra.mxu1 %v8505_v38  ;;  %v8568_v37 = vcombine.high %v269_v30, %v273_v31  ;;  %v277_v38 = vld [vmem:[#allocation2 + $0x550] sm:$0xff]  ;;  %v330_v30 = vld [vmem:[#allocation2 + $0x6f8] sm:$0xff] }
 0x1a3   :  { %3603 = vmatprep.subr.bf16.mxu0 %v8512_v40  ;;  %3767 = vmatprep.subr.bf16.mxu1 %v8514_v41  ;;  %v281_v40 = vld [vmem:[#allocation2 + $0x570] sm:$0xff]  ;;  %v278_v41 = vld [vmem:[#allocation2 + $0x558] sm:$0xff] }
 0x1a4   :  { %v8576_v45 = vcombine.high %v277_v38, %v281_v40  ;;  %v8575_v51 = vcombine.low %v277_v38, %v281_v40  ;;  %v8577_v52 = vcombine.low %v278_v41, %v282_v42  ;;  %v338_v38 = vld [vmem:[#allocation2 + $0x738] sm:$0xff] }
 0x1a6   :  { %3604 = vmatpush1.bf16.msra.mxu0 %v8511_v46  ;;  %3768 = vmatpush1.bf16.msra.mxu1 %v8513_v47  ;;  %v8578_v46 = vcombine.high %v278_v41, %v282_v42  ;;  %v285_v47 = vld [vmem:[#allocation2 + $0x590] sm:$0xff] }
 0x1a7   :  { %3605 = vmatprep.subr.bf16.mxu0 %v8520_v48  ;;  %3769 = vmatprep.subr.bf16.mxu1 %v8522_v49  ;;  %v289_v48 = vld [vmem:[#allocation2 + $0x5b0] sm:$0xff]  ;;  %v286_v49 = vld [vmem:[#allocation2 + $0x598] sm:$0xff] }
 0x1a8   :  { %v8584_v54 = vcombine.high %v285_v47, %v289_v48  ;;  %v8583_v62 = vcombine.low %v285_v47, %v289_v48  ;;  %v8585_v63 = vcombine.low %v286_v49, %v290_v50  ;;  %v346_v47 = vld [vmem:[#allocation2 + $0x778] sm:$0xff] }
 0x1aa   :  { %3606 = vmatpush1.bf16.msra.mxu0 %v8519_v56  ;;  %3770 = vmatpush1.bf16.msra.mxu1 %v8521_v58  ;;  %v8586_v56 = vcombine.high %v286_v49, %v290_v50  ;;  %v293_v58 = vld [vmem:[#allocation2 + $0x5d0] sm:$0xff] }
 0x1ab   :  { %3607 = vmatprep.subr.bf16.mxu0 %v8528_v59  ;;  %3771 = vmatprep.subr.bf16.mxu1 %v8530_v60  ;;  %v297_v59 = vld [vmem:[#allocation2 + $0x5f0] sm:$0xff]  ;;  %v294_v60 = vld [vmem:[#allocation2 + $0x5d8] sm:$0xff] }
 0x1ac   :  { %v8592_v0 = vcombine.high %v293_v58, %v297_v59  ;;  %v8591_v5 = vcombine.low %v293_v58, %v297_v59  ;;  %v8593_v6 = vcombine.low %v294_v60, %v298_v61  ;;  %v354_v58 = vld [vmem:[#allocation2 + $0x7b8] sm:$0xff] }
 0x1ae   :  { %3608 = vmatpush1.bf16.msra.mxu0 %v8527_v1  ;;  %3772 = vmatpush1.bf16.msra.mxu1 %v8529_v2  ;;  %v8594_v1 = vcombine.high %v294_v60, %v298_v61  ;;  %v301_v2 = vld [vmem:[#allocation2 + $0x610] sm:$0xff] }
 0x1af   :  { %3618 = vmatprep.subr.bf16.mxu0 %v8536_v39  ;;  %3782 = vmatprep.subr.bf16.mxu1 %v8538_v3  ;;  %v305_v39 = vld [vmem:[#allocation2 + $0x630] sm:$0xff]  ;;  %v302_v3 = vld [vmem:[#allocation2 + $0x618] sm:$0xff] }
 0x1b0   :  { %v8600_v7 = vcombine.high %v301_v2, %v305_v39  ;;  %v8599_v14 = vcombine.low %v301_v2, %v305_v39  ;;  %v362_v2 = vld [vmem:[#allocation2 + $0x7f8] sm:$0xff] }
 0x1b1   :  { %3610 = vmatmul.mubr.bf16.vlgmr.msra.gmra.mrb[4].mxu0 %v10050_v12  ;;  %3774 = vmatmul.mubr.bf16.vlgmr.msra.gmra.mrb[4].mxu1 %v10050_v12  ;;  %v8553_v12 = vcombine.low %v254_v16, %v258_v17  ;;  %v8601_v16 = vcombine.low %v302_v3, %v306_v4 }
 0x1b2   :  { %3619 = vmatpush1.bf16.msra.mxu0 %v8535_v8  ;;  %3783 = vmatpush1.bf16.msra.mxu1 %v8537_v9  ;;  %v8602_v8 = vcombine.high %v302_v3, %v306_v4  ;;  %v309_v9 = vld [vmem:[#allocation2 + $0x650] sm:$0xff] }
 0x1b3   :  { %3620 = vmatprep.subr.bf16.mxu0 %v8544_v10  ;;  %3784 = vmatprep.subr.bf16.mxu1 %v8546_v11  ;;  %v313_v10 = vld [vmem:[#allocation2 + $0x670] sm:$0xff]  ;;  %v310_v11 = vld [vmem:[#allocation2 + $0x658] sm:$0xff] }
 0x1b4   :  { %3650 = vmatprep.mubr.bf16.mxu0 %v10059_v23  ;;  %3814 = vmatprep.mubr.bf16.mxu1 %v10059_v23  ;;  %v8570_v23 = vcombine.high %v270_v33, %v274_v34  ;;  %v8608_v17 = vcombine.high %v309_v9, %v313_v10  ;;  %v8607_v57 = vcombine.low %v309_v9, %v313_v10  ;;  %v370_v9 = vld [vmem:[#allocation2 + $0x838] sm:$0xff] }
 0x1b5   :  { %v8609_v53 = vcombine.low %v310_v11, %v314_v13 }
 0x1b6   :  { %3621 = vmatpush1.bf16.msra.mxu0 %v8543_v18  ;;  %3785 = vmatpush1.bf16.msra.mxu1 %v8545_v19  ;;  %v8610_v18 = vcombine.high %v310_v11, %v314_v13  ;;  %v317_v19 = vld [vmem:[#allocation2 + $0x690] sm:$0xff] }
 0x1b7   :  { %3622 = vmatprep.subr.bf16.mxu0 %v8552_v20  ;;  %3786 = vmatprep.subr.bf16.mxu1 %v8554_v21  ;;  %v321_v20 = vld [vmem:[#allocation2 + $0x6b0] sm:$0xff]  ;;  %v318_v21 = vld [vmem:[#allocation2 + $0x698] sm:$0xff] }
 0x1b8   :  { %v8616_v26 = vcombine.high %v317_v19, %v321_v20  ;;  %v8615_v31 = vcombine.low %v317_v19, %v321_v20  ;;  %v8617_v33 = vcombine.low %v318_v21, %v322_v22  ;;  %v378_v19 = vld [vmem:[#allocation2 + $0x878] sm:$0xff] }
 0x1ba   :  { %3623 = vmatpush1.bf16.msra.mxu0 %v8551_v27  ;;  %3787 = vmatpush1.bf16.msra.mxu1 %v8553_v12  ;;  %v8618_v27 = vcombine.high %v318_v21, %v322_v22  ;;  %v325_v12 = vld [vmem:[#allocation2 + $0x6d0] sm:$0xff] }
 0x1bb   :  { %3624 = vmatprep.subr.bf16.mxu0 %v8560_v28  ;;  %3788 = vmatprep.subr.bf16.mxu1 %v8562_v29  ;;  %v329_v28 = vld [vmem:[#allocation2 + $0x6f0] sm:$0xff]  ;;  %v326_v29 = vld [vmem:[#allocation2 + $0x6d8] sm:$0xff] }
 0x1bc   :  { %v8624_v34 = vcombine.high %v325_v12, %v329_v28  ;;  %v8623_v40 = vcombine.low %v325_v12, %v329_v28  ;;  %v8625_v41 = vcombine.low %v326_v29, %v330_v30  ;;  %v386_v12 = vld [vmem:[#allocation2 + $0x8b8] sm:$0xff] }
 0x1be   :  { %3625 = vmatpush1.bf16.msra.mxu0 %v8559_v15  ;;  %3789 = vmatpush1.bf16.msra.mxu1 %v8561_v35  ;;  %v8626_v15 = vcombine.high %v326_v29, %v330_v30  ;;  %v333_v35 = vld [vmem:[#allocation2 + $0x710] sm:$0xff] }
 0x1bf   :  { %3626 = vmatprep.subr.bf16.mxu0 %v8568_v37  ;;  %3790 = vmatprep.subr.bf16.mxu1 %v8570_v23  ;;  %v337_v37 = vld [vmem:[#allocation2 + $0x730] sm:$0xff]  ;;  %v334_v23 = vld [vmem:[#allocation2 + $0x718] sm:$0xff] }
 0x1c0   :  { %v8632_v42 = vcombine.high %v333_v35, %v337_v37  ;;  %v8631_v48 = vcombine.low %v333_v35, %v337_v37  ;;  %v8633_v49 = vcombine.low %v334_v23, %v338_v38  ;;  %v394_v35 = vld [vmem:[#allocation2 + $0x8f8] sm:$0xff] }
 0x1c2   :  { %3627 = vmatpush1.bf16.msra.mxu0 %v8567_v43  ;;  %3791 = vmatpush1.bf16.msra.mxu1 %v8569_v44  ;;  %v8634_v43 = vcombine.high %v334_v23, %v338_v38  ;;  %v341_v44 = vld [vmem:[#allocation2 + $0x750] sm:$0xff] }
 0x1c3   :  { %3628 = vmatprep.subr.bf16.mxu0 %v8576_v45  ;;  %3792 = vmatprep.subr.bf16.mxu1 %v8578_v46  ;;  %v345_v45 = vld [vmem:[#allocation2 + $0x770] sm:$0xff]  ;;  %v342_v46 = vld [vmem:[#allocation2 + $0x758] sm:$0xff] }
 0x1c4   :  { %v8640_v50 = vcombine.high %v341_v44, %v345_v45  ;;  %v8639_v59 = vcombine.low %v341_v44, %v345_v45  ;;  %v8641_v60 = vcombine.low %v342_v46, %v346_v47 }
 0x1c6   :  { %3629 = vmatpush1.bf16.msra.mxu0 %v8575_v51  ;;  %3793 = vmatpush1.bf16.msra.mxu1 %v8577_v52  ;;  %v8642_v51 = vcombine.high %v342_v46, %v346_v47  ;;  %v349_v52 = vld [vmem:[#allocation2 + $0x790] sm:$0xff] }
 0x1c7   :  { %3630 = vmatprep.subr.bf16.mxu0 %v8584_v54  ;;  %3794 = vmatprep.subr.bf16.mxu1 %v8586_v56  ;;  %v353_v54 = vld [vmem:[#allocation2 + $0x7b0] sm:$0xff]  ;;  %v350_v56 = vld [vmem:[#allocation2 + $0x798] sm:$0xff] }
 0x1c8   :  { %v8648_v61 = vcombine.high %v349_v52, %v353_v54  ;;  %v8647_v39 = vcombine.low %v349_v52, %v353_v54  ;;  %v8649_v3 = vcombine.low %v350_v56, %v354_v58  ;;  %v405_v47 = vld [vmem:[#allocation2 + $0x950] sm:$0xff] }
 0x1ca   :  { %3631 = vmatpush1.bf16.msra.mxu0 %v8583_v62  ;;  %3795 = vmatpush1.bf16.msra.mxu1 %v8585_v63  ;;  %v8650_v62 = vcombine.high %v350_v56, %v354_v58  ;;  %v357_v63 = vld [vmem:[#allocation2 + $0x7d0] sm:$0xff] }
 0x1cb   :  { %3632 = vmatprep.subr.bf16.mxu0 %v8592_v0  ;;  %3796 = vmatprep.subr.bf16.mxu1 %v8594_v1  ;;  %v361_v0 = vld [vmem:[#allocation2 + $0x7f0] sm:$0xff]  ;;  %v358_v1 = vld [vmem:[#allocation2 + $0x7d8] sm:$0xff] }
 0x1cc   :  { %v8656_v4 = vcombine.high %v357_v63, %v361_v0  ;;  %v8655_v10 = vcombine.low %v357_v63, %v361_v0  ;;  %v8657_v11 = vcombine.low %v358_v1, %v362_v2  ;;  %v413_v58 = vld [vmem:[#allocation2 + $0x990] sm:$0xff] }
 0x1ce   :  { %3633 = vmatpush1.bf16.msra.mxu0 %v8591_v5  ;;  %3797 = vmatpush1.bf16.msra.mxu1 %v8593_v6  ;;  %v8658_v5 = vcombine.high %v358_v1, %v362_v2  ;;  %v365_v6 = vld [vmem:[#allocation2 + $0x810] sm:$0xff] }
 0x1cf   :  { %3634 = vmatprep.subr.bf16.mxu0 %v8600_v7  ;;  %3798 = vmatprep.subr.bf16.mxu1 %v8602_v8  ;;  %v369_v7 = vld [vmem:[#allocation2 + $0x830] sm:$0xff]  ;;  %v366_v8 = vld [vmem:[#allocation2 + $0x818] sm:$0xff] }
 0x1d0   :  { %v8664_v13 = vcombine.high %v365_v6, %v369_v7  ;;  %v8663_v20 = vcombine.low %v365_v6, %v369_v7  ;;  %v8665_v21 = vcombine.low %v366_v8, %v370_v9  ;;  %v421_v2 = vld [vmem:[#allocation2 + $0x9d0] sm:$0xff] }
 0x1d2   :  { %3635 = vmatpush1.bf16.msra.mxu0 %v8599_v14  ;;  %3799 = vmatpush1.bf16.msra.mxu1 %v8601_v16  ;;  %v8666_v14 = vcombine.high %v366_v8, %v370_v9  ;;  %v373_v16 = vld [vmem:[#allocation2 + $0x850] sm:$0xff] }
 0x1d3   :  { %3636 = vmatprep.subr.bf16.mxu0 %v8608_v17  ;;  %3800 = vmatprep.subr.bf16.mxu1 %v8610_v18  ;;  %v377_v17 = vld [vmem:[#allocation2 + $0x870] sm:$0xff]  ;;  %v374_v18 = vld [vmem:[#allocation2 + $0x858] sm:$0xff] }
 0x1d4   :  { %v8672_v22 = vcombine.high %v373_v16, %v377_v17  ;;  %v8671_v28 = vcombine.low %v373_v16, %v377_v17  ;;  %v8673_v29 = vcombine.low %v374_v18, %v378_v19  ;;  %v429_v9 = vld [vmem:[#allocation2 + $0xa10] sm:$0xff] }
 0x1d6   :  { %3637 = vmatpush1.bf16.msra.mxu0 %v8607_v57  ;;  %3801 = vmatpush1.bf16.msra.mxu1 %v8609_v53  ;;  %v8674_v57 = vcombine.high %v374_v18, %v378_v19  ;;  %v381_v53 = vld [vmem:[#allocation2 + $0x890] sm:$0xff] }
 0x1d7   :  { %3638 = vmatprep.subr.bf16.mxu0 %v8616_v26  ;;  %3802 = vmatprep.subr.bf16.mxu1 %v8618_v27  ;;  %v385_v26 = vld [vmem:[#allocation2 + $0x8b0] sm:$0xff]  ;;  %v382_v27 = vld [vmem:[#allocation2 + $0x898] sm:$0xff] }
 0x1d8   :  { %v8680_v30 = vcombine.high %v381_v53, %v385_v26  ;;  %v8679_v37 = vcombine.low %v381_v53, %v385_v26  ;;  %v437_v19 = vld [vmem:[#allocation2 + $0xa50] sm:$0xff] }
 0x1da   :  { %3639 = vmatpush1.bf16.msra.mxu0 %v8615_v31  ;;  %3803 = vmatpush1.bf16.msra.mxu1 %v8617_v33  ;;  %v8682_v31 = vcombine.high %v382_v27, %v386_v12  ;;  %v389_v33 = vld [vmem:[#allocation2 + $0x8d0] sm:$0xff] }
 0x1db   :  { %3640 = vmatprep.subr.bf16.mxu0 %v8624_v34  ;;  %3804 = vmatprep.subr.bf16.mxu1 %v8626_v15  ;;  %v393_v34 = vld [vmem:[#allocation2 + $0x8f0] sm:$0xff]  ;;  %v390_v15 = vld [vmem:[#allocation2 + $0x8d8] sm:$0xff] }
 0x1dc   :  { %v8688_v23 = vcombine.high %v389_v33, %v393_v34  ;;  %v8690_v38 = vcombine.high %v390_v15, %v394_v35  ;;  %v8687_v44 = vcombine.low %v389_v33, %v393_v34  ;;  %v8689_v45 = vcombine.low %v390_v15, %v394_v35  ;;  %v453_v35 = vld [vmem:[#allocation2 + $0xad0] sm:$0xff] }
 0x1de   :  { %3641 = vmatpush1.bf16.msra.mxu0 %v8623_v40  ;;  %3805 = vmatpush1.bf16.msra.mxu1 %v8625_v41  ;;  %v397_v40 = vld [vmem:[#allocation2 + $0x910] sm:$0xff] }
 0x1df   :  { %3642 = vmatprep.subr.bf16.mxu0 %v8632_v42  ;;  %3806 = vmatprep.subr.bf16.mxu1 %v8634_v43  ;;  %v401_v41 = vld [vmem:[#allocation2 + $0x930] sm:$0xff]  ;;  %v398_v42 = vld [vmem:[#allocation2 + $0x918] sm:$0xff] }
 0x1e0   :  { %v402_v43 = vld [vmem:[#allocation2 + $0x938] sm:$0xff]  ;;  %v8696_v46 = vcombine.high %v397_v40, %v401_v41 }
 0x1e1   :  { %v8697_v52 = vcombine.low %v398_v42, %v402_v43 }
 0x1e2   :  { %3643 = vmatpush1.bf16.msra.mxu0 %v8631_v48  ;;  %3807 = vmatpush1.bf16.msra.mxu1 %v8633_v49  ;;  %v409_v48 = vld [vmem:[#allocation2 + $0x970] sm:$0xff]  ;;  %v406_v49 = vld [vmem:[#allocation2 + $0x958] sm:$0xff] }
 0x1e3   :  { %3644 = vmatprep.subr.bf16.mxu0 %v8640_v50  ;;  %3808 = vmatprep.subr.bf16.mxu1 %v8642_v51  ;;  %v410_v50 = vld [vmem:[#allocation2 + $0x978] sm:$0xff]  ;;  %v8695_v51 = vcombine.low %v397_v40, %v401_v41  ;;  %v8704_v54 = vcombine.high %v405_v47, %v409_v48 }
 0x1e4   :  { %v8706_v56 = vcombine.high %v406_v49, %v410_v50  ;;  %v8705_v63 = vcombine.low %v406_v49, %v410_v50  ;;  %v469_v50 = vld [vmem:[#allocation2 + $0xb50] sm:$0xff] }
 0x1e6   :  { %3645 = vmatpush1.bf16.msra.mxu0 %v8639_v59  ;;  %3809 = vmatpush1.bf16.msra.mxu1 %v8641_v60  ;;  %v417_v59 = vld [vmem:[#allocation2 + $0x9b0] sm:$0xff]  ;;  %v414_v60 = vld [vmem:[#allocation2 + $0x998] sm:$0xff] }
 0x1e7   :  { %3646 = vmatprep.subr.bf16.mxu0 %v8648_v61  ;;  %3810 = vmatprep.subr.bf16.mxu1 %v8650_v62  ;;  %v418_v61 = vld [vmem:[#allocation2 + $0x9b8] sm:$0xff]  ;;  %v8703_v62 = vcombine.low %v405_v47, %v409_v48  ;;  %v8712_v0 = vcombine.high %v413_v58, %v417_v59 }
 0x1e8   :  { %v8714_v1 = vcombine.high %v414_v60, %v418_v61  ;;  %v8713_v6 = vcombine.low %v414_v60, %v418_v61  ;;  %v477_v61 = vld [vmem:[#allocation2 + $0xb90] sm:$0xff] }
 0x1ea   :  { %3647 = vmatpush1.bf16.msra.mxu0 %v8647_v39  ;;  %3811 = vmatpush1.bf16.msra.mxu1 %v8649_v3  ;;  %v425_v39 = vld [vmem:[#allocation2 + $0x9f0] sm:$0xff]  ;;  %v422_v3 = vld [vmem:[#allocation2 + $0x9d8] sm:$0xff] }
 0x1eb   :  { %3648 = vmatprep.subr.bf16.mxu0 %v8656_v4  ;;  %3812 = vmatprep.subr.bf16.mxu1 %v8658_v5  ;;  %v426_v4 = vld [vmem:[#allocation2 + $0x9f8] sm:$0xff]  ;;  %v8711_v5 = vcombine.low %v413_v58, %v417_v59  ;;  %v8720_v7 = vcombine.high %v421_v2, %v425_v39 }
 0x1ec   :  { %v8722_v8 = vcombine.high %v422_v3, %v426_v4  ;;  %v8721_v16 = vcombine.low %v422_v3, %v426_v4  ;;  %v485_v4 = vld [vmem:[#allocation2 + $0xbd0] sm:$0xff] }
 0x1ee   :  { %3649 = vmatpush1.bf16.msra.mxu0 %v8655_v10  ;;  %3813 = vmatpush1.bf16.msra.mxu1 %v8657_v11  ;;  %v433_v10 = vld [vmem:[#allocation2 + $0xa30] sm:$0xff]  ;;  %v430_v11 = vld [vmem:[#allocation2 + $0xa18] sm:$0xff] }
 0x1ef   :  { %3659 = vmatprep.subr.bf16.mxu0 %v8664_v13  ;;  %3823 = vmatprep.subr.bf16.mxu1 %v8666_v14  ;;  %v434_v13 = vld [vmem:[#allocation2 + $0xa38] sm:$0xff]  ;;  %v8719_v14 = vcombine.low %v421_v2, %v425_v39  ;;  %v8728_v17 = vcombine.high %v429_v9, %v433_v10 }
 0x1f0   :  { %v8730_v18 = vcombine.high %v430_v11, %v434_v13  ;;  %v8729_v53 = vcombine.low %v430_v11, %v434_v13  ;;  %v493_v13 = vld [vmem:[#allocation2 + $0xc10] sm:$0xff] }
 0x1f1   :  { %3651 = vmatmul.mubr.bf16.vlgmr.msra.gmra.mrb[4].mxu0 %v10072_v25  ;;  %3815 = vmatmul.mubr.bf16.vlgmr.msra.gmra.mrb[4].mxu1 %v10072_v25  ;;  %v8681_v25 = vcombine.low %v382_v27, %v386_v12  ;;  %v445_v12 = vld [vmem:[#allocation2 + $0xa90] sm:$0xff] }
 0x1f2   :  { %3660 = vmatpush1.bf16.msra.mxu0 %v8663_v20  ;;  %3824 = vmatpush1.bf16.msra.mxu1 %v8665_v21  ;;  %v441_v20 = vld [vmem:[#allocation2 + $0xa70] sm:$0xff]  ;;  %v438_v21 = vld [vmem:[#allocation2 + $0xa58] sm:$0xff] }
 0x1f3   :  { %3661 = vmatprep.subr.bf16.mxu0 %v8672_v22  ;;  %3825 = vmatprep.subr.bf16.mxu1 %v8674_v57  ;;  %v442_v22 = vld [vmem:[#allocation2 + $0xa78] sm:$0xff]  ;;  %v8727_v57 = vcombine.low %v429_v9, %v433_v10  ;;  %v8736_v26 = vcombine.high %v437_v19, %v441_v20 }
 0x1f4   :  { %3691 = vmatprep.mubr.bf16.mxu0 %v10076_v32  ;;  %3855 = vmatprep.mubr.bf16.mxu1 %v10076_v32  ;;  %v8698_v32 = vcombine.high %v398_v42, %v402_v43  ;;  %v8738_v27 = vcombine.high %v438_v21, %v442_v22  ;;  %v8737_v33 = vcombine.low %v438_v21, %v442_v22  ;;  %v461_v43 = vld [vmem:[#allocation2 + $0xb10] sm:$0xff] }
 0x1f5   :  { %v501_v22 = vld [vmem:[#allocation2 + $0xc50] sm:$0xff] }
 0x1f6   :  { %3662 = vmatpush1.bf16.msra.mxu0 %v8671_v28  ;;  %3826 = vmatpush1.bf16.msra.mxu1 %v8673_v29  ;;  %v449_v28 = vld [vmem:[#allocation2 + $0xab0] sm:$0xff]  ;;  %v446_v29 = vld [vmem:[#allocation2 + $0xa98] sm:$0xff] }
 0x1f7   :  { %3663 = vmatprep.subr.bf16.mxu0 %v8680_v30  ;;  %3827 = vmatprep.subr.bf16.mxu1 %v8682_v31  ;;  %v450_v30 = vld [vmem:[#allocation2 + $0xab8] sm:$0xff]  ;;  %v8735_v31 = vcombine.low %v437_v19, %v441_v20  ;;  %v8744_v34 = vcombine.high %v445_v12, %v449_v28 }
 0x1f8   :  { %v8746_v15 = vcombine.high %v446_v29, %v450_v30  ;;  %v8745_v40 = vcombine.low %v446_v29, %v450_v30  ;;  %v509_v30 = vld [vmem:[#allocation2 + $0xc90] sm:$0xff] }
 0x1fa   :  { %3664 = vmatpush1.bf16.msra.mxu0 %v8679_v37  ;;  %3828 = vmatpush1.bf16.msra.mxu1 %v8681_v25  ;;  %v457_v37 = vld [vmem:[#allocation2 + $0xaf0] sm:$0xff]  ;;  %v454_v25 = vld [vmem:[#allocation2 + $0xad8] sm:$0xff] }
 0x1fb   :  { %3665 = vmatprep.subr.bf16.mxu0 %v8688_v23  ;;  %3829 = vmatprep.subr.bf16.mxu1 %v8690_v38  ;;  %v458_v23 = vld [vmem:[#allocation2 + $0xaf8] sm:$0xff]  ;;  %v8743_v38 = vcombine.low %v445_v12, %v449_v28  ;;  %v8752_v41 = vcombine.high %v453_v35, %v457_v37 }
 0x1fc   :  { %v8754_v42 = vcombine.high %v454_v25, %v458_v23  ;;  %v8753_v47 = vcombine.low %v454_v25, %v458_v23  ;;  %v517_v23 = vld [vmem:[#allocation2 + $0xcd0] sm:$0xff] }
 0x1fe   :  { %3666 = vmatpush1.bf16.msra.mxu0 %v8687_v44  ;;  %3830 = vmatpush1.bf16.msra.mxu1 %v8689_v45  ;;  %v465_v44 = vld [vmem:[#allocation2 + $0xb30] sm:$0xff]  ;;  %v462_v45 = vld [vmem:[#allocation2 + $0xb18] sm:$0xff] }
 0x1ff   :  { %3667 = vmatprep.subr.bf16.mxu0 %v8696_v46  ;;  %3831 = vmatprep.subr.bf16.mxu1 %v8698_v32  ;;  %v466_v46 = vld [vmem:[#allocation2 + $0xb38] sm:$0xff]  ;;  %v8751_v32 = vcombine.low %v453_v35, %v457_v37  ;;  %v8760_v48 = vcombine.high %v461_v43, %v465_v44 }
 0x200   :  { %v8762_v49 = vcombine.high %v462_v45, %v466_v46  ;;  %v8761_v58 = vcombine.low %v462_v45, %v466_v46  ;;  %v525_v45 = vld [vmem:[#allocation2 + $0xd10] sm:$0xff] }
 0x201   :  { %v529_v46 = vld [vmem:[#allocation2 + $0xd30] sm:$0xff] }
 0x202   :  { %3668 = vmatpush1.bf16.msra.mxu0 %v8695_v51  ;;  %3832 = vmatpush1.bf16.msra.mxu1 %v8697_v52  ;;  %v473_v51 = vld [vmem:[#allocation2 + $0xb70] sm:$0xff]  ;;  %v470_v52 = vld [vmem:[#allocation2 + $0xb58] sm:$0xff] }
 0x203   :  { %3669 = vmatprep.subr.bf16.mxu0 %v8704_v54  ;;  %3833 = vmatprep.subr.bf16.mxu1 %v8706_v56  ;;  %v474_v54 = vld [vmem:[#allocation2 + $0xb78] sm:$0xff]  ;;  %v8759_v56 = vcombine.low %v461_v43, %v465_v44  ;;  %v8768_v59 = vcombine.high %v469_v50, %v473_v51 }
 0x204   :  { %v8770_v60 = vcombine.high %v470_v52, %v474_v54  ;;  %v8769_v2 = vcombine.low %v470_v52, %v474_v54  ;;  %v537_v52 = vld [vmem:[#allocation2 + $0xd70] sm:$0xff]  ;;  %v534_v54 = vld [vmem:[#allocation2 + $0xd58] sm:$0xff] }
 0x206   :  { %3670 = vmatpush1.bf16.msra.mxu0 %v8703_v62  ;;  %3834 = vmatpush1.bf16.msra.mxu1 %v8705_v63  ;;  %v481_v62 = vld [vmem:[#allocation2 + $0xbb0] sm:$0xff]  ;;  %v478_v63 = vld [vmem:[#allocation2 + $0xb98] sm:$0xff] }
 0x207   :  { %3671 = vmatprep.subr.bf16.mxu0 %v8712_v0  ;;  %3835 = vmatprep.subr.bf16.mxu1 %v8714_v1  ;;  %v482_v0 = vld [vmem:[#allocation2 + $0xbb8] sm:$0xff]  ;;  %v8767_v1 = vcombine.low %v469_v50, %v473_v51  ;;  %v8776_v39 = vcombine.high %v477_v61, %v481_v62  ;;  %v8824_v50 = vcombine.high %v525_v45, %v529_v46  ;;  %v533_v51 = vld [vmem:[#allocation2 + $0xd50] sm:$0xff] }
 0x208   :  { %v8778_v3 = vcombine.high %v478_v63, %v482_v0  ;;  %v8777_v9 = vcombine.low %v478_v63, %v482_v0  ;;  %v545_v63 = vld [vmem:[#allocation2 + $0xdb0] sm:$0xff]  ;;  %v542_v0 = vld [vmem:[#allocation2 + $0xd98] sm:$0xff] }
 0x20a   :  { %3672 = vmatpush1.bf16.msra.mxu0 %v8711_v5  ;;  %3836 = vmatpush1.bf16.msra.mxu1 %v8713_v6  ;;  %v489_v5 = vld [vmem:[#allocation2 + $0xbf0] sm:$0xff]  ;;  %v486_v6 = vld [vmem:[#allocation2 + $0xbd8] sm:$0xff] }
 0x20b   :  { %3673 = vmatprep.subr.bf16.mxu0 %v8720_v7  ;;  %3837 = vmatprep.subr.bf16.mxu1 %v8722_v8  ;;  %v490_v7 = vld [vmem:[#allocation2 + $0xbf8] sm:$0xff]  ;;  %v8775_v8 = vcombine.low %v477_v61, %v481_v62  ;;  %v8784_v10 = vcombine.high %v485_v4, %v489_v5  ;;  %v541_v62 = vld [vmem:[#allocation2 + $0xd90] sm:$0xff] }
 0x20c   :  { %v8786_v11 = vcombine.high %v486_v6, %v490_v7  ;;  %v8785_v19 = vcombine.low %v486_v6, %v490_v7  ;;  %v549_v6 = vld [vmem:[#allocation2 + $0xdd0] sm:$0xff] }
 0x20d   :  { %v553_v7 = vld [vmem:[#allocation2 + $0xdf0] sm:$0xff] }
 0x20e   :  { %3674 = vmatpush1.bf16.msra.mxu0 %v8719_v14  ;;  %3838 = vmatpush1.bf16.msra.mxu1 %v8721_v16  ;;  %v497_v14 = vld [vmem:[#allocation2 + $0xc30] sm:$0xff]  ;;  %v494_v16 = vld [vmem:[#allocation2 + $0xc18] sm:$0xff] }
 0x20f   :  { %3675 = vmatprep.subr.bf16.mxu0 %v8728_v17  ;;  %3839 = vmatprep.subr.bf16.mxu1 %v8730_v18  ;;  %v498_v17 = vld [vmem:[#allocation2 + $0xc38] sm:$0xff]  ;;  %v8783_v18 = vcombine.low %v485_v4, %v489_v5  ;;  %v8792_v20 = vcombine.high %v493_v13, %v497_v14 }
 0x210   :  { %v8794_v21 = vcombine.high %v494_v16, %v498_v17  ;;  %v8793_v12 = vcombine.low %v494_v16, %v498_v17  ;;  %v8839_v16 = vcombine.low %v541_v62, %v545_v63 }
 0x212   :  { %3676 = vmatpush1.bf16.msra.mxu0 %v8727_v57  ;;  %3840 = vmatpush1.bf16.msra.mxu1 %v8729_v53  ;;  %v505_v57 = vld [vmem:[#allocation2 + $0xc70] sm:$0xff]  ;;  %v502_v53 = vld [vmem:[#allocation2 + $0xc58] sm:$0xff] }
 0x213   :  { %3677 = vmatprep.subr.bf16.mxu0 %v8736_v26  ;;  %3841 = vmatprep.subr.bf16.mxu1 %v8738_v27  ;;  %v506_v26 = vld [vmem:[#allocation2 + $0xc78] sm:$0xff]  ;;  %v8791_v27 = vcombine.low %v493_v13, %v497_v14  ;;  %v8800_v28 = vcombine.high %v501_v22, %v505_v57 }
 0x214   :  { %v8802_v29 = vcombine.high %v502_v53, %v506_v26  ;;  %v8801_v35 = vcombine.low %v502_v53, %v506_v26  ;;  %v561_v53 = vld [vmem:[#allocation2 + $0xe30] sm:$0xff]  ;;  %v558_v26 = vld [vmem:[#allocation2 + $0xe18] sm:$0xff] }
 0x216   :  { %3678 = vmatpush1.bf16.msra.mxu0 %v8735_v31  ;;  %3842 = vmatpush1.bf16.msra.mxu1 %v8737_v33  ;;  %v513_v31 = vld [vmem:[#allocation2 + $0xcb0] sm:$0xff]  ;;  %v510_v33 = vld [vmem:[#allocation2 + $0xc98] sm:$0xff] }
 0x217   :  { %3679 = vmatprep.subr.bf16.mxu0 %v8744_v34  ;;  %3843 = vmatprep.subr.bf16.mxu1 %v8746_v15  ;;  %v514_v34 = vld [vmem:[#allocation2 + $0xcb8] sm:$0xff]  ;;  %v8799_v15 = vcombine.low %v501_v22, %v505_v57  ;;  %v8808_v37 = vcombine.high %v509_v30, %v513_v31  ;;  %v557_v57 = vld [vmem:[#allocation2 + $0xe10] sm:$0xff] }
 0x218   :  { %v8810_v25 = vcombine.high %v510_v33, %v514_v34 }
 0x21a   :  { %3680 = vmatpush1.bf16.msra.mxu0 %v8743_v38  ;;  %3844 = vmatpush1.bf16.msra.mxu1 %v8745_v40  ;;  %v521_v38 = vld [vmem:[#allocation2 + $0xcf0] sm:$0xff]  ;;  %v518_v40 = vld [vmem:[#allocation2 + $0xcd8] sm:$0xff] }
 0x21b   :  { %3681 = vmatprep.subr.bf16.mxu0 %v8752_v41  ;;  %3845 = vmatprep.subr.bf16.mxu1 %v8754_v42  ;;  %v522_v41 = vld [vmem:[#allocation2 + $0xcf8] sm:$0xff]  ;;  %v8807_v42 = vcombine.low %v509_v30, %v513_v31  ;;  %v8816_v43 = vcombine.high %v517_v23, %v521_v38  ;;  %v565_v31 = vld [vmem:[#allocation2 + $0xe50] sm:$0xff] }
 0x21c   :  { %v8818_v44 = vcombine.high %v518_v40, %v522_v41 }
 0x21e   :  { %3682 = vmatpush1.bf16.msra.mxu0 %v8751_v32  ;;  %3846 = vmatpush1.bf16.msra.mxu1 %v8753_v47  ;;  %v526_v32 = vld [vmem:[#allocation2 + $0xd18] sm:$0xff] }
 0x21f   :  { %3683 = vmatprep.subr.bf16.mxu0 %v8760_v48  ;;  %3847 = vmatprep.subr.bf16.mxu1 %v8762_v49  ;;  %v530_v47 = vld [vmem:[#allocation2 + $0xd38] sm:$0xff]  ;;  %v8815_v48 = vcombine.low %v517_v23, %v521_v38  ;;  %v8817_v49 = vcombine.low %v518_v40, %v522_v41  ;;  %v573_v38 = vld [vmem:[#allocation2 + $0xe90] sm:$0xff] }
 0x220   :  { %v577_v40 = vld [vmem:[#allocation2 + $0xeb0] sm:$0xff]  ;;  %v574_v41 = vld [vmem:[#allocation2 + $0xe98] sm:$0xff] }
 0x222   :  { %3684 = vmatpush1.bf16.msra.mxu0 %v8759_v56  ;;  %3848 = vmatpush1.bf16.msra.mxu1 %v8761_v58  ;;  %v538_v56 = vld [vmem:[#allocation2 + $0xd78] sm:$0xff]  ;;  %v8823_v58 = vcombine.low %v525_v45, %v529_v46  ;;  %v581_v46 = vld [vmem:[#allocation2 + $0xed0] sm:$0xff] }
 0x223   :  { %3685 = vmatprep.subr.bf16.mxu0 %v8768_v59  ;;  %3849 = vmatprep.subr.bf16.mxu1 %v8770_v60  ;;  %v8825_v59 = vcombine.low %v526_v32, %v530_v47  ;;  %v8832_v60 = vcombine.high %v533_v51, %v537_v52  ;;  %v8834_v61 = vcombine.high %v534_v54, %v538_v56 }
 0x226   :  { %3686 = vmatpush1.bf16.msra.mxu0 %v8767_v1  ;;  %3850 = vmatpush1.bf16.msra.mxu1 %v8769_v2  ;;  %v546_v1 = vld [vmem:[#allocation2 + $0xdb8] sm:$0xff]  ;;  %v8831_v2 = vcombine.low %v533_v51, %v537_v52  ;;  %v589_v52 = vld [vmem:[#allocation2 + $0xf10] sm:$0xff] }
 0x227   :  { %3687 = vmatprep.subr.bf16.mxu0 %v8776_v39  ;;  %3851 = vmatprep.subr.bf16.mxu1 %v8778_v3  ;;  %v8833_v39 = vcombine.low %v534_v54, %v538_v56  ;;  %v8840_v3 = vcombine.high %v541_v62, %v545_v63  ;;  %v8842_v5 = vcombine.high %v542_v0, %v546_v1  ;;  %v593_v54 = vld [vmem:[#allocation2 + $0xf30] sm:$0xff]  ;;  %v621_v56 = vlaneseq }
 0x228   :  { %v8888_v62 = vcombine.high %v589_v52, %v593_v54 }
 0x22a   :  { %3688 = vmatpush1.bf16.msra.mxu0 %v8775_v8  ;;  %3852 = vmatpush1.bf16.msra.mxu1 %v8777_v9 }
 0x22b   :  { %3689 = vmatprep.subr.bf16.mxu0 %v8784_v10  ;;  %3853 = vmatprep.subr.bf16.mxu1 %v8786_v11  ;;  %v550_v10 = vld [vmem:[#allocation2 + $0xdd8] sm:$0xff] }
 0x22c   :  { %v554_v11 = vld [vmem:[#allocation2 + $0xdf8] sm:$0xff] }
 0x22d   :  { %v8850_v22 = vcombine.high %v550_v10, %v554_v11 }
 0x22e   :  { %3690 = vmatpush1.bf16.msra.mxu0 %v8783_v18  ;;  %3854 = vmatpush1.bf16.msra.mxu1 %v8785_v19  ;;  %v8841_v19 = vcombine.low %v542_v0, %v546_v1  ;;  %v597_v0 = vld [vmem:[#allocation2 + $0xf50] sm:$0xff] }
 0x22f   :  { %3700 = vmatprep.subr.bf16.mxu0 %v8792_v20  ;;  %3864 = vmatprep.subr.bf16.mxu1 %v8794_v21  ;;  %v8848_v20 = vcombine.high %v549_v6, %v553_v7  ;;  %v601_v1 = vld [vmem:[#allocation2 + $0xf70] sm:$0xff] }
 0x231   :  { %3692 = vmatmul.mubr.bf16.vlgmr.msra.gmra.mrb[4].mxu0 %v10084_v36  ;;  %3856 = vmatmul.mubr.bf16.vlgmr.msra.gmra.mrb[4].mxu1 %v10084_v36  ;;  %v8809_v36 = vcombine.low %v510_v33, %v514_v34  ;;  %v569_v33 = vld [vmem:[#allocation2 + $0xe70] sm:$0xff]  ;;  %v566_v34 = vld [vmem:[#allocation2 + $0xe58] sm:$0xff] }
 0x232   :  { %3701 = vmatpush1.bf16.msra.mxu0 %v8791_v27  ;;  %3865 = vmatpush1.bf16.msra.mxu1 %v8793_v12  ;;  %v562_v27 = vld [vmem:[#allocation2 + $0xe38] sm:$0xff]  ;;  %v8847_v12 = vcombine.low %v549_v6, %v553_v7  ;;  %v8896_v7 = vcombine.high %v597_v0, %v601_v1 }
 0x233   :  { %3702 = vmatprep.subr.bf16.mxu0 %v8800_v28  ;;  %3866 = vmatprep.subr.bf16.mxu1 %v8802_v29  ;;  %v8849_v28 = vcombine.low %v550_v10, %v554_v11  ;;  %v8856_v29 = vcombine.high %v557_v57, %v561_v53  ;;  %v8858_v30 = vcombine.high %v558_v26, %v562_v27  ;;  %v605_v11 = vld [vmem:[#allocation2 + $0xf90] sm:$0xff] }
 0x234   :  { %3732 = vmatprep.mubr.bf16.mxu0 %v10093_v24  ;;  %3896 = vmatprep.mubr.bf16.mxu1 %v10093_v24  ;;  %v8826_v24 = vcombine.high %v526_v32, %v530_v47  ;;  %v585_v32 = vld [vmem:[#allocation2 + $0xef0] sm:$0xff]  ;;  %v582_v47 = vld [vmem:[#allocation2 + $0xed8] sm:$0xff] }
 0x236   :  { %3703 = vmatpush1.bf16.msra.mxu0 %v8799_v15  ;;  %3867 = vmatpush1.bf16.msra.mxu1 %v8801_v35  ;;  %v570_v15 = vld [vmem:[#allocation2 + $0xe78] sm:$0xff]  ;;  %v8855_v35 = vcombine.low %v557_v57, %v561_v53  ;;  %v613_v53 = vld [vmem:[#allocation2 + $0xfd0] sm:$0xff] }
 0x237   :  { %3704 = vmatprep.subr.bf16.mxu0 %v8808_v37  ;;  %3868 = vmatprep.subr.bf16.mxu1 %v8810_v25  ;;  %v8857_v37 = vcombine.low %v558_v26, %v562_v27  ;;  %v8864_v25 = vcombine.high %v565_v31, %v569_v33  ;;  %v8866_v23 = vcombine.high %v566_v34, %v570_v15  ;;  %v617_v26 = vld [vmem:[#allocation2 + $0xff0] sm:$0xff] }
 0x23a   :  { %3705 = vmatpush1.bf16.msra.mxu0 %v8807_v42  ;;  %3869 = vmatpush1.bf16.msra.mxu1 %v8809_v36  ;;  %v578_v42 = vld [vmem:[#allocation2 + $0xeb8] sm:$0xff]  ;;  %v8863_v36 = vcombine.low %v565_v31, %v569_v33  ;;  %v8912_v31 = vcombine.high %v613_v53, %v617_v26 }
 0x23b   :  { %3706 = vmatprep.subr.bf16.mxu0 %v8816_v43  ;;  %3870 = vmatprep.subr.bf16.mxu1 %v8818_v44  ;;  %v8865_v43 = vcombine.low %v566_v34, %v570_v15  ;;  %v8872_v44 = vcombine.high %v573_v38, %v577_v40  ;;  %v8874_v45 = vcombine.high %v574_v41, %v578_v42  ;;  %v3921_v34 = vld [vmem:[#allocation6] sm:$0xff] }
 0x23c   :  { %v3925_v15 = vld [vmem:[#allocation6 + $0x20] sm:$0xff] }
 0x23e   :  { %3707 = vmatpush1.bf16.msra.mxu0 %v8815_v48  ;;  %3871 = vmatpush1.bf16.msra.mxu1 %v8817_v49  ;;  %v586_v48 = vld [vmem:[#allocation2 + $0xef8] sm:$0xff]  ;;  %v8871_v49 = vcombine.low %v573_v38, %v577_v40  ;;  %v8916_v40 = vcombine.high %v3921_v34, %v3925_v15 }
 0x23f   :  { %3708 = vmatprep.subr.bf16.mxu0 %v8824_v50  ;;  %3872 = vmatprep.subr.bf16.mxu1 %v8826_v24  ;;  %v8873_v50 = vcombine.low %v574_v41, %v578_v42  ;;  %v8880_v24 = vcombine.high %v581_v46, %v585_v32  ;;  %v8882_v51 = vcombine.high %v582_v47, %v586_v48 }
 0x242   :  { %3709 = vmatpush1.bf16.msra.mxu0 %v8823_v58  ;;  %3873 = vmatpush1.bf16.msra.mxu1 %v8825_v59  ;;  %v590_v58 = vld [vmem:[#allocation2 + $0xf18] sm:$0xff] }
 0x243   :  { %3710 = vmatprep.subr.bf16.mxu0 %v8832_v60  ;;  %3874 = vmatprep.subr.bf16.mxu1 %v8834_v61  ;;  %v594_v59 = vld [vmem:[#allocation2 + $0xf38] sm:$0xff]  ;;  %v8879_v60 = vcombine.low %v581_v46, %v585_v32  ;;  %v8881_v61 = vcombine.low %v582_v47, %v586_v48  ;;  %v3934_v46 = vld [vmem:[#allocation6 + $0x68] sm:$0xff]  ;;  %v3937_v47 = vld [vmem:[#allocation6 + $0x80] sm:$0xff] }
 0x244   :  { %v10119_v4 = vpop.f32.mrb[0].mxu0  ;;  %v10121_v8 = vpop.f32.mrb[0].mxu1  ;;  %v8890_v63 = vcombine.high %v590_v58, %v594_v59  ;;  %v8889_v6 = vcombine.low %v590_v58, %v594_v59  ;;  %v3941_v48 = vld [vmem:[#allocation6 + $0xa0] sm:$0xff] }
 0x245   :  { %v10123_v9 = vpop.f32.mrb[1].mxu0  ;;  %v10125_v13 = vpop.f32.mrb[1].mxu1  ;;  %v3945_v59 = vld [vmem:[#allocation6 + $0xc0] sm:$0xff] }
 0x246   :  { %v3410_v14 = vpop.f32.mrb[2].mxu0  ;;  %3711 = vmatpush1.bf16.msra.mxu0 %v8831_v2  ;;  %v3574_v17 = vpop.f32.mrb[2].mxu1  ;;  %3875 = vmatpush1.bf16.msra.mxu1 %v8833_v39  ;;  %v10127_v2 = vshrl.u32 %v621_v56, 7  ;;  %v598_v39 = vld [vmem:[#allocation2 + $0xf58] sm:$0xff]  ;;  %v8932_v56 = vcombine.high %v3937_v47, %v3941_v48 }
 0x247   :  { %v3411_v18 = vpop.f32.mrb[3].mxu0  ;;  %3712 = vmatprep.subr.bf16.mxu0 %v8840_v3  ;;  %v3575_v21 = vpop.f32.mrb[3].mxu1  ;;  %3876 = vmatprep.subr.bf16.mxu1 %v8842_v5  ;;  %v602_v3 = vld [vmem:[#allocation2 + $0xf78] sm:$0xff]  ;;  %v8887_v5 = vcombine.low %v589_v52, %v593_v54  ;;  %v609_v14 = vld [vmem:[#allocation2 + $0xfb0] sm:$0xff] }
 0x248   :  { %v8898_v10 = vcombine.high %v598_v39, %v602_v3  ;;  %v606_v17 = vld [vmem:[#allocation2 + $0xf98] sm:$0xff]  ;;  %v8897_v21 = vcombine.low %v598_v39, %v602_v3  ;;  %v3953_v39 = vld [vmem:[#allocation6 + $0x100] sm:$0xff] }
 0x249   :  { %v610_v18 = vld [vmem:[#allocation2 + $0xfb8] sm:$0xff]  ;;  %v3957_v3 = vld [vmem:[#allocation6 + $0x120] sm:$0xff] }
 0x24a   :  { %3713 = vmatpush1.bf16.msra.mxu0 %v8839_v16  ;;  %3877 = vmatpush1.bf16.msra.mxu1 %v8841_v19  ;;  %v627_v16 = vsub.s32 1, %v10127_v2  ;;  %v10130_v19 = vld [vmem:[#allocation4] sm:$0xff]  ;;  %v8906_v57 = vcombine.high %v606_v17, %v610_v18 }
 0x24b   :  { %3714 = vmatprep.subr.bf16.mxu0 %v8848_v20  ;;  %3878 = vmatprep.subr.bf16.mxu1 %v8850_v22  ;;  %v8895_v20 = vcombine.low %v597_v0, %v601_v1  ;;  %v8904_v22 = vcombine.high %v605_v11, %v609_v14 }
 0x24c   :  { %v628_v27 = vrot.slane %v10130_v19, %v627_v16 }
 0x24e   :  { %3715 = vmatpush1.bf16.msra.mxu0 %v8847_v12  ;;  %3879 = vmatpush1.bf16.msra.mxu1 %v8849_v28  ;;  %v614_v12 = vld [vmem:[#allocation2 + $0xfd8] sm:$0xff] }
 0x24f   :  { %3716 = vmatprep.subr.bf16.mxu0 %v8856_v29  ;;  %3880 = vmatprep.subr.bf16.mxu1 %v8858_v30  ;;  %v618_v28 = vld [vmem:[#allocation2 + $0xff8] sm:$0xff]  ;;  %v8903_v29 = vcombine.low %v605_v11, %v609_v14  ;;  %v8905_v30 = vcombine.low %v606_v17, %v610_v18  ;;  %v8948_v11 = vcombine.high %v3953_v39, %v3957_v3  ;;  %v3961_v17 = vld [vmem:[#allocation6 + $0x140] sm:$0xff] }
 0x250   :  { %v8914_v33 = vcombine.high %v614_v12, %v618_v28  ;;  %v8913_v38 = vcombine.low %v614_v12, %v618_v28  ;;  %v3965_v18 = vld [vmem:[#allocation6 + $0x160] sm:$0xff]  ;;  %v3970_v28 = vld [vmem:[#allocation6 + $0x188] sm:$0xff] }
 0x251   :  { %v3973_v12 = vld [vmem:[#allocation6 + $0x1a0] sm:$0xff] }
 0x252   :  { %3717 = vmatpush1.bf16.msra.mxu0 %v8855_v35  ;;  %3881 = vmatpush1.bf16.msra.mxu1 %v8857_v37  ;;  %v9581_v35 = vadd.f32 %v10123_v9, %v628_v27  ;;  %v3922_v37 = vld [vmem:[#allocation6 + $0x8] sm:$0xff]  ;;  %v3969_v27 = vld [vmem:[#allocation6 + $0x180] sm:$0xff] }
 0x253   :  { %3718 = vmatprep.subr.bf16.mxu0 %v8864_v25  ;;  %3882 = vmatprep.subr.bf16.mxu1 %v8866_v23  ;;  %v3926_v25 = vld [vmem:[#allocation6 + $0x28] sm:$0xff]  ;;  %v8911_v23 = vcombine.low %v613_v53, %v617_v26  ;;  %v8956_v53 = vcombine.high %v3961_v17, %v3965_v18 }
 0x254   :  { %v8918_v41 = vcombine.high %v3922_v37, %v3926_v25  ;;  %v3906_v42 = vmax.f32 %v9581_v35, 0.0  ;;  %v8917_v9 = vcombine.low %v3922_v37, %v3926_v25  ;;  %v3981_v35 = vld [vmem:[#allocation6 + $0x1e0] sm:$0xff]  ;;  %v3978_v37 = vld [vmem:[#allocation6 + $0x1c8] sm:$0xff] }
 0x255   :  { %v3982_v25 = vld [vmem:[#allocation6 + $0x1e8] sm:$0xff] }
 0x256   :  { %3719 = vmatpush1.bf16.msra.mxu0 %v8863_v36  ;;  %3883 = vmatpush1.bf16.msra.mxu1 %v8865_v43  ;;  %v3929_v36 = vld [vmem:[#allocation6 + $0x40] sm:$0xff] }
 0x257   :  { %3720 = vmatprep.subr.bf16.mxu0 %v8872_v44  ;;  %3884 = vmatprep.subr.bf16.mxu1 %v8874_v45  ;;  %v3933_v43 = vld [vmem:[#allocation6 + $0x60] sm:$0xff]  ;;  %v8915_v44 = vcombine.low %v3921_v34, %v3925_v15  ;;  %v3930_v45 = vld [vmem:[#allocation6 + $0x48] sm:$0xff] }
 0x258   :  { %v8924_v32 = vcombine.high %v3929_v36, %v3933_v43  ;;  %v8923_v52 = vcombine.low %v3929_v36, %v3933_v43  ;;  %v8925_v54 = vcombine.low %v3930_v45, %v3934_v46  ;;  %v3977_v15 = vld [vmem:[#allocation6 + $0x1c0] sm:$0xff]  ;;  %v3986_v43 = vld [vmem:[#allocation6 + $0x208] sm:$0xff] }
 0x259   :  { %v3989_v36 = vld [vmem:[#allocation6 + $0x220] sm:$0xff] }
 0x25a   :  { %3721 = vmatpush1.bf16.msra.mxu0 %v8871_v49  ;;  %3885 = vmatpush1.bf16.msra.mxu1 %v8873_v50  ;;  %v10136_v49 = vpack.c.bf16 %v3906_v42, %v3906_v42  ;;  %v8926_v50 = vcombine.high %v3930_v45, %v3934_v46  ;;  %v3985_v42 = vld [vmem:[#allocation6 + $0x200] sm:$0xff]  ;;  %v8971_v45 = vcombine.low %v3977_v15, %v3981_v35 }
 0x25b   :  { %3722 = vmatprep.subr.bf16.mxu0 %v8880_v24  ;;  %3886 = vmatprep.subr.bf16.mxu1 %v8882_v51  ;;  %v3938_v24 = vld [vmem:[#allocation6 + $0x88] sm:$0xff]  ;;  %v8973_v46 = vcombine.low %v3978_v37, %v3982_v25 }
 0x25c   :  { %v3942_v51 = vld [vmem:[#allocation6 + $0xa8] sm:$0xff] }
 0x25d   :  { %v8934_v58 = vcombine.high %v3938_v24, %v3942_v51 }
 0x25e   :  { %3723 = vmatpush1.bf16.msra.mxu0 %v8879_v60  ;;  %3887 = vmatpush1.bf16.msra.mxu1 %v8881_v61  ;;  %v3949_v60 = vld [vmem:[#allocation6 + $0xe0] sm:$0xff]  ;;  %v3946_v61 = vld [vmem:[#allocation6 + $0xc8] sm:$0xff] }
 0x25f   :  { %3724 = vmatprep.subr.bf16.mxu0 %v8888_v62  ;;  %3888 = vmatprep.subr.bf16.mxu1 %v8890_v63  ;;  %v3950_v62 = vld [vmem:[#allocation6 + $0xe8] sm:$0xff]  ;;  %v8931_v63 = vcombine.low %v3937_v47, %v3941_v48  ;;  %v8940_v0 = vcombine.high %v3945_v59, %v3949_v60  ;;  %v3993_v47 = vld [vmem:[#allocation6 + $0x240] sm:$0xff] }
 0x260   :  { %v8942_v1 = vcombine.high %v3946_v61, %v3950_v62  ;;  %v3997_v48 = vld [vmem:[#allocation6 + $0x260] sm:$0xff] }
 0x262   :  { %3725 = vmatpush1.bf16.msra.mxu0 %v8887_v5  ;;  %3889 = vmatpush1.bf16.msra.mxu1 %v8889_v6  ;;  %v3954_v5 = vld [vmem:[#allocation6 + $0x108] sm:$0xff] }
 0x263   :  { %3726 = vmatprep.subr.bf16.mxu0 %v8896_v7  ;;  %3890 = vmatprep.subr.bf16.mxu1 %v8898_v10  ;;  %v3958_v6 = vld [vmem:[#allocation6 + $0x128] sm:$0xff]  ;;  %v8939_v7 = vcombine.low %v3945_v59, %v3949_v60  ;;  %v8941_v10 = vcombine.low %v3946_v61, %v3950_v62  ;;  %v4005_v59 = vld [vmem:[#allocation6 + $0x2a0] sm:$0xff]  ;;  %v8987_v62 = vcombine.low %v3993_v47, %v3997_v48 }
 0x264   :  { %v8950_v14 = vcombine.high %v3954_v5, %v3958_v6  ;;  %v4002_v60 = vld [vmem:[#allocation6 + $0x288] sm:$0xff] }
 0x265   :  { %v4006_v61 = vld [vmem:[#allocation6 + $0x2a8] sm:$0xff] }
 0x266   :  { %3727 = vmatpush1.bf16.msra.mxu0 %v8895_v20  ;;  %3891 = vmatpush1.bf16.msra.mxu1 %v8897_v21  ;;  %v3962_v20 = vld [vmem:[#allocation6 + $0x148] sm:$0xff] }
 0x267   :  { %3728 = vmatprep.subr.bf16.mxu0 %v8904_v22  ;;  %3892 = vmatprep.subr.bf16.mxu1 %v8906_v57  ;;  %v3966_v21 = vld [vmem:[#allocation6 + $0x168] sm:$0xff]  ;;  %v8947_v22 = vcombine.low %v3953_v39, %v3957_v3  ;;  %v8949_v57 = vcombine.low %v3954_v5, %v3958_v6  ;;  %v4013_v39 = vld [vmem:[#allocation6 + $0x2e0] sm:$0xff] }
 0x268   :  { %v8958_v26 = vcombine.high %v3962_v20, %v3966_v21  ;;  %v4010_v3 = vld [vmem:[#allocation6 + $0x2c8] sm:$0xff] }
 0x269   :  { %v4014_v5 = vld [vmem:[#allocation6 + $0x2e8] sm:$0xff] }
 0x26a   :  { %3729 = vmatpush1.bf16.msra.mxu0 %v8903_v29  ;;  %3893 = vmatpush1.bf16.msra.mxu1 %v8905_v30  ;;  %v3974_v29 = vld [vmem:[#allocation6 + $0x1a8] sm:$0xff]  ;;  %v8955_v30 = vcombine.low %v3961_v17, %v3965_v18  ;;  %v4021_v17 = vld [vmem:[#allocation6 + $0x320] sm:$0xff] }
 0x26b   :  { %3730 = vmatprep.subr.bf16.mxu0 %v8912_v31  ;;  %3894 = vmatprep.subr.bf16.mxu1 %v8914_v33  ;;  %v8957_v31 = vcombine.low %v3962_v20, %v3966_v21  ;;  %v8964_v33 = vcombine.high %v3969_v27, %v3973_v12  ;;  %v8966_v34 = vcombine.high %v3970_v28, %v3974_v29  ;;  %v4018_v18 = vld [vmem:[#allocation6 + $0x308] sm:$0xff] }
 0x26c   :  { %v4022_v20 = vld [vmem:[#allocation6 + $0x328] sm:$0xff] }
 0x26e   :  { %3731 = vmatpush1.bf16.msra.mxu0 %v8911_v23  ;;  %3895 = vmatpush1.bf16.msra.mxu1 %v8913_v38  ;;  %v8963_v23 = vcombine.low %v3969_v27, %v3973_v12  ;;  %v8965_v38 = vcombine.low %v3970_v28, %v3974_v29  ;;  %v4029_v27 = vld [vmem:[#allocation6 + $0x360] sm:$0xff]  ;;  %v4026_v12 = vld [vmem:[#allocation6 + $0x348] sm:$0xff] }
 0x26f   :  { %7035 = vmatprep.subr.bf16.mxu0 %v8916_v40  ;;  %7199 = vmatprep.subr.bf16.mxu1 %v8918_v41  ;;  %v8972_v40 = vcombine.high %v3977_v15, %v3981_v35  ;;  %v8974_v41 = vcombine.high %v3978_v37, %v3982_v25  ;;  %v4030_v28 = vld [vmem:[#allocation6 + $0x368] sm:$0xff]  ;;  %v4033_v15 = vld [vmem:[#allocation6 + $0x380] sm:$0xff]  ;;  %v635_v37 = vsub.s32 3, %v10127_v2 }
 0x270   :  { %v4037_v35 = vld [vmem:[#allocation6 + $0x3a0] sm:$0xff]  ;;  %v4034_v25 = vld [vmem:[#allocation6 + $0x388] sm:$0xff] }
 0x271   :  { %3733 = vmatmul.mubr.bf16.vlgmr.msra.gmra.mrb[4].mxu0 %v10101_v55  ;;  %3897 = vmatmul.mubr.bf16.vlgmr.msra.gmra.mrb[4].mxu1 %v10101_v55  ;;  %v8933_v55 = vcombine.low %v3938_v24, %v3942_v51  ;;  %v3998_v24 = vld [vmem:[#allocation6 + $0x268] sm:$0xff]  ;;  %v8979_v51 = vcombine.low %v3985_v42, %v3989_v36 }
 0x272   :  { %7036 = vmatpush1.bf16.msra.mxu0 %v8915_v44  ;;  %7067 = vmatprep.mubr.bf16.mxu0 %v10136_v49  ;;  %v3990_v44 = vld [vmem:[#allocation6 + $0x228] sm:$0xff] }
 0x273   :  { %7200 = vmatpush1.bf16.msra.mxu1 %v8917_v9  ;;  %7231 = vmatprep.mubr.bf16.mxu1 %v10136_v49  ;;  %v8980_v9 = vcombine.high %v3985_v42, %v3989_v36  ;;  %v9028_v42 = vcombine.high %v4033_v15, %v4037_v35 }
 0x274   :  { %7037 = vmatprep.subr.bf16.mxu0 %v8924_v32  ;;  %7201 = vmatprep.subr.bf16.mxu1 %v8926_v50  ;;  %v8982_v32 = vcombine.high %v3986_v43, %v3990_v44  ;;  %v3994_v50 = vld [vmem:[#allocation6 + $0x248] sm:$0xff] }
 0x276   :  { %7038 = vmatpush1.bf16.msra.mxu0 %v8923_v52  ;;  %v8981_v52 = vcombine.low %v3986_v43, %v3990_v44  ;;  %v4041_v43 = vld [vmem:[#allocation6 + $0x3c0] sm:$0xff] }
 0x277   :  { %7202 = vmatpush1.bf16.msra.mxu1 %v8925_v54  ;;  %7039 = vmatprep.subr.bf16.mxu0 %v8932_v56  ;;  %v8988_v54 = vcombine.high %v3993_v47, %v3997_v48  ;;  %v8990_v56 = vcombine.high %v3994_v50, %v3998_v24  ;;  %v4045_v44 = vld [vmem:[#allocation6 + $0x3e0] sm:$0xff] }
 0x278   :  { %7203 = vmatprep.subr.bf16.mxu1 %v8934_v58  ;;  %v4001_v58 = vld [vmem:[#allocation6 + $0x280] sm:$0xff] }
 0x279   :  { %v8995_v6 = vcombine.low %v4001_v58, %v4005_v59 }
 0x27a   :  { %7040 = vmatpush1.bf16.msra.mxu0 %v8931_v63  ;;  %v8989_v63 = vcombine.low %v3994_v50, %v3998_v24  ;;  %v9036_v50 = vcombine.high %v4041_v43, %v4045_v44 }
 0x27b   :  { %7204 = vmatpush1.bf16.msra.mxu1 %v8933_v55  ;;  %7041 = vmatprep.subr.bf16.mxu0 %v8940_v0  ;;  %v8996_v55 = vcombine.high %v4001_v58, %v4005_v59  ;;  %v8998_v0 = vcombine.high %v4002_v60, %v4006_v61  ;;  %v4054_v58 = vld [vmem:[#allocation6 + $0x428] sm:$0xff]  ;;  %v9035_v59 = vcombine.low %v4041_v43, %v4045_v44 }
 0x27c   :  { %7205 = vmatprep.subr.bf16.mxu1 %v8942_v1  ;;  %v4009_v1 = vld [vmem:[#allocation6 + $0x2c0] sm:$0xff]  ;;  %v4090_v43 = vld [vmem:[#allocation6 + $0x548] sm:$0xff] }
 0x27d   :  { %v9003_v21 = vcombine.low %v4009_v1, %v4013_v39  ;;  %v4094_v44 = vld [vmem:[#allocation6 + $0x568] sm:$0xff] }
 0x27e   :  { %7042 = vmatpush1.bf16.msra.mxu0 %v8939_v7  ;;  %v8997_v7 = vcombine.low %v4002_v60, %v4006_v61 }
 0x27f   :  { %7206 = vmatpush1.bf16.msra.mxu1 %v8941_v10  ;;  %7043 = vmatprep.subr.bf16.mxu0 %v8948_v11  ;;  %v9004_v10 = vcombine.high %v4009_v1, %v4013_v39  ;;  %v9006_v11 = vcombine.high %v4010_v3, %v4014_v5  ;;  %v4058_v39 = vld [vmem:[#allocation6 + $0x448] sm:$0xff] }
 0x280   :  { %7207 = vmatprep.subr.bf16.mxu1 %v8950_v14  ;;  %v4017_v14 = vld [vmem:[#allocation6 + $0x300] sm:$0xff] }
 0x281   :  { %v9011_v29 = vcombine.low %v4017_v14, %v4021_v17 }
 0x282   :  { %7044 = vmatpush1.bf16.msra.mxu0 %v8947_v22  ;;  %v9005_v22 = vcombine.low %v4010_v3, %v4014_v5  ;;  %v4062_v3 = vld [vmem:[#allocation6 + $0x468] sm:$0xff] }
 0x283   :  { %7208 = vmatpush1.bf16.msra.mxu1 %v8949_v57  ;;  %7045 = vmatprep.subr.bf16.mxu0 %v8956_v53  ;;  %v9012_v57 = vcombine.high %v4017_v14, %v4021_v17  ;;  %v9014_v53 = vcombine.high %v4018_v18, %v4022_v20  ;;  %v9054_v14 = vcombine.high %v4058_v39, %v4062_v3  ;;  %v4066_v17 = vld [vmem:[#allocation6 + $0x488] sm:$0xff] }
 0x284   :  { %7209 = vmatprep.subr.bf16.mxu1 %v8958_v26  ;;  %v4025_v26 = vld [vmem:[#allocation6 + $0x340] sm:$0xff] }
 0x286   :  { %7046 = vmatpush1.bf16.msra.mxu0 %v8955_v30  ;;  %v623_v30 = vsub.s32 0, %v10127_v2 }
 0x287   :  { %7210 = vmatpush1.bf16.msra.mxu1 %v8957_v31  ;;  %7047 = vmatprep.subr.bf16.mxu0 %v8964_v33  ;;  %v9013_v31 = vcombine.low %v4018_v18, %v4022_v20  ;;  %v9020_v33 = vcombine.high %v4025_v26, %v4029_v27  ;;  %v4070_v18 = vld [vmem:[#allocation6 + $0x4a8] sm:$0xff] }
 0x288   :  { %7211 = vmatprep.subr.bf16.mxu1 %v8966_v34  ;;  %v9022_v34 = vcombine.high %v4026_v12, %v4030_v28 }
 0x28a   :  { %7048 = vmatpush1.bf16.msra.mxu0 %v8963_v23  ;;  %v4038_v23 = vld [vmem:[#allocation6 + $0x3a8] sm:$0xff] }
 0x28b   :  { %7212 = vmatpush1.bf16.msra.mxu1 %v8965_v38  ;;  %7049 = vmatprep.subr.bf16.mxu0 %v8972_v40  ;;  %v9019_v38 = vcombine.low %v4025_v26, %v4029_v27  ;;  %v624_v40 = vrot.slane %v10130_v19, %v623_v30  ;;  %v9030_v36 = vcombine.high %v4034_v25, %v4038_v23  ;;  %v4077_v26 = vld [vmem:[#allocation6 + $0x4e0] sm:$0xff]  ;;  %v4074_v27 = vld [vmem:[#allocation6 + $0x4c8] sm:$0xff] }
 0x28c   :  { %7213 = vmatprep.subr.bf16.mxu1 %v8974_v41  ;;  %v9021_v41 = vcombine.low %v4026_v12, %v4030_v28  ;;  %v9029_v48 = vcombine.low %v4034_v25, %v4038_v23  ;;  %v4078_v12 = vld [vmem:[#allocation6 + $0x4e8] sm:$0xff] }
 0x28d   :  { %v9580_v47 = vadd.f32 %v10119_v4, %v624_v40  ;;  %v4086_v25 = vld [vmem:[#allocation6 + $0x528] sm:$0xff] }
 0x28e   :  { %7050 = vmatpush1.bf16.msra.mxu0 %v8971_v45  ;;  %v636_v45 = vrot.slane %v10130_v19, %v635_v37 }
 0x28f   :  { %7214 = vmatpush1.bf16.msra.mxu1 %v8973_v46  ;;  %7051 = vmatprep.subr.bf16.mxu0 %v8980_v9  ;;  %v4042_v46 = vld [vmem:[#allocation6 + $0x3c8] sm:$0xff]  ;;  %v3905_v60 = vmax.f32 %v9580_v47, 0.0  ;;  %v4097_v47 = vld [vmem:[#allocation6 + $0x580] sm:$0xff] }
 0x290   :  { %7215 = vmatprep.subr.bf16.mxu1 %v8982_v32  ;;  %v4046_v9 = vld [vmem:[#allocation6 + $0x3e8] sm:$0xff]  ;;  %v9027_v32 = vcombine.low %v4033_v15, %v4037_v35  ;;  %v4085_v15 = vld [vmem:[#allocation6 + $0x520] sm:$0xff] }
 0x291   :  { %v9038_v24 = vcombine.high %v4042_v46, %v4046_v9  ;;  %v9037_v61 = vcombine.low %v4042_v46, %v4046_v9  ;;  %v10152_v5 = vpack.c.bf16 %v3905_v60, %v3905_v60  ;;  %v4082_v35 = vld [vmem:[#allocation6 + $0x508] sm:$0xff] }
 0x292   :  { %7052 = vmatpush1.bf16.msra.mxu0 %v8979_v51  ;;  %v4049_v51 = vld [vmem:[#allocation6 + $0x400] sm:$0xff]  ;;  %v9077_v46 = vcombine.low %v4082_v35, %v4086_v25  ;;  %v4106_v60 = vld [vmem:[#allocation6 + $0x5c8] sm:$0xff] }
 0x293   :  { %7216 = vmatpush1.bf16.msra.mxu1 %v8981_v52  ;;  %7053 = vmatprep.subr.bf16.mxu0 %v8988_v54  ;;  %v4053_v52 = vld [vmem:[#allocation6 + $0x420] sm:$0xff]  ;;  %v9583_v54 = vadd.f32 %v10125_v13, %v636_v45 }
 0x294   :  { %7217 = vmatprep.subr.bf16.mxu1 %v8990_v56  ;;  %v4050_v56 = vld [vmem:[#allocation6 + $0x408] sm:$0xff]  ;;  %v9043_v1 = vcombine.low %v4049_v51, %v4053_v52 }
 0x295   :  { %v9046_v4 = vcombine.high %v4050_v56, %v4054_v58  ;;  %v9045_v13 = vcombine.low %v4050_v56, %v4054_v58  ;;  %v4105_v58 = vld [vmem:[#allocation6 + $0x5c0] sm:$0xff] }
 0x296   :  { %7054 = vmatpush1.bf16.msra.mxu0 %v8987_v62  ;;  %v9044_v62 = vcombine.high %v4049_v51, %v4053_v52  ;;  %v9085_v52 = vcombine.low %v4090_v43, %v4094_v44 }
 0x297   :  { %7218 = vmatpush1.bf16.msra.mxu1 %v8989_v63  ;;  %7055 = vmatprep.subr.bf16.mxu0 %v8996_v55  ;;  %v3908_v63 = vmax.f32 %v9583_v54, 0.0  ;;  %v4057_v55 = vld [vmem:[#allocation6 + $0x440] sm:$0xff] }
 0x298   :  { %7219 = vmatprep.subr.bf16.mxu1 %v8998_v0  ;;  %v4061_v0 = vld [vmem:[#allocation6 + $0x460] sm:$0xff] }
 0x299   :  { %v9051_v20 = vcombine.low %v4057_v55, %v4061_v0 }
 0x29a   :  { %7056 = vmatpush1.bf16.msra.mxu0 %v8995_v6  ;;  %v9052_v6 = vcombine.high %v4057_v55, %v4061_v0  ;;  %v4113_v0 = vld [vmem:[#allocation6 + $0x600] sm:$0xff] }
 0x29b   :  { %7220 = vmatpush1.bf16.msra.mxu1 %v8997_v7  ;;  %7057 = vmatprep.subr.bf16.mxu0 %v9004_v10  ;;  %v4065_v7 = vld [vmem:[#allocation6 + $0x480] sm:$0xff] }
 0x29c   :  { %7221 = vmatprep.subr.bf16.mxu1 %v9006_v11  ;;  %v4069_v10 = vld [vmem:[#allocation6 + $0x4a0] sm:$0xff]  ;;  %v10154_v11 = vpack.c.bf16 %v3908_v63, %v3908_v63 }
 0x29d   :  { %v9059_v28 = vcombine.low %v4065_v7, %v4069_v10 }
 0x29e   :  { %7058 = vmatpush1.bf16.msra.mxu0 %v9003_v21  ;;  %v9053_v21 = vcombine.low %v4058_v39, %v4062_v3  ;;  %v4114_v39 = vld [vmem:[#allocation6 + $0x608] sm:$0xff] }
 0x29f   :  { %7222 = vmatpush1.bf16.msra.mxu1 %v9005_v22  ;;  %7059 = vmatprep.subr.bf16.mxu0 %v9012_v57  ;;  %v9060_v22 = vcombine.high %v4065_v7, %v4069_v10  ;;  %v9062_v57 = vcombine.high %v4066_v17, %v4070_v18  ;;  %v4118_v3 = vld [vmem:[#allocation6 + $0x628] sm:$0xff] }
 0x2a0   :  { %7223 = vmatprep.subr.bf16.mxu1 %v9014_v53  ;;  %v4073_v53 = vld [vmem:[#allocation6 + $0x4c0] sm:$0xff]  ;;  %v9110_v10 = vcombine.high %v4114_v39, %v4118_v3 }
 0x2a1   :  { %v9067_v23 = vcombine.low %v4073_v53, %v4077_v26 }
 0x2a2   :  { %7060 = vmatpush1.bf16.msra.mxu0 %v9011_v29  ;;  %v9061_v29 = vcombine.low %v4066_v17, %v4070_v18  ;;  %v4125_v17 = vld [vmem:[#allocation6 + $0x660] sm:$0xff]  ;;  %v4122_v18 = vld [vmem:[#allocation6 + $0x648] sm:$0xff] }
 0x2a3   :  { %7224 = vmatpush1.bf16.msra.mxu1 %v9013_v31  ;;  %7061 = vmatprep.subr.bf16.mxu0 %v9020_v33  ;;  %v9068_v31 = vcombine.high %v4073_v53, %v4077_v26  ;;  %v9070_v33 = vcombine.high %v4074_v27, %v4078_v12  ;;  %v4129_v26 = vld [vmem:[#allocation6 + $0x680] sm:$0xff] }
 0x2a4   :  { %7225 = vmatprep.subr.bf16.mxu1 %v9022_v34  ;;  %v4081_v34 = vld [vmem:[#allocation6 + $0x500] sm:$0xff] }
 0x2a5   :  { %v9076_v40 = vcombine.high %v4081_v34, %v4085_v15  ;;  %v9075_v45 = vcombine.low %v4081_v34, %v4085_v15  ;;  %v4137_v15 = vld [vmem:[#allocation6 + $0x6c0] sm:$0xff] }
 0x2a6   :  { %7062 = vmatpush1.bf16.msra.mxu0 %v9019_v38  ;;  %v9069_v38 = vcombine.low %v4074_v27, %v4078_v12  ;;  %v4133_v27 = vld [vmem:[#allocation6 + $0x6a0] sm:$0xff]  ;;  %v4130_v12 = vld [vmem:[#allocation6 + $0x688] sm:$0xff] }
 0x2a7   :  { %7226 = vmatpush1.bf16.msra.mxu1 %v9021_v41  ;;  %7063 = vmatprep.subr.bf16.mxu0 %v9028_v42  ;;  %v9078_v41 = vcombine.high %v4082_v35, %v4086_v25  ;;  %v4089_v42 = vld [vmem:[#allocation6 + $0x540] sm:$0xff]  ;;  %v4138_v25 = vld [vmem:[#allocation6 + $0x6c8] sm:$0xff] }
 0x2a8   :  { %7227 = vmatprep.subr.bf16.mxu1 %v9030_v36  ;;  %v4093_v36 = vld [vmem:[#allocation6 + $0x560] sm:$0xff] }
 0x2a9   :  { %v9084_v9 = vcombine.high %v4089_v42, %v4093_v36  ;;  %v9083_v51 = vcombine.low %v4089_v42, %v4093_v36  ;;  %v4141_v35 = vld [vmem:[#allocation6 + $0x6e0] sm:$0xff] }
 0x2aa   :  { %7064 = vmatpush1.bf16.msra.mxu0 %v9027_v32  ;;  %v9086_v32 = vcombine.high %v4090_v43, %v4094_v44  ;;  %v4145_v36 = vld [vmem:[#allocation6 + $0x700] sm:$0xff]  ;;  %v4146_v44 = vld [vmem:[#allocation6 + $0x708] sm:$0xff] }
 0x2ab   :  { %7228 = vmatpush1.bf16.msra.mxu1 %v9029_v48  ;;  %7065 = vmatprep.subr.bf16.mxu0 %v9036_v50  ;;  %v4101_v48 = vld [vmem:[#allocation6 + $0x5a0] sm:$0xff]  ;;  %v4098_v50 = vld [vmem:[#allocation6 + $0x588] sm:$0xff] }
 0x2ac   :  { %7229 = vmatprep.subr.bf16.mxu1 %v9038_v24  ;;  %v4102_v24 = vld [vmem:[#allocation6 + $0x5a8] sm:$0xff]  ;;  %v9092_v54 = vcombine.high %v4097_v47, %v4101_v48  ;;  %v4149_v43 = vld [vmem:[#allocation6 + $0x720] sm:$0xff] }
 0x2ad   :  { %v9094_v56 = vcombine.high %v4098_v50, %v4102_v24 }
 0x2ae   :  { %7066 = vmatpush1.bf16.msra.mxu0 %v9035_v59  ;;  %v4109_v59 = vld [vmem:[#allocation6 + $0x5e0] sm:$0xff] }
 0x2af   :  { %7230 = vmatpush1.bf16.msra.mxu1 %v9037_v61  ;;  %7076 = vmatprep.subr.bf16.mxu0 %v9044_v62  ;;  %v4110_v61 = vld [vmem:[#allocation6 + $0x5e8] sm:$0xff]  ;;  %v9091_v62 = vcombine.low %v4097_v47, %v4101_v48  ;;  %v9100_v63 = vcombine.high %v4105_v58, %v4109_v59  ;;  %v4153_v48 = vld [vmem:[#allocation6 + $0x740] sm:$0xff] }
 0x2b0   :  { %7240 = vmatprep.subr.bf16.mxu1 %v9046_v4  ;;  %v9093_v4 = vcombine.low %v4098_v50, %v4102_v24  ;;  %v9102_v55 = vcombine.high %v4106_v60, %v4110_v61  ;;  %v4157_v50 = vld [vmem:[#allocation6 + $0x760] sm:$0xff]  ;;  %v4154_v24 = vld [vmem:[#allocation6 + $0x748] sm:$0xff] }
 0x2b1   :  { %7068 = vmatmul.mubr.bf16.vlgmr.msra.gmra.mrb[8].mxu0 %v10152_v5 }
 0x2b2   :  { %7232 = vmatmul.mubr.bf16.vlgmr.msra.gmra.mrb[8].mxu1 %v10152_v5  ;;  %7077 = vmatpush1.bf16.msra.mxu0 %v9043_v1  ;;  %v4117_v1 = vld [vmem:[#allocation6 + $0x620] sm:$0xff] }
 0x2b3   :  { %7108 = vmatprep.mubr.bf16.mxu0 %v10154_v11  ;;  %7241 = vmatpush1.bf16.msra.mxu1 %v9045_v13  ;;  %v9099_v13 = vcombine.low %v4105_v58, %v4109_v59  ;;  %v9108_v7 = vcombine.high %v4113_v0, %v4117_v1  ;;  %v9148_v58 = vcombine.high %v4153_v48, %v4157_v50 }
 0x2b4   :  { %7272 = vmatprep.mubr.bf16.mxu1 %v10154_v11  ;;  %7078 = vmatprep.subr.bf16.mxu0 %v9052_v6  ;;  %v9101_v6 = vcombine.low %v4106_v60, %v4110_v61  ;;  %v4161_v60 = vld [vmem:[#allocation6 + $0x780] sm:$0xff] }
 0x2b5   :  { %7242 = vmatprep.subr.bf16.mxu1 %v9054_v14  ;;  %v4121_v14 = vld [vmem:[#allocation6 + $0x640] sm:$0xff] }
 0x2b6   :  { %7079 = vmatpush1.bf16.msra.mxu0 %v9051_v20  ;;  %v4126_v20 = vld [vmem:[#allocation6 + $0x668] sm:$0xff]  ;;  %v4165_v61 = vld [vmem:[#allocation6 + $0x7a0] sm:$0xff] }
 0x2b7   :  { %7243 = vmatpush1.bf16.msra.mxu1 %v9053_v21  ;;  %7080 = vmatprep.subr.bf16.mxu0 %v9060_v22  ;;  %v9107_v21 = vcombine.low %v4113_v0, %v4117_v1  ;;  %v9109_v22 = vcombine.low %v4114_v39, %v4118_v3  ;;  %v9118_v53 = vcombine.high %v4122_v18, %v4126_v20  ;;  %v4169_v3 = vld [vmem:[#allocation6 + $0x7c0] sm:$0xff] }
 0x2b8   :  { %7244 = vmatprep.subr.bf16.mxu1 %v9062_v57  ;;  %v9116_v57 = vcombine.high %v4121_v14, %v4125_v17  ;;  %v9156_v1 = vcombine.high %v4161_v60, %v4165_v61 }
 0x2ba   :  { %7081 = vmatpush1.bf16.msra.mxu0 %v9059_v28  ;;  %v4134_v28 = vld [vmem:[#allocation6 + $0x6a8] sm:$0xff] }
 0x2bb   :  { %7245 = vmatpush1.bf16.msra.mxu1 %v9061_v29  ;;  %7082 = vmatprep.subr.bf16.mxu0 %v9068_v31  ;;  %v9115_v29 = vcombine.low %v4121_v14, %v4125_v17  ;;  %v9117_v31 = vcombine.low %v4122_v18, %v4126_v20  ;;  %v9126_v34 = vcombine.high %v4130_v12, %v4134_v28  ;;  %v4177_v20 = vld [vmem:[#allocation6 + $0x800] sm:$0xff] }
 0x2bc   :  { %7246 = vmatprep.subr.bf16.mxu1 %v9070_v33  ;;  %v9124_v33 = vcombine.high %v4129_v26, %v4133_v27 }
 0x2be   :  { %7083 = vmatpush1.bf16.msra.mxu0 %v9067_v23  ;;  %v4142_v23 = vld [vmem:[#allocation6 + $0x6e8] sm:$0xff] }
 0x2bf   :  { %7247 = vmatpush1.bf16.msra.mxu1 %v9069_v38  ;;  %7084 = vmatprep.subr.bf16.mxu0 %v9076_v40  ;;  %v9123_v38 = vcombine.low %v4129_v26, %v4133_v27  ;;  %v9125_v40 = vcombine.low %v4130_v12, %v4134_v28  ;;  %v9134_v42 = vcombine.high %v4138_v25, %v4142_v23 }
 0x2c0   :  { %7248 = vmatprep.subr.bf16.mxu1 %v9078_v41  ;;  %v9132_v41 = vcombine.high %v4137_v15, %v4141_v35 }
 0x2c2   :  { %7085 = vmatpush1.bf16.msra.mxu0 %v9075_v45  ;;  %v4150_v45 = vld [vmem:[#allocation6 + $0x728] sm:$0xff] }
 0x2c3   :  { %7249 = vmatpush1.bf16.msra.mxu1 %v9077_v46  ;;  %7086 = vmatprep.subr.bf16.mxu0 %v9084_v9  ;;  %v9131_v46 = vcombine.low %v4137_v15, %v4141_v35  ;;  %v9133_v9 = vcombine.low %v4138_v25, %v4142_v23  ;;  %v9142_v47 = vcombine.high %v4146_v44, %v4150_v45 }
 0x2c4   :  { %7250 = vmatprep.subr.bf16.mxu1 %v9086_v32  ;;  %v9140_v32 = vcombine.high %v4145_v36, %v4149_v43 }
 0x2c6   :  { %7087 = vmatpush1.bf16.msra.mxu0 %v9083_v51  ;;  %v4158_v51 = vld [vmem:[#allocation6 + $0x768] sm:$0xff] }
 0x2c7   :  { %7251 = vmatpush1.bf16.msra.mxu1 %v9085_v52  ;;  %7088 = vmatprep.subr.bf16.mxu0 %v9092_v54  ;;  %v9139_v52 = vcombine.low %v4145_v36, %v4149_v43  ;;  %v631_v54 = vsub.s32 2, %v10127_v2  ;;  %v9150_v59 = vcombine.high %v4154_v24, %v4158_v51  ;;  %v9149_v0 = vcombine.low %v4154_v24, %v4158_v51 }
 0x2c8   :  { %7252 = vmatprep.subr.bf16.mxu1 %v9094_v56  ;;  %v9141_v56 = vcombine.low %v4146_v44, %v4150_v45 }
 0x2ca   :  { %7089 = vmatpush1.bf16.msra.mxu0 %v9091_v62  ;;  %v4162_v62 = vld [vmem:[#allocation6 + $0x788] sm:$0xff] }
 0x2cb   :  { %7253 = vmatpush1.bf16.msra.mxu1 %v9093_v4  ;;  %7090 = vmatprep.subr.bf16.mxu0 %v9100_v63  ;;  %v4166_v4 = vld [vmem:[#allocation6 + $0x7a8] sm:$0xff]  ;;  %v9147_v63 = vcombine.low %v4153_v48, %v4157_v50 }
 0x2cc   :  { %7254 = vmatprep.subr.bf16.mxu1 %v9102_v55  ;;  %v632_v55 = vrot.slane %v10130_v19, %v631_v54  ;;  %v9158_v39 = vcombine.high %v4162_v62, %v4166_v4  ;;  %v9157_v17 = vcombine.low %v4162_v62, %v4166_v4 }
 0x2ce   :  { %7091 = vmatpush1.bf16.msra.mxu0 %v9099_v13  ;;  %v4173_v13 = vld [vmem:[#allocation6 + $0x7e0] sm:$0xff]  ;;  %v9582_v14 = vadd.f32 %v10121_v8, %v632_v55 }
 0x2cf   :  { %7255 = vmatpush1.bf16.msra.mxu1 %v9101_v6  ;;  %7092 = vmatprep.subr.bf16.mxu0 %v9108_v7  ;;  %v4170_v6 = vld [vmem:[#allocation6 + $0x7c8] sm:$0xff]  ;;  %v9164_v18 = vcombine.high %v4169_v3, %v4173_v13  ;;  %v4185_v8 = vld [vmem:[#allocation6 + $0x840] sm:$0xff] }
 0x2d0   :  { %7256 = vmatprep.subr.bf16.mxu1 %v9110_v10  ;;  %v4174_v7 = vld [vmem:[#allocation6 + $0x7e8] sm:$0xff]  ;;  %v9155_v10 = vcombine.low %v4161_v60, %v4165_v61  ;;  %v3907_v26 = vmax.f32 %v9582_v14, 0.0  ;;  %v4221_v55 = vld [vmem:[#allocation6 + $0x960] sm:$0xff] }
 0x2d1   :  { %v9166_v19 = vcombine.high %v4170_v6, %v4174_v7  ;;  %v9165_v27 = vcombine.low %v4170_v6, %v4174_v7  ;;  %v4225_v7 = vld [vmem:[#allocation6 + $0x980] sm:$0xff]  ;;  %v4226_v14 = vld [vmem:[#allocation6 + $0x988] sm:$0xff] }
 0x2d2   :  { %7093 = vmatpush1.bf16.msra.mxu0 %v9107_v21  ;;  %v4181_v21 = vld [vmem:[#allocation6 + $0x820] sm:$0xff]  ;;  %v10165_v15 = vpack.c.bf16 %v3907_v26, %v3907_v26  ;;  %v4238_v26 = vld [vmem:[#allocation6 + $0x9e8] sm:$0xff] }
 0x2d3   :  { %7257 = vmatpush1.bf16.msra.mxu1 %v9109_v22  ;;  %7094 = vmatprep.subr.bf16.mxu0 %v9116_v57  ;;  %v4178_v22 = vld [vmem:[#allocation6 + $0x808] sm:$0xff]  ;;  %v9172_v12 = vcombine.high %v4177_v20, %v4181_v21 }
 0x2d4   :  { %7258 = vmatprep.subr.bf16.mxu1 %v9118_v53  ;;  %v4182_v57 = vld [vmem:[#allocation6 + $0x828] sm:$0xff]  ;;  %v9163_v53 = vcombine.low %v4169_v3, %v4173_v13 }
 0x2d5   :  { %v9174_v28 = vcombine.high %v4178_v22, %v4182_v57  ;;  %v9173_v35 = vcombine.low %v4178_v22, %v4182_v57  ;;  %v4233_v22 = vld [vmem:[#allocation6 + $0x9c0] sm:$0xff] }
 0x2d6   :  { %7095 = vmatpush1.bf16.msra.mxu0 %v9115_v29  ;;  %v4189_v29 = vld [vmem:[#allocation6 + $0x860] sm:$0xff] }
 0x2d7   :  { %7259 = vmatpush1.bf16.msra.mxu1 %v9117_v31  ;;  %7096 = vmatprep.subr.bf16.mxu0 %v9124_v33  ;;  %v4186_v31 = vld [vmem:[#allocation6 + $0x848] sm:$0xff]  ;;  %v9180_v25 = vcombine.high %v4185_v8, %v4189_v29  ;;  %v9179_v36 = vcombine.low %v4185_v8, %v4189_v29  ;;  %v4237_v57 = vld [vmem:[#allocation6 + $0x9e0] sm:$0xff] }
 0x2d8   :  { %7260 = vmatprep.subr.bf16.mxu1 %v9126_v34  ;;  %v4190_v33 = vld [vmem:[#allocation6 + $0x868] sm:$0xff]  ;;  %v9171_v34 = vcombine.low %v4177_v20, %v4181_v21  ;;  %v4241_v29 = vld [vmem:[#allocation6 + $0xa00] sm:$0xff] }
 0x2d9   :  { %v9182_v23 = vcombine.high %v4186_v31, %v4190_v33  ;;  %v9181_v43 = vcombine.low %v4186_v31, %v4190_v33  ;;  %v4245_v31 = vld [vmem:[#allocation6 + $0xa20] sm:$0xff]  ;;  %v4242_v33 = vld [vmem:[#allocation6 + $0xa08] sm:$0xff] }
 0x2da   :  { %7097 = vmatpush1.bf16.msra.mxu0 %v9123_v38  ;;  %v4193_v38 = vld [vmem:[#allocation6 + $0x880] sm:$0xff] }
 0x2db   :  { %7261 = vmatpush1.bf16.msra.mxu1 %v9125_v40  ;;  %7098 = vmatprep.subr.bf16.mxu0 %v9132_v41  ;;  %v4197_v40 = vld [vmem:[#allocation6 + $0x8a0] sm:$0xff]  ;;  %v4194_v41 = vld [vmem:[#allocation6 + $0x888] sm:$0xff] }
 0x2dc   :  { %7262 = vmatprep.subr.bf16.mxu1 %v9134_v42  ;;  %v4198_v42 = vld [vmem:[#allocation6 + $0x8a8] sm:$0xff]  ;;  %v9188_v44 = vcombine.high %v4193_v38, %v4197_v40  ;;  %v9187_v48 = vcombine.low %v4193_v38, %v4197_v40  ;;  %v4249_v40 = vld [vmem:[#allocation6 + $0xa40] sm:$0xff] }
 0x2dd   :  { %v9190_v45 = vcombine.high %v4194_v41, %v4198_v42  ;;  %v9189_v50 = vcombine.low %v4194_v41, %v4198_v42  ;;  %v4253_v41 = vld [vmem:[#allocation6 + $0xa60] sm:$0xff]  ;;  %v4250_v42 = vld [vmem:[#allocation6 + $0xa48] sm:$0xff] }
 0x2de   :  { %7099 = vmatpush1.bf16.msra.mxu0 %v9131_v46  ;;  %v4201_v46 = vld [vmem:[#allocation6 + $0x8c0] sm:$0xff] }
 0x2df   :  { %7263 = vmatpush1.bf16.msra.mxu1 %v9133_v9  ;;  %7100 = vmatprep.subr.bf16.mxu0 %v9140_v32  ;;  %v4205_v9 = vld [vmem:[#allocation6 + $0x8e0] sm:$0xff]  ;;  %v4202_v32 = vld [vmem:[#allocation6 + $0x8c8] sm:$0xff] }
 0x2e0   :  { %7264 = vmatprep.subr.bf16.mxu1 %v9142_v47  ;;  %v4206_v47 = vld [vmem:[#allocation6 + $0x8e8] sm:$0xff]  ;;  %v9196_v24 = vcombine.high %v4201_v46, %v4205_v9  ;;  %v9195_v60 = vcombine.low %v4201_v46, %v4205_v9  ;;  %v4257_v9 = vld [vmem:[#allocation6 + $0xa80] sm:$0xff] }
 0x2e1   :  { %v9198_v51 = vcombine.high %v4202_v32, %v4206_v47  ;;  %v9197_v61 = vcombine.low %v4202_v32, %v4206_v47  ;;  %v4261_v32 = vld [vmem:[#allocation6 + $0xaa0] sm:$0xff]  ;;  %v4258_v47 = vld [vmem:[#allocation6 + $0xa88] sm:$0xff] }
 0x2e2   :  { %7101 = vmatpush1.bf16.msra.mxu0 %v9139_v52  ;;  %v4209_v52 = vld [vmem:[#allocation6 + $0x900] sm:$0xff] }
 0x2e3   :  { %7265 = vmatpush1.bf16.msra.mxu1 %v9141_v56  ;;  %7102 = vmatprep.subr.bf16.mxu0 %v9148_v58  ;;  %v4213_v56 = vld [vmem:[#allocation6 + $0x920] sm:$0xff]  ;;  %v4210_v58 = vld [vmem:[#allocation6 + $0x908] sm:$0xff] }
 0x2e4   :  { %7266 = vmatprep.subr.bf16.mxu1 %v9150_v59  ;;  %v4214_v59 = vld [vmem:[#allocation6 + $0x928] sm:$0xff]  ;;  %v9204_v62 = vcombine.high %v4209_v52, %v4213_v56 }
 0x2e5   :  { %v9206_v4 = vcombine.high %v4210_v58, %v4214_v59  ;;  %v9205_v3 = vcombine.low %v4210_v58, %v4214_v59  ;;  %v4269_v58 = vld [vmem:[#allocation6 + $0xae0] sm:$0xff]  ;;  %v4266_v59 = vld [vmem:[#allocation6 + $0xac8] sm:$0xff] }
 0x2e6   :  { %7103 = vmatpush1.bf16.msra.mxu0 %v9147_v63  ;;  %v4217_v63 = vld [vmem:[#allocation6 + $0x940] sm:$0xff] }
 0x2e7   :  { %7267 = vmatpush1.bf16.msra.mxu1 %v9149_v0  ;;  %7104 = vmatprep.subr.bf16.mxu0 %v9156_v1  ;;  %v4218_v0 = vld [vmem:[#allocation6 + $0x948] sm:$0xff]  ;;  %v9212_v13 = vcombine.high %v4217_v63, %v4221_v55 }
 0x2e8   :  { %7268 = vmatprep.subr.bf16.mxu1 %v9158_v39  ;;  %v4222_v1 = vld [vmem:[#allocation6 + $0x968] sm:$0xff]  ;;  %v9203_v39 = vcombine.low %v4209_v52, %v4213_v56  ;;  %v4265_v56 = vld [vmem:[#allocation6 + $0xac0] sm:$0xff] }
 0x2e9   :  { %v9214_v6 = vcombine.high %v4218_v0, %v4222_v1 }
 0x2ea   :  { %7105 = vmatpush1.bf16.msra.mxu0 %v9155_v10  ;;  %v4229_v10 = vld [vmem:[#allocation6 + $0x9a0] sm:$0xff] }
 0x2eb   :  { %7269 = vmatpush1.bf16.msra.mxu1 %v9157_v17  ;;  %7106 = vmatprep.subr.bf16.mxu0 %v9164_v18  ;;  %v4230_v17 = vld [vmem:[#allocation6 + $0x9a8] sm:$0xff]  ;;  %v9211_v18 = vcombine.low %v4217_v63, %v4221_v55  ;;  %v9220_v20 = vcombine.high %v4225_v7, %v4229_v10  ;;  %v4273_v55 = vld [vmem:[#allocation6 + $0xb00] sm:$0xff] }
 0x2ec   :  { %7270 = vmatprep.subr.bf16.mxu1 %v9166_v19  ;;  %v9213_v19 = vcombine.low %v4218_v0, %v4222_v1  ;;  %v9222_v21 = vcombine.high %v4226_v14, %v4230_v17  ;;  %v4277_v0 = vld [vmem:[#allocation6 + $0xb20] sm:$0xff]  ;;  %v4274_v1 = vld [vmem:[#allocation6 + $0xb08] sm:$0xff] }
 0x2ee   :  { %7107 = vmatpush1.bf16.msra.mxu0 %v9163_v53  ;;  %v4234_v53 = vld [vmem:[#allocation6 + $0x9c8] sm:$0xff] }
 0x2ef   :  { %7271 = vmatpush1.bf16.msra.mxu1 %v9165_v27  ;;  %7117 = vmatprep.subr.bf16.mxu0 %v9172_v12  ;;  %v9219_v27 = vcombine.low %v4225_v7, %v4229_v10  ;;  %v9221_v12 = vcombine.low %v4226_v14, %v4230_v17  ;;  %v9230_v8 = vcombine.high %v4234_v53, %v4238_v26  ;;  %v4281_v10 = vld [vmem:[#allocation6 + $0xb40] sm:$0xff]  ;;  %v4282_v17 = vld [vmem:[#allocation6 + $0xb48] sm:$0xff] }
 0x2f0   :  { %7281 = vmatprep.subr.bf16.mxu1 %v9174_v28  ;;  %v9228_v28 = vcombine.high %v4233_v22, %v4237_v57  ;;  %v4285_v14 = vld [vmem:[#allocation6 + $0xb60] sm:$0xff] }
 0x2f1   :  { %7109 = vmatmul.mubr.bf16.vlgmr.msra.gmra.mrb[8].mxu0 %v10165_v15 }
 0x2f2   :  { %7273 = vmatmul.mubr.bf16.vlgmr.msra.gmra.mrb[8].mxu1 %v10165_v15  ;;  %7118 = vmatpush1.bf16.msra.mxu0 %v9171_v34  ;;  %v4246_v34 = vld [vmem:[#allocation6 + $0xa28] sm:$0xff] }
 0x2f3   :  { %7282 = vmatpush1.bf16.msra.mxu1 %v9173_v35  ;;  %7119 = vmatprep.subr.bf16.mxu0 %v9180_v25  ;;  %v9227_v35 = vcombine.low %v4233_v22, %v4237_v57  ;;  %v9229_v25 = vcombine.low %v4234_v53, %v4238_v26  ;;  %v9238_v38 = vcombine.high %v4242_v33, %v4246_v34  ;;  %v4289_v57 = vld [vmem:[#allocation6 + $0xb80] sm:$0xff]  ;;  %v4290_v26 = vld [vmem:[#allocation6 + $0xb88] sm:$0xff] }
 0x2f4   :  { %7283 = vmatprep.subr.bf16.mxu1 %v9182_v23  ;;  %v9236_v23 = vcombine.high %v4241_v29, %v4245_v31  ;;  %v4293_v53 = vld [vmem:[#allocation6 + $0xba0] sm:$0xff] }
 0x2f6   :  { %7120 = vmatpush1.bf16.msra.mxu0 %v9179_v36  ;;  %v4254_v36 = vld [vmem:[#allocation6 + $0xa68] sm:$0xff] }
 0x2f7   :  { %7284 = vmatpush1.bf16.msra.mxu1 %v9181_v43  ;;  %7121 = vmatprep.subr.bf16.mxu0 %v9188_v44  ;;  %v9235_v43 = vcombine.low %v4241_v29, %v4245_v31  ;;  %v9237_v44 = vcombine.low %v4242_v33, %v4246_v34  ;;  %v9246_v46 = vcombine.high %v4250_v42, %v4254_v36  ;;  %v4297_v31 = vld [vmem:[#allocation6 + $0xbc0] sm:$0xff]  ;;  %v4298_v34 = vld [vmem:[#allocation6 + $0xbc8] sm:$0xff] }
 0x2f8   :  { %7285 = vmatprep.subr.bf16.mxu1 %v9190_v45  ;;  %v9244_v45 = vcombine.high %v4249_v40, %v4253_v41  ;;  %v4301_v33 = vld [vmem:[#allocation6 + $0xbe0] sm:$0xff] }
 0x2fa   :  { %7122 = vmatpush1.bf16.msra.mxu0 %v9187_v48  ;;  %v4262_v48 = vld [vmem:[#allocation6 + $0xaa8] sm:$0xff] }
 0x2fb   :  { %7286 = vmatpush1.bf16.msra.mxu1 %v9189_v50  ;;  %7123 = vmatprep.subr.bf16.mxu0 %v9196_v24  ;;  %v9243_v50 = vcombine.low %v4249_v40, %v4253_v41  ;;  %v9245_v24 = vcombine.low %v4250_v42, %v4254_v36  ;;  %v9254_v52 = vcombine.high %v4258_v47, %v4262_v48  ;;  %v4305_v41 = vld [vmem:[#allocation6 + $0xc00] sm:$0xff]  ;;  %v4306_v36 = vld [vmem:[#allocation6 + $0xc08] sm:$0xff] }
 0x2fc   :  { %7287 = vmatprep.subr.bf16.mxu1 %v9198_v51  ;;  %v9252_v51 = vcombine.high %v4257_v9, %v4261_v32  ;;  %v4309_v42 = vld [vmem:[#allocation6 + $0xc20] sm:$0xff] }
 0x2fe   :  { %7124 = vmatpush1.bf16.msra.mxu0 %v9195_v60  ;;  %v4270_v60 = vld [vmem:[#allocation6 + $0xae8] sm:$0xff] }
 0x2ff   :  { %7288 = vmatpush1.bf16.msra.mxu1 %v9197_v61  ;;  %7125 = vmatprep.subr.bf16.mxu0 %v9204_v62  ;;  %v9251_v61 = vcombine.low %v4257_v9, %v4261_v32  ;;  %v9253_v62 = vcombine.low %v4258_v47, %v4262_v48  ;;  %v9262_v63 = vcombine.high %v4266_v59, %v4270_v60  ;;  %v639_v32 = vsub.s32 4, %v10127_v2 }
 0x300   :  { %7289 = vmatprep.subr.bf16.mxu1 %v9206_v4  ;;  %v9260_v4 = vcombine.high %v4265_v56, %v4269_v58  ;;  %v643_v47 = vsub.s32 5, %v10127_v2  ;;  %v651_v48 = vsub.s32 7, %v10127_v2 }
 0x302   :  { %7126 = vmatpush1.bf16.msra.mxu0 %v9203_v39  ;;  %v4278_v39 = vld [vmem:[#allocation6 + $0xb28] sm:$0xff] }
 0x303   :  { %7290 = vmatpush1.bf16.msra.mxu1 %v9205_v3  ;;  %7127 = vmatprep.subr.bf16.mxu0 %v9212_v13  ;;  %v9259_v3 = vcombine.low %v4265_v56, %v4269_v58  ;;  %v9261_v13 = vcombine.low %v4266_v59, %v4270_v60  ;;  %v9270_v7 = vcombine.high %v4274_v1, %v4278_v39 }
 0x304   :  { %7291 = vmatprep.subr.bf16.mxu1 %v9214_v6  ;;  %v9268_v6 = vcombine.high %v4273_v55, %v4277_v0 }
 0x306   :  { %7128 = vmatpush1.bf16.msra.mxu0 %v9211_v18  ;;  %v4286_v18 = vld [vmem:[#allocation6 + $0xb68] sm:$0xff] }
 0x307   :  { %7292 = vmatpush1.bf16.msra.mxu1 %v9213_v19  ;;  %7129 = vmatprep.subr.bf16.mxu0 %v9220_v20  ;;  %v9267_v19 = vcombine.low %v4273_v55, %v4277_v0  ;;  %v9269_v20 = vcombine.low %v4274_v1, %v4278_v39  ;;  %v9278_v22 = vcombine.high %v4282_v17, %v4286_v18 }
 0x308   :  { %7293 = vmatprep.subr.bf16.mxu1 %v9222_v21  ;;  %v9276_v21 = vcombine.high %v4281_v10, %v4285_v14 }
 0x30a   :  { %7130 = vmatpush1.bf16.msra.mxu0 %v9219_v27  ;;  %v4294_v27 = vld [vmem:[#allocation6 + $0xba8] sm:$0xff] }
 0x30b   :  { %7294 = vmatpush1.bf16.msra.mxu1 %v9221_v12  ;;  %7131 = vmatprep.subr.bf16.mxu0 %v9228_v28  ;;  %v9275_v12 = vcombine.low %v4281_v10, %v4285_v14  ;;  %v9277_v28 = vcombine.low %v4282_v17, %v4286_v18  ;;  %v9286_v29 = vcombine.high %v4290_v26, %v4294_v27  ;;  %v4314_v10 = vld [vmem:[#allocation6 + $0xc48] sm:$0xff] }
 0x30c   :  { %7295 = vmatprep.subr.bf16.mxu1 %v9230_v8  ;;  %v9284_v8 = vcombine.high %v4289_v57, %v4293_v53  ;;  %v4318_v14 = vld [vmem:[#allocation6 + $0xc68] sm:$0xff]  ;;  %v9299_v18 = vcombine.low %v4305_v41, %v4309_v42 }
 0x30e   :  { %7132 = vmatpush1.bf16.msra.mxu0 %v9227_v35  ;;  %v4302_v35 = vld [vmem:[#allocation6 + $0xbe8] sm:$0xff] }
 0x30f   :  { %7296 = vmatpush1.bf16.msra.mxu1 %v9229_v25  ;;  %7133 = vmatprep.subr.bf16.mxu0 %v9236_v23  ;;  %v9283_v25 = vcombine.low %v4289_v57, %v4293_v53  ;;  %v9285_v23 = vcombine.low %v4290_v26, %v4294_v27  ;;  %v9294_v40 = vcombine.high %v4298_v34, %v4302_v35  ;;  %v4325_v53 = vld [vmem:[#allocation6 + $0xca0] sm:$0xff]  ;;  %v4322_v26 = vld [vmem:[#allocation6 + $0xc88] sm:$0xff] }
 0x310   :  { %7297 = vmatprep.subr.bf16.mxu1 %v9238_v38  ;;  %v9292_v38 = vcombine.high %v4297_v31, %v4301_v33  ;;  %v9310_v57 = vcombine.high %v4314_v10, %v4318_v14  ;;  %v4326_v27 = vld [vmem:[#allocation6 + $0xca8] sm:$0xff] }
 0x312   :  { %7134 = vmatpush1.bf16.msra.mxu0 %v9235_v43  ;;  %v4310_v43 = vld [vmem:[#allocation6 + $0xc28] sm:$0xff] }
 0x313   :  { %7298 = vmatpush1.bf16.msra.mxu1 %v9237_v44  ;;  %7135 = vmatprep.subr.bf16.mxu0 %v9244_v45  ;;  %v9291_v44 = vcombine.low %v4297_v31, %v4301_v33  ;;  %v9293_v45 = vcombine.low %v4298_v34, %v4302_v35  ;;  %v9302_v9 = vcombine.high %v4306_v36, %v4310_v43  ;;  %v4329_v33 = vld [vmem:[#allocation6 + $0xcc0] sm:$0xff]  ;;  %v4330_v35 = vld [vmem:[#allocation6 + $0xcc8] sm:$0xff] }
 0x314   :  { %7299 = vmatprep.subr.bf16.mxu1 %v9246_v46  ;;  %v9300_v46 = vcombine.high %v4305_v41, %v4309_v42  ;;  %v9318_v31 = vcombine.high %v4322_v26, %v4326_v27  ;;  %v4333_v34 = vld [vmem:[#allocation6 + $0xce0] sm:$0xff] }
 0x315   :  { %v4337_v42 = vld [vmem:[#allocation6 + $0xd00] sm:$0xff] }
 0x316   :  { %7136 = vmatpush1.bf16.msra.mxu0 %v9243_v50  ;;  %v10172_v50 = vld [vmem:[#allocation4] sm:$0xff] }
 0x317   :  { %7300 = vmatpush1.bf16.msra.mxu1 %v9245_v24  ;;  %7137 = vmatprep.subr.bf16.mxu0 %v9252_v51  ;;  %v640_v24 = vrot.slane %v10172_v50, %v639_v32  ;;  %v644_v51 = vrot.slane %v10172_v50, %v643_v47 }
 0x318   :  { %7301 = vmatprep.subr.bf16.mxu1 %v9254_v52  ;;  %v652_v52 = vrot.slane %v10172_v50, %v651_v48 }
 0x31a   :  { %7138 = vmatpush1.bf16.msra.mxu0 %v9251_v61 }
 0x31b   :  { %7302 = vmatpush1.bf16.msra.mxu1 %v9253_v62  ;;  %7139 = vmatprep.subr.bf16.mxu0 %v9260_v4 }
 0x31c   :  { %7303 = vmatprep.subr.bf16.mxu1 %v9262_v63 }
 0x31e   :  { %7140 = vmatpush1.bf16.msra.mxu0 %v9259_v3 }
 0x31f   :  { %7304 = vmatpush1.bf16.msra.mxu1 %v9261_v13  ;;  %7141 = vmatprep.subr.bf16.mxu0 %v9268_v6  ;;  %v4313_v13 = vld [vmem:[#allocation6 + $0xc40] sm:$0xff] }
 0x320   :  { %7305 = vmatprep.subr.bf16.mxu1 %v9270_v7  ;;  %v4317_v7 = vld [vmem:[#allocation6 + $0xc60] sm:$0xff] }
 0x322   :  { %7142 = vmatpush1.bf16.msra.mxu0 %v9267_v19  ;;  %v9301_v19 = vcombine.low %v4306_v36, %v4310_v43  ;;  %v4341_v36 = vld [vmem:[#allocation6 + $0xd20] sm:$0xff]  ;;  %v4338_v43 = vld [vmem:[#allocation6 + $0xd08] sm:$0xff] }
 0x323   :  { %7306 = vmatpush1.bf16.msra.mxu1 %v9269_v20  ;;  %7143 = vmatprep.subr.bf16.mxu0 %v9276_v21  ;;  %v4321_v21 = vld [vmem:[#allocation6 + $0xc80] sm:$0xff] }
 0x324   :  { %7307 = vmatprep.subr.bf16.mxu1 %v9278_v22  ;;  %v9308_v22 = vcombine.high %v4313_v13, %v4317_v7 }
 0x326   :  { %7144 = vmatpush1.bf16.msra.mxu0 %v9275_v12 }
 0x327   :  { %7308 = vmatpush1.bf16.msra.mxu1 %v9277_v28  ;;  %7145 = vmatprep.subr.bf16.mxu0 %v9284_v8  ;;  %v9307_v28 = vcombine.low %v4313_v13, %v4317_v7  ;;  %v9309_v8 = vcombine.low %v4314_v10, %v4318_v14  ;;  %v4361_v7 = vld [vmem:[#allocation6 + $0xdc0] sm:$0xff]  ;;  %v4362_v14 = vld [vmem:[#allocation6 + $0xdc8] sm:$0xff] }
 0x328   :  { %7309 = vmatprep.subr.bf16.mxu1 %v9286_v29  ;;  %v9316_v29 = vcombine.high %v4321_v21, %v4325_v53  ;;  %v4365_v10 = vld [vmem:[#allocation6 + $0xde0] sm:$0xff] }
 0x32a   :  { %7146 = vmatpush1.bf16.msra.mxu0 %v9283_v25  ;;  %v4334_v25 = vld [vmem:[#allocation6 + $0xce8] sm:$0xff] }
 0x32b   :  { %7310 = vmatpush1.bf16.msra.mxu1 %v9285_v23  ;;  %7147 = vmatprep.subr.bf16.mxu0 %v9292_v38  ;;  %v9315_v23 = vcombine.low %v4321_v21, %v4325_v53  ;;  %v9317_v38 = vcombine.low %v4322_v26, %v4326_v27  ;;  %v9326_v41 = vcombine.high %v4330_v35, %v4334_v25  ;;  %v4369_v53 = vld [vmem:[#allocation6 + $0xe00] sm:$0xff]  ;;  %v4370_v27 = vld [vmem:[#allocation6 + $0xe08] sm:$0xff] }
 0x32c   :  { %7311 = vmatprep.subr.bf16.mxu1 %v9294_v40  ;;  %v9324_v40 = vcombine.high %v4329_v33, %v4333_v34  ;;  %v4373_v26 = vld [vmem:[#allocation6 + $0xe20] sm:$0xff] }
 0x32e   :  { %7148 = vmatpush1.bf16.msra.mxu0 %v9291_v44  ;;  %v4342_v44 = vld [vmem:[#allocation6 + $0xd28] sm:$0xff] }
 0x32f   :  { %7312 = vmatpush1.bf16.msra.mxu1 %v9293_v45  ;;  %7158 = vmatprep.subr.bf16.mxu0 %v9300_v46  ;;  %v9323_v45 = vcombine.low %v4329_v33, %v4333_v34  ;;  %v9325_v46 = vcombine.low %v4330_v35, %v4334_v25  ;;  %v4377_v34 = vld [vmem:[#allocation6 + $0xe40] sm:$0xff]  ;;  %v4378_v25 = vld [vmem:[#allocation6 + $0xe48] sm:$0xff] }
 0x330   :  { %7322 = vmatprep.subr.bf16.mxu1 %v9302_v9  ;;  %v9332_v9 = vcombine.high %v4337_v42, %v4341_v36  ;;  %v4381_v35 = vld [vmem:[#allocation6 + $0xe60] sm:$0xff] }
 0x344   :  { %v3734_v56 = vpop.f32.mrb[4].mxu0  ;;  %v10183_v59 = vpop.f32.mrb[4].mxu1 }
 0x345   :  { %v9584_v58 = vadd.f32 %v3734_v56, %v640_v24  ;;  %v3736_v60 = vpop.f32.mrb[5].mxu0  ;;  %v3900_v62 = vpop.f32.mrb[5].mxu1  ;;  %v9334_v24 = vcombine.high %v4338_v43, %v4342_v44  ;;  %v4346_v56 = vld [vmem:[#allocation6 + $0xd48] sm:$0xff] }
 0x346   :  { %v9585_v61 = vadd.f32 %v3736_v60, %v644_v51  ;;  %v3738_v4 = vpop.f32.mrb[6].mxu0  ;;  %v9587_v55 = vadd.f32 %v3900_v62, %v652_v52  ;;  %v3902_v0 = vpop.f32.mrb[6].mxu1  ;;  %v4345_v51 = vld [vmem:[#allocation6 + $0xd40] sm:$0xff]  ;;  %v9331_v60 = vcombine.low %v4337_v42, %v4341_v36 }
 0x347   :  { %v3909_v63 = vmax.f32 %v9584_v58, 0.0  ;;  %v3739_v1 = vpop.f32.mrb[7].mxu0  ;;  %v3903_v3 = vpop.f32.mrb[7].mxu1  ;;  %v4349_v52 = vld [vmem:[#allocation6 + $0xd60] sm:$0xff]  ;;  %v4350_v58 = vld [vmem:[#allocation6 + $0xd68] sm:$0xff] }
 0x348   :  { %v3910_v39 = vmax.f32 %v9585_v61, 0.0  ;;  %v3912_v6 = vmax.f32 %v9587_v55, 0.0  ;;  %v9333_v61 = vcombine.low %v4338_v43, %v4342_v44  ;;  %v9340_v62 = vcombine.high %v4345_v51, %v4349_v52  ;;  %v4357_v55 = vld [vmem:[#allocation6 + $0xda0] sm:$0xff]  ;;  %v4354_v0 = vld [vmem:[#allocation6 + $0xd88] sm:$0xff] }
 0x349   :  { %v10187_v20 = vpack.c.bf16 %v3909_v63, %v3909_v63  ;;  %v9342_v4 = vcombine.high %v4346_v56, %v4350_v58  ;;  %v4353_v63 = vld [vmem:[#allocation6 + $0xd80] sm:$0xff]  ;;  %v4358_v1 = vld [vmem:[#allocation6 + $0xda8] sm:$0xff]  ;;  %v9341_v3 = vcombine.low %v4346_v56, %v4350_v58 }
 0x34a   :  { %v10185_v17 = vpack.c.bf16 %v3910_v39, %v3910_v39  ;;  %v10191_v12 = vpack.c.bf16 %v3912_v6, %v3912_v6  ;;  %v9339_v39 = vcombine.low %v4345_v51, %v4349_v52  ;;  %v9348_v13 = vcombine.high %v4353_v63, %v4357_v55  ;;  %v4385_v36 = vld [vmem:[#allocation6 + $0xe80] sm:$0xff]  ;;  %v4386_v44 = vld [vmem:[#allocation6 + $0xe88] sm:$0xff] }
 0x34b   :  { %v9350_v6 = vcombine.high %v4354_v0, %v4358_v1  ;;  %v9349_v21 = vcombine.low %v4354_v0, %v4358_v1  ;;  %v4389_v43 = vld [vmem:[#allocation6 + $0xea0] sm:$0xff]  ;;  %v4394_v58 = vld [vmem:[#allocation6 + $0xec8] sm:$0xff] }
 0x34c   :  { %7149 = vmatprep.mubr.bf16.mxu0 %v10185_v17  ;;  %7313 = vmatprep.mubr.bf16.mxu1 %v10185_v17  ;;  %v4393_v52 = vld [vmem:[#allocation6 + $0xec0] sm:$0xff]  ;;  %v4402_v1 = vld [vmem:[#allocation6 + $0xf08] sm:$0xff] }
 0x34d   :  { %7150 = vmatmul.mubr.bf16.vlgmr.msra.gmra.mrb[8].mxu0 %v10187_v20  ;;  %7314 = vmatmul.mubr.bf16.vlgmr.msra.gmra.mrb[8].mxu1 %v10187_v20  ;;  %v4397_v56 = vld [vmem:[#allocation6 + $0xee0] sm:$0xff] }
 0x34e   :  { %7159 = vmatpush1.bf16.msra.mxu0 %v9299_v18  ;;  %7323 = vmatpush1.bf16.msra.mxu1 %v9301_v19  ;;  %v4366_v18 = vld [vmem:[#allocation6 + $0xde8] sm:$0xff]  ;;  %v9347_v19 = vcombine.low %v4353_v63, %v4357_v55  ;;  %v4401_v55 = vld [vmem:[#allocation6 + $0xf00] sm:$0xff] }
 0x34f   :  { %7190 = vmatprep.mubr.bf16.mxu0 %v10191_v12  ;;  %7354 = vmatprep.mubr.bf16.mxu1 %v10191_v12  ;;  %v4405_v0 = vld [vmem:[#allocation6 + $0xf20] sm:$0xff] }
 0x350   :  { %7160 = vmatprep.subr.bf16.mxu0 %v9308_v22  ;;  %7324 = vmatprep.subr.bf16.mxu1 %v9310_v57  ;;  %v9356_v22 = vcombine.high %v4361_v7, %v4365_v10  ;;  %v9358_v57 = vcombine.high %v4362_v14, %v4366_v18 }
 0x352   :  { %7161 = vmatpush1.bf16.msra.mxu0 %v9307_v28  ;;  %7325 = vmatpush1.bf16.msra.mxu1 %v9309_v8  ;;  %v4374_v28 = vld [vmem:[#allocation6 + $0xe28] sm:$0xff]  ;;  %v9355_v8 = vcombine.low %v4361_v7, %v4365_v10  ;;  %v4409_v10 = vld [vmem:[#allocation6 + $0xf40] sm:$0xff] }
 0x353   :  { %7162 = vmatprep.subr.bf16.mxu0 %v9316_v29  ;;  %7326 = vmatprep.subr.bf16.mxu1 %v9318_v31  ;;  %v9357_v29 = vcombine.low %v4362_v14, %v4366_v18  ;;  %v9364_v31 = vcombine.high %v4369_v53, %v4373_v26  ;;  %v9366_v33 = vcombine.high %v4370_v27, %v4374_v28  ;;  %v4413_v14 = vld [vmem:[#allocation6 + $0xf60] sm:$0xff]  ;;  %v4410_v18 = vld [vmem:[#allocation6 + $0xf48] sm:$0xff] }
 0x356   :  { %7163 = vmatpush1.bf16.msra.mxu0 %v9315_v23  ;;  %7327 = vmatpush1.bf16.msra.mxu1 %v9317_v38  ;;  %v4382_v23 = vld [vmem:[#allocation6 + $0xe68] sm:$0xff]  ;;  %v9363_v38 = vcombine.low %v4369_v53, %v4373_v26  ;;  %v9404_v53 = vcombine.high %v4409_v10, %v4413_v14 }
 0x357   :  { %7164 = vmatprep.subr.bf16.mxu0 %v9324_v40  ;;  %7328 = vmatprep.subr.bf16.mxu1 %v9326_v41  ;;  %v9365_v40 = vcombine.low %v4370_v27, %v4374_v28  ;;  %v9372_v41 = vcombine.high %v4377_v34, %v4381_v35  ;;  %v9374_v42 = vcombine.high %v4378_v25, %v4382_v23  ;;  %v4417_v27 = vld [vmem:[#allocation6 + $0xf80] sm:$0xff] }
 0x358   :  { %v4421_v28 = vld [vmem:[#allocation6 + $0xfa0] sm:$0xff] }
 0x35a   :  { %7165 = vmatpush1.bf16.msra.mxu0 %v9323_v45  ;;  %7329 = vmatpush1.bf16.msra.mxu1 %v9325_v46  ;;  %v4390_v45 = vld [vmem:[#allocation6 + $0xea8] sm:$0xff]  ;;  %v9371_v46 = vcombine.low %v4377_v34, %v4381_v35  ;;  %v9412_v35 = vcombine.high %v4417_v27, %v4421_v28 }
 0x35b   :  { %7166 = vmatprep.subr.bf16.mxu0 %v9332_v9  ;;  %7330 = vmatprep.subr.bf16.mxu1 %v9334_v24  ;;  %v9373_v9 = vcombine.low %v4378_v25, %v4382_v23  ;;  %v9380_v24 = vcombine.high %v4385_v36, %v4389_v43  ;;  %v9382_v51 = vcombine.high %v4386_v44, %v4390_v45  ;;  %v4425_v23 = vld [vmem:[#allocation6 + $0xfc0] sm:$0xff] }
 0x35e   :  { %7167 = vmatpush1.bf16.msra.mxu0 %v9331_v60  ;;  %7331 = vmatpush1.bf16.msra.mxu1 %v9333_v61  ;;  %v4398_v60 = vld [vmem:[#allocation6 + $0xee8] sm:$0xff]  ;;  %v9379_v61 = vcombine.low %v4385_v36, %v4389_v43 }
 0x35f   :  { %7168 = vmatprep.subr.bf16.mxu0 %v9340_v62  ;;  %7332 = vmatprep.subr.bf16.mxu1 %v9342_v4  ;;  %v9381_v62 = vcombine.low %v4386_v44, %v4390_v45  ;;  %v9388_v4 = vcombine.high %v4393_v52, %v4397_v56  ;;  %v9390_v63 = vcombine.high %v4394_v58, %v4398_v60 }
 0x362   :  { %7169 = vmatpush1.bf16.msra.mxu0 %v9339_v39  ;;  %7333 = vmatpush1.bf16.msra.mxu1 %v9341_v3  ;;  %v4406_v39 = vld [vmem:[#allocation6 + $0xf28] sm:$0xff]  ;;  %v9387_v3 = vcombine.low %v4393_v52, %v4397_v56 }
 0x363   :  { %7170 = vmatprep.subr.bf16.mxu0 %v9348_v13  ;;  %7334 = vmatprep.subr.bf16.mxu1 %v9350_v6  ;;  %v9389_v13 = vcombine.low %v4394_v58, %v4398_v60  ;;  %v9396_v6 = vcombine.high %v4401_v55, %v4405_v0  ;;  %v9398_v7 = vcombine.high %v4402_v1, %v4406_v39 }
 0x366   :  { %7171 = vmatpush1.bf16.msra.mxu0 %v9347_v19  ;;  %7335 = vmatpush1.bf16.msra.mxu1 %v9349_v21  ;;  %v4414_v19 = vld [vmem:[#allocation6 + $0xf68] sm:$0xff]  ;;  %v9395_v21 = vcombine.low %v4401_v55, %v4405_v0 }
 0x367   :  { %7172 = vmatprep.subr.bf16.mxu0 %v9356_v22  ;;  %7336 = vmatprep.subr.bf16.mxu1 %v9358_v57  ;;  %v9397_v22 = vcombine.low %v4402_v1, %v4406_v39  ;;  %v647_v57 = vsub.s32 6, %v10127_v2  ;;  %v9406_v26 = vcombine.high %v4410_v18, %v4414_v19 }
 0x369   :  { %v648_v34 = vrot.slane %v10172_v50, %v647_v57  ;;  %v3927_v50 = vld [vmem:[#allocation6 + $0x30] sm:$0xff] }
 0x36a   :  { %7173 = vmatpush1.bf16.msra.mxu0 %v9355_v8  ;;  %7337 = vmatpush1.bf16.msra.mxu1 %v9357_v29  ;;  %v4418_v8 = vld [vmem:[#allocation6 + $0xf88] sm:$0xff] }
 0x36b   :  { %7174 = vmatprep.subr.bf16.mxu0 %v9364_v31  ;;  %7338 = vmatprep.subr.bf16.mxu1 %v9366_v33  ;;  %v4422_v29 = vld [vmem:[#allocation6 + $0xfa8] sm:$0xff]  ;;  %v9403_v31 = vcombine.low %v4409_v10, %v4413_v14  ;;  %v9405_v33 = vcombine.low %v4410_v18, %v4414_v19  ;;  %v9586_v43 = vadd.f32 %v10183_v59, %v648_v34  ;;  %v3932_v59 = vld [vmem:[#allocation6 + $0x58] sm:$0xff] }
 0x36c   :  { %v9414_v25 = vcombine.high %v4418_v8, %v4422_v29  ;;  %v9413_v36 = vcombine.low %v4418_v8, %v4422_v29  ;;  %v3960_v34 = vld [vmem:[#allocation6 + $0x138] sm:$0xff] }
 0x36d   :  { %v3911_v56 = vmax.f32 %v9586_v43, 0.0 }
 0x36e   :  { %7175 = vmatpush1.bf16.msra.mxu0 %v9363_v38  ;;  %7339 = vmatpush1.bf16.msra.mxu1 %v9365_v40  ;;  %v4429_v38 = vld [vmem:[#allocation6 + $0xfe0] sm:$0xff]  ;;  %v4426_v40 = vld [vmem:[#allocation6 + $0xfc8] sm:$0xff] }
 0x36f   :  { %7176 = vmatprep.subr.bf16.mxu0 %v9372_v41  ;;  %7340 = vmatprep.subr.bf16.mxu1 %v9374_v42  ;;  %v4430_v41 = vld [vmem:[#allocation6 + $0xfe8] sm:$0xff]  ;;  %v9411_v42 = vcombine.low %v4417_v27, %v4421_v28  ;;  %v9420_v44 = vcombine.high %v4425_v23, %v4429_v38  ;;  %v10202_v55 = vpack.c.bf16 %v3911_v56, %v3911_v56 }
 0x370   :  { %v9422_v45 = vcombine.high %v4426_v40, %v4430_v41  ;;  %v9421_v52 = vcombine.low %v4426_v40, %v4430_v41  ;;  %v3963_v40 = vld [vmem:[#allocation6 + $0x150] sm:$0xff] }
 0x371   :  { %v3967_v41 = vld [vmem:[#allocation6 + $0x170] sm:$0xff] }
 0x372   :  { %7177 = vmatpush1.bf16.msra.mxu0 %v9371_v46  ;;  %7341 = vmatpush1.bf16.msra.mxu1 %v9373_v9  ;;  %v3923_v46 = vld [vmem:[#allocation6 + $0x10] sm:$0xff]  ;;  %v3924_v9 = vld [vmem:[#allocation6 + $0x18] sm:$0xff] }
 0x373   :  { %7178 = vmatprep.subr.bf16.mxu0 %v9380_v24  ;;  %7342 = vmatprep.subr.bf16.mxu1 %v9382_v51  ;;  %v3928_v24 = vld [vmem:[#allocation6 + $0x38] sm:$0xff]  ;;  %v9419_v51 = vcombine.low %v4425_v23, %v4429_v38  ;;  %v8920_v58 = vcombine.high %v3923_v46, %v3927_v50 }
 0x374   :  { %v8922_v60 = vcombine.high %v3924_v9, %v3928_v24  ;;  %v8921_v0 = vcombine.low %v3924_v9, %v3928_v24  ;;  %v3975_v9 = vld [vmem:[#allocation6 + $0x1b0] sm:$0xff]  ;;  %v3972_v24 = vld [vmem:[#allocation6 + $0x198] sm:$0xff] }
 0x376   :  { %7179 = vmatpush1.bf16.msra.mxu0 %v9379_v61  ;;  %7343 = vmatpush1.bf16.msra.mxu1 %v9381_v62  ;;  %v3931_v61 = vld [vmem:[#allocation6 + $0x50] sm:$0xff] }
 0x377   :  { %7180 = vmatprep.subr.bf16.mxu0 %v9388_v4  ;;  %7344 = vmatprep.subr.bf16.mxu1 %v9390_v63  ;;  %v3935_v62 = vld [vmem:[#allocation6 + $0x70] sm:$0xff]  ;;  %v3936_v4 = vld [vmem:[#allocation6 + $0x78] sm:$0xff]  ;;  %v8919_v63 = vcombine.low %v3923_v46, %v3927_v50 }
 0x378   :  { %v8928_v1 = vcombine.high %v3931_v61, %v3935_v62  ;;  %v8930_v39 = vcombine.high %v3932_v59, %v3936_v4  ;;  %v8927_v10 = vcombine.low %v3931_v61, %v3935_v62  ;;  %v8929_v14 = vcombine.low %v3932_v59, %v3936_v4  ;;  %v3971_v50 = vld [vmem:[#allocation6 + $0x190] sm:$0xff]  ;;  %v3980_v59 = vld [vmem:[#allocation6 + $0x1d8] sm:$0xff] }
 0x379   :  { %v3979_v61 = vld [vmem:[#allocation6 + $0x1d0] sm:$0xff]  ;;  %v3984_v4 = vld [vmem:[#allocation6 + $0x1f8] sm:$0xff] }
 0x37a   :  { %7181 = vmatpush1.bf16.msra.mxu0 %v9387_v3  ;;  %7345 = vmatpush1.bf16.msra.mxu1 %v9389_v13  ;;  %v3939_v3 = vld [vmem:[#allocation6 + $0x90] sm:$0xff] }
 0x37b   :  { %7182 = vmatprep.subr.bf16.mxu0 %v9396_v6  ;;  %7346 = vmatprep.subr.bf16.mxu1 %v9398_v7  ;;  %v3943_v13 = vld [vmem:[#allocation6 + $0xb0] sm:$0xff]  ;;  %v3940_v6 = vld [vmem:[#allocation6 + $0x98] sm:$0xff] }
 0x37c   :  { %v3944_v7 = vld [vmem:[#allocation6 + $0xb8] sm:$0xff]  ;;  %v8936_v18 = vcombine.high %v3939_v3, %v3943_v13  ;;  %v8935_v27 = vcombine.low %v3939_v3, %v3943_v13  ;;  %v3983_v62 = vld [vmem:[#allocation6 + $0x1f0] sm:$0xff] }
 0x37d   :  { %v8938_v19 = vcombine.high %v3940_v6, %v3944_v7  ;;  %v8937_v28 = vcombine.low %v3940_v6, %v3944_v7  ;;  %v3987_v3 = vld [vmem:[#allocation6 + $0x210] sm:$0xff]  ;;  %v3988_v6 = vld [vmem:[#allocation6 + $0x218] sm:$0xff] }
 0x37e   :  { %7183 = vmatpush1.bf16.msra.mxu0 %v9395_v21  ;;  %7347 = vmatpush1.bf16.msra.mxu1 %v9397_v22  ;;  %v3947_v21 = vld [vmem:[#allocation6 + $0xd0] sm:$0xff]  ;;  %v3992_v7 = vld [vmem:[#allocation6 + $0x238] sm:$0xff] }
 0x37f   :  { %7184 = vmatprep.subr.bf16.mxu0 %v9404_v53  ;;  %7348 = vmatprep.subr.bf16.mxu1 %v9406_v26  ;;  %v3951_v22 = vld [vmem:[#allocation6 + $0xf0] sm:$0xff]  ;;  %v3948_v53 = vld [vmem:[#allocation6 + $0xd8] sm:$0xff] }
 0x380   :  { %v3952_v26 = vld [vmem:[#allocation6 + $0xf8] sm:$0xff]  ;;  %v8944_v8 = vcombine.high %v3947_v21, %v3951_v22  ;;  %v3991_v13 = vld [vmem:[#allocation6 + $0x230] sm:$0xff] }
 0x381   :  { %v8946_v29 = vcombine.high %v3948_v53, %v3952_v26 }
 0x382   :  { %7185 = vmatpush1.bf16.msra.mxu0 %v9403_v31  ;;  %7349 = vmatpush1.bf16.msra.mxu1 %v9405_v33  ;;  %v3955_v31 = vld [vmem:[#allocation6 + $0x110] sm:$0xff] }
 0x383   :  { %7186 = vmatprep.subr.bf16.mxu0 %v9412_v35  ;;  %7350 = vmatprep.subr.bf16.mxu1 %v9414_v25  ;;  %v3959_v33 = vld [vmem:[#allocation6 + $0x130] sm:$0xff]  ;;  %v8943_v35 = vcombine.low %v3947_v21, %v3951_v22  ;;  %v8945_v25 = vcombine.low %v3948_v53, %v3952_v26  ;;  %v3996_v53 = vld [vmem:[#allocation6 + $0x258] sm:$0xff] }
 0x384   :  { %v8952_v23 = vcombine.high %v3955_v31, %v3959_v33  ;;  %v8951_v43 = vcombine.low %v3955_v31, %v3959_v33  ;;  %v3995_v21 = vld [vmem:[#allocation6 + $0x250] sm:$0xff]  ;;  %v4000_v26 = vld [vmem:[#allocation6 + $0x278] sm:$0xff] }
 0x385   :  { %v3999_v22 = vld [vmem:[#allocation6 + $0x270] sm:$0xff] }
 0x386   :  { %7187 = vmatpush1.bf16.msra.mxu0 %v9411_v42  ;;  %7351 = vmatpush1.bf16.msra.mxu1 %v9413_v36  ;;  %v3964_v42 = vld [vmem:[#allocation6 + $0x158] sm:$0xff]  ;;  %v4003_v31 = vld [vmem:[#allocation6 + $0x290] sm:$0xff] }
 0x387   :  { %7188 = vmatprep.subr.bf16.mxu0 %v9420_v44  ;;  %7352 = vmatprep.subr.bf16.mxu1 %v9422_v45  ;;  %v3968_v36 = vld [vmem:[#allocation6 + $0x178] sm:$0xff]  ;;  %v8960_v45 = vcombine.high %v3963_v40, %v3967_v41  ;;  %v4007_v33 = vld [vmem:[#allocation6 + $0x2b0] sm:$0xff] }
 0x388   :  { %v8962_v46 = vcombine.high %v3964_v42, %v3968_v36  ;;  %v8961_v56 = vcombine.low %v3964_v42, %v3968_v36  ;;  %v4012_v42 = vld [vmem:[#allocation6 + $0x2d8] sm:$0xff] }
 0x389   :  { %v4016_v36 = vld [vmem:[#allocation6 + $0x2f8] sm:$0xff] }
 0x38a   :  { %7189 = vmatpush1.bf16.msra.mxu0 %v9419_v51  ;;  %7353 = vmatpush1.bf16.msra.mxu1 %v9421_v52  ;;  %v3976_v51 = vld [vmem:[#allocation6 + $0x1b8] sm:$0xff]  ;;  %v8959_v52 = vcombine.low %v3963_v40, %v3967_v41  ;;  %v4011_v40 = vld [vmem:[#allocation6 + $0x2d0] sm:$0xff] }
 0x38b   :  { %7363 = vmatprep.subr.bf16.mxu0 %v8920_v58  ;;  %7527 = vmatprep.subr.bf16.mxu1 %v8922_v60  ;;  %v8968_v58 = vcombine.high %v3971_v50, %v3975_v9  ;;  %v8970_v60 = vcombine.high %v3972_v24, %v3976_v51  ;;  %v4015_v41 = vld [vmem:[#allocation6 + $0x2f0] sm:$0xff] }
 0x38d   :  { %7191 = vmatmul.mubr.bf16.vlgmr.msra.gmra.mrb[8].mxu0 %v10202_v55  ;;  %7355 = vmatmul.mubr.bf16.vlgmr.msra.gmra.mrb[8].mxu1 %v10202_v55 }
 0x38e   :  { %7364 = vmatpush1.bf16.msra.mxu0 %v8919_v63  ;;  %7395 = vmatprep.mubr.bf16.mxu0 %v10136_v49  ;;  %v8967_v63 = vcombine.low %v3971_v50, %v3975_v9  ;;  %v4019_v50 = vld [vmem:[#allocation6 + $0x310] sm:$0xff] }
 0x38f   :  { %7528 = vmatpush1.bf16.msra.mxu1 %v8921_v0  ;;  %7559 = vmatprep.mubr.bf16.mxu1 %v10136_v49  ;;  %v3956_v49 = vld [vmem:[#allocation6 + $0x118] sm:$0xff]  ;;  %v8969_v0 = vcombine.low %v3972_v24, %v3976_v51  ;;  %v4023_v9 = vld [vmem:[#allocation6 + $0x330] sm:$0xff] }
 0x390   :  { %7365 = vmatprep.subr.bf16.mxu0 %v8928_v1  ;;  %7529 = vmatprep.subr.bf16.mxu1 %v8930_v39  ;;  %v8954_v38 = vcombine.high %v3956_v49, %v3960_v34  ;;  %v8953_v44 = vcombine.low %v3956_v49, %v3960_v34  ;;  %v8976_v1 = vcombine.high %v3979_v61, %v3983_v62  ;;  %v4004_v49 = vld [vmem:[#allocation6 + $0x298] sm:$0xff] }
 0x391   :  { %v8978_v39 = vcombine.high %v3980_v59, %v3984_v4  ;;  %v4008_v34 = vld [vmem:[#allocation6 + $0x2b8] sm:$0xff] }
 0x392   :  { %7366 = vmatpush1.bf16.msra.mxu0 %v8927_v10  ;;  %v8975_v10 = vcombine.low %v3979_v61, %v3983_v62  ;;  %v4020_v24 = vld [vmem:[#allocation6 + $0x318] sm:$0xff]  ;;  %v4027_v61 = vld [vmem:[#allocation6 + $0x350] sm:$0xff] }
 0x393   :  { %7530 = vmatpush1.bf16.msra.mxu1 %v8929_v14  ;;  %7367 = vmatprep.subr.bf16.mxu0 %v8936_v18  ;;  %v8977_v14 = vcombine.low %v3980_v59, %v3984_v4  ;;  %v8984_v18 = vcombine.high %v3987_v3, %v3991_v13  ;;  %v4024_v51 = vld [vmem:[#allocation6 + $0x338] sm:$0xff]  ;;  %v4031_v62 = vld [vmem:[#allocation6 + $0x370] sm:$0xff] }
 0x394   :  { %7531 = vmatprep.subr.bf16.mxu1 %v8938_v19  ;;  %v8986_v19 = vcombine.high %v3988_v6, %v3992_v7  ;;  %v4028_v59 = vld [vmem:[#allocation6 + $0x358] sm:$0xff] }
 0x395   :  { %v4032_v4 = vld [vmem:[#allocation6 + $0x378] sm:$0xff] }
 0x396   :  { %7368 = vmatpush1.bf16.msra.mxu0 %v8935_v27  ;;  %v8983_v27 = vcombine.low %v3987_v3, %v3991_v13  ;;  %v4035_v3 = vld [vmem:[#allocation6 + $0x390] sm:$0xff] }
 0x397   :  { %7532 = vmatpush1.bf16.msra.mxu1 %v8937_v28  ;;  %7369 = vmatprep.subr.bf16.mxu0 %v8944_v8  ;;  %v8985_v28 = vcombine.low %v3988_v6, %v3992_v7  ;;  %v8992_v8 = vcombine.high %v3995_v21, %v3999_v22  ;;  %v4039_v13 = vld [vmem:[#allocation6 + $0x3b0] sm:$0xff]  ;;  %v4036_v6 = vld [vmem:[#allocation6 + $0x398] sm:$0xff] }
 0x398   :  { %7533 = vmatprep.subr.bf16.mxu1 %v8946_v29  ;;  %v8994_v29 = vcombine.high %v3996_v53, %v4000_v26  ;;  %v4040_v7 = vld [vmem:[#allocation6 + $0x3b8] sm:$0xff] }
 0x39a   :  { %7370 = vmatpush1.bf16.msra.mxu0 %v8943_v35  ;;  %v8991_v35 = vcombine.low %v3995_v21, %v3999_v22  ;;  %v4043_v21 = vld [vmem:[#allocation6 + $0x3d0] sm:$0xff] }
 0x39b   :  { %7534 = vmatpush1.bf16.msra.mxu1 %v8945_v25  ;;  %7371 = vmatprep.subr.bf16.mxu0 %v8952_v23  ;;  %v8993_v25 = vcombine.low %v3996_v53, %v4000_v26  ;;  %v9000_v23 = vcombine.high %v4003_v31, %v4007_v33  ;;  %v4047_v22 = vld [vmem:[#allocation6 + $0x3f0] sm:$0xff]  ;;  %v4044_v53 = vld [vmem:[#allocation6 + $0x3d8] sm:$0xff] }
 0x39c   :  { %7535 = vmatprep.subr.bf16.mxu1 %v8954_v38  ;;  %v9002_v38 = vcombine.high %v4004_v49, %v4008_v34  ;;  %v4048_v26 = vld [vmem:[#allocation6 + $0x3f8] sm:$0xff] }
 0x39e   :  { %7372 = vmatpush1.bf16.msra.mxu0 %v8951_v43  ;;  %v8999_v43 = vcombine.low %v4003_v31, %v4007_v33  ;;  %v4051_v31 = vld [vmem:[#allocation6 + $0x410] sm:$0xff] }
 0x39f   :  { %7536 = vmatpush1.bf16.msra.mxu1 %v8953_v44  ;;  %7373 = vmatprep.subr.bf16.mxu0 %v8960_v45  ;;  %v9001_v44 = vcombine.low %v4004_v49, %v4008_v34  ;;  %v9008_v45 = vcombine.high %v4011_v40, %v4015_v41  ;;  %v4055_v33 = vld [vmem:[#allocation6 + $0x430] sm:$0xff]  ;;  %v4052_v49 = vld [vmem:[#allocation6 + $0x418] sm:$0xff] }
 0x3a0   :  { %7537 = vmatprep.subr.bf16.mxu1 %v8962_v46  ;;  %v9010_v46 = vcombine.high %v4012_v42, %v4016_v36  ;;  %v4056_v34 = vld [vmem:[#allocation6 + $0x438] sm:$0xff] }
 0x3a2   :  { %7374 = vmatpush1.bf16.msra.mxu0 %v8959_v52  ;;  %v9007_v52 = vcombine.low %v4011_v40, %v4015_v41  ;;  %v4059_v40 = vld [vmem:[#allocation6 + $0x450] sm:$0xff] }
 0x3a3   :  { %7538 = vmatpush1.bf16.msra.mxu1 %v8961_v56  ;;  %7375 = vmatprep.subr.bf16.mxu0 %v8968_v58  ;;  %v9009_v56 = vcombine.low %v4012_v42, %v4016_v36  ;;  %v9016_v58 = vcombine.high %v4019_v50, %v4023_v9  ;;  %v4063_v41 = vld [vmem:[#allocation6 + $0x470] sm:$0xff]  ;;  %v9047_v42 = vcombine.low %v4051_v31, %v4055_v33  ;;  %v4060_v36 = vld [vmem:[#allocation6 + $0x458] sm:$0xff] }
 0x3a4   :  { %7539 = vmatprep.subr.bf16.mxu1 %v8970_v60  ;;  %v9018_v60 = vcombine.high %v4020_v24, %v4024_v51 }
 0x3a6   :  { %7376 = vmatpush1.bf16.msra.mxu0 %v8967_v63  ;;  %v9015_v63 = vcombine.low %v4019_v50, %v4023_v9  ;;  %v4071_v50 = vld [vmem:[#allocation6 + $0x4b0] sm:$0xff] }
 0x3a7   :  { %7540 = vmatpush1.bf16.msra.mxu1 %v8969_v0  ;;  %7377 = vmatprep.subr.bf16.mxu0 %v8976_v1  ;;  %v9017_v0 = vcombine.low %v4020_v24, %v4024_v51  ;;  %v9024_v1 = vcombine.high %v4027_v61, %v4031_v62  ;;  %v4068_v24 = vld [vmem:[#allocation6 + $0x498] sm:$0xff] }
 0x3a8   :  { %7541 = vmatprep.subr.bf16.mxu1 %v8978_v39  ;;  %v9026_v39 = vcombine.high %v4028_v59, %v4032_v4  ;;  %v4072_v51 = vld [vmem:[#allocation6 + $0x4b8] sm:$0xff] }
 0x3aa   :  { %7378 = vmatpush1.bf16.msra.mxu0 %v8975_v10  ;;  %v9023_v10 = vcombine.low %v4027_v61, %v4031_v62  ;;  %v4075_v61 = vld [vmem:[#allocation6 + $0x4d0] sm:$0xff] }
 0x3ab   :  { %7542 = vmatpush1.bf16.msra.mxu1 %v8977_v14  ;;  %7379 = vmatprep.subr.bf16.mxu0 %v8984_v18  ;;  %v9025_v14 = vcombine.low %v4028_v59, %v4032_v4  ;;  %v9032_v18 = vcombine.high %v4035_v3, %v4039_v13  ;;  %v4079_v62 = vld [vmem:[#allocation6 + $0x4f0] sm:$0xff]  ;;  %v4076_v59 = vld [vmem:[#allocation6 + $0x4d8] sm:$0xff] }
 0x3ac   :  { %7543 = vmatprep.subr.bf16.mxu1 %v8986_v19  ;;  %v9034_v19 = vcombine.high %v4036_v6, %v4040_v7  ;;  %v4080_v4 = vld [vmem:[#allocation6 + $0x4f8] sm:$0xff] }
 0x3ae   :  { %7380 = vmatpush1.bf16.msra.mxu0 %v8983_v27  ;;  %v9031_v27 = vcombine.low %v4035_v3, %v4039_v13  ;;  %v4087_v3 = vld [vmem:[#allocation6 + $0x530] sm:$0xff]  ;;  %v4084_v13 = vld [vmem:[#allocation6 + $0x518] sm:$0xff] }
 0x3af   :  { %7544 = vmatpush1.bf16.msra.mxu1 %v8985_v28  ;;  %7381 = vmatprep.subr.bf16.mxu0 %v8992_v8  ;;  %v9033_v28 = vcombine.low %v4036_v6, %v4040_v7  ;;  %v9040_v8 = vcombine.high %v4043_v21, %v4047_v22  ;;  %v4088_v6 = vld [vmem:[#allocation6 + $0x538] sm:$0xff]  ;;  %v9073_v7 = vcombine.low %v4076_v59, %v4080_v4 }
 0x3b0   :  { %7545 = vmatprep.subr.bf16.mxu1 %v8994_v29  ;;  %v9042_v29 = vcombine.high %v4044_v53, %v4048_v26 }
 0x3b2   :  { %7382 = vmatpush1.bf16.msra.mxu0 %v8991_v35  ;;  %v9039_v35 = vcombine.low %v4043_v21, %v4047_v22  ;;  %v4092_v21 = vld [vmem:[#allocation6 + $0x558] sm:$0xff] }
 0x3b3   :  { %7546 = vmatpush1.bf16.msra.mxu1 %v8993_v25  ;;  %7383 = vmatprep.subr.bf16.mxu0 %v9000_v23  ;;  %v9041_v25 = vcombine.low %v4044_v53, %v4048_v26  ;;  %v9048_v23 = vcombine.high %v4051_v31, %v4055_v33  ;;  %v4096_v22 = vld [vmem:[#allocation6 + $0x578] sm:$0xff]  ;;  %v9081_v26 = vcombine.low %v4084_v13, %v4088_v6 }
 0x3b4   :  { %7547 = vmatprep.subr.bf16.mxu1 %v9002_v38  ;;  %v9050_v38 = vcombine.high %v4052_v49, %v4056_v34  ;;  %v4100_v31 = vld [vmem:[#allocation6 + $0x598] sm:$0xff] }
 0x3b5   :  { %v4104_v33 = vld [vmem:[#allocation6 + $0x5b8] sm:$0xff] }
 0x3b6   :  { %7384 = vmatpush1.bf16.msra.mxu0 %v8999_v43  ;;  %v4064_v43 = vld [vmem:[#allocation6 + $0x478] sm:$0xff] }
 0x3b7   :  { %7548 = vmatpush1.bf16.msra.mxu1 %v9001_v44  ;;  %7385 = vmatprep.subr.bf16.mxu0 %v9008_v45  ;;  %v9049_v44 = vcombine.low %v4052_v49, %v4056_v34  ;;  %v9056_v45 = vcombine.high %v4059_v40, %v4063_v41  ;;  %v9058_v9 = vcombine.high %v4060_v36, %v4064_v43 }
 0x3b8   :  { %7549 = vmatprep.subr.bf16.mxu1 %v9010_v46  ;;  %v4067_v46 = vld [vmem:[#allocation6 + $0x490] sm:$0xff]  ;;  %v9089_v34 = vcombine.low %v4092_v21, %v4096_v22 }
 0x3ba   :  { %7386 = vmatpush1.bf16.msra.mxu0 %v9007_v52  ;;  %v9055_v52 = vcombine.low %v4059_v40, %v4063_v41  ;;  %v4108_v40 = vld [vmem:[#allocation6 + $0x5d8] sm:$0xff] }
 0x3bb   :  { %7550 = vmatpush1.bf16.msra.mxu1 %v9009_v56  ;;  %7387 = vmatprep.subr.bf16.mxu0 %v9016_v58  ;;  %v9057_v56 = vcombine.low %v4060_v36, %v4064_v43  ;;  %v9064_v58 = vcombine.high %v4067_v46, %v4071_v50  ;;  %v4112_v41 = vld [vmem:[#allocation6 + $0x5f8] sm:$0xff]  ;;  %v9097_v36 = vcombine.low %v4100_v31, %v4104_v33 }
 0x3bc   :  { %7551 = vmatprep.subr.bf16.mxu1 %v9018_v60  ;;  %v9066_v60 = vcombine.high %v4068_v24, %v4072_v51 }
 0x3be   :  { %7388 = vmatpush1.bf16.msra.mxu0 %v9015_v63  ;;  %v9063_v63 = vcombine.low %v4067_v46, %v4071_v50  ;;  %v4119_v46 = vld [vmem:[#allocation6 + $0x630] sm:$0xff]  ;;  %v4116_v50 = vld [vmem:[#allocation6 + $0x618] sm:$0xff] }
 0x3bf   :  { %7552 = vmatpush1.bf16.msra.mxu1 %v9017_v0  ;;  %7389 = vmatprep.subr.bf16.mxu0 %v9024_v1  ;;  %v9072_v0 = vcombine.high %v4075_v61, %v4079_v62  ;;  %v9074_v1 = vcombine.high %v4076_v59, %v4080_v4 }
 0x3c0   :  { %7553 = vmatprep.subr.bf16.mxu1 %v9026_v39  ;;  %v4083_v39 = vld [vmem:[#allocation6 + $0x510] sm:$0xff] }
 0x3c1   :  { %v9079_v53 = vcombine.low %v4083_v39, %v4087_v3 }
 0x3c2   :  { %7390 = vmatpush1.bf16.msra.mxu0 %v9023_v10  ;;  %v9080_v10 = vcombine.high %v4083_v39, %v4087_v3  ;;  %v4132_v39 = vld [vmem:[#allocation6 + $0x698] sm:$0xff] }
 0x3c3   :  { %7554 = vmatpush1.bf16.msra.mxu1 %v9025_v14  ;;  %7391 = vmatprep.subr.bf16.mxu0 %v9032_v18  ;;  %v9082_v14 = vcombine.high %v4084_v13, %v4088_v6  ;;  %v4091_v18 = vld [vmem:[#allocation6 + $0x550] sm:$0xff]  ;;  %v4136_v3 = vld [vmem:[#allocation6 + $0x6b8] sm:$0xff] }
 0x3c4   :  { %7555 = vmatprep.subr.bf16.mxu1 %v9034_v19  ;;  %v4095_v19 = vld [vmem:[#allocation6 + $0x570] sm:$0xff] }
 0x3c5   :  { %v9087_v49 = vcombine.low %v4091_v18, %v4095_v19 }
 0x3c6   :  { %7392 = vmatpush1.bf16.msra.mxu0 %v9031_v27  ;;  %v9088_v27 = vcombine.high %v4091_v18, %v4095_v19  ;;  %v4140_v18 = vld [vmem:[#allocation6 + $0x6d8] sm:$0xff] }
 0x3c7   :  { %7556 = vmatpush1.bf16.msra.mxu1 %v9033_v28  ;;  %7393 = vmatprep.subr.bf16.mxu0 %v9040_v8  ;;  %v9090_v28 = vcombine.high %v4092_v21, %v4096_v22  ;;  %v4099_v8 = vld [vmem:[#allocation6 + $0x590] sm:$0xff]  ;;  %v4144_v19 = vld [vmem:[#allocation6 + $0x6f8] sm:$0xff]  ;;  %v9129_v22 = vcombine.low %v4132_v39, %v4136_v3 }
 0x3c8   :  { %7557 = vmatprep.subr.bf16.mxu1 %v9042_v29  ;;  %v4103_v29 = vld [vmem:[#allocation6 + $0x5b0] sm:$0xff] }
 0x3ca   :  { %7394 = vmatpush1.bf16.msra.mxu0 %v9039_v35  ;;  %v9096_v35 = vcombine.high %v4099_v8, %v4103_v29 }
 0x3cb   :  { %7558 = vmatpush1.bf16.msra.mxu1 %v9041_v25  ;;  %7404 = vmatprep.subr.bf16.mxu0 %v9048_v23  ;;  %v9098_v25 = vcombine.high %v4100_v31, %v4104_v33  ;;  %v4107_v23 = vld [vmem:[#allocation6 + $0x5d0] sm:$0xff]  ;;  %v9137_v33 = vcombine.low %v4140_v18, %v4144_v19 }
 0x3cc   :  { %7568 = vmatprep.subr.bf16.mxu1 %v9050_v38  ;;  %v4111_v38 = vld [vmem:[#allocation6 + $0x5f0] sm:$0xff] }
 0x3cd   :  { %7396 = vmatmul.mubr.bf16.vlgmr.msra.gmra.mrb[12].mxu0 %v10152_v5  ;;  %v9104_v43 = vcombine.high %v4107_v23, %v4111_v38 }
 0x3ce   :  { %7560 = vmatmul.mubr.bf16.vlgmr.msra.gmra.mrb[12].mxu1 %v10152_v5  ;;  %7405 = vmatpush1.bf16.msra.mxu0 %v9047_v42  ;;  %v9065_v5 = vcombine.low %v4068_v24, %v4072_v51  ;;  %v9095_v42 = vcombine.low %v4099_v8, %v4103_v29  ;;  %v9103_v24 = vcombine.low %v4107_v23, %v4111_v38  ;;  %v4148_v8 = vld [vmem:[#allocation6 + $0x718] sm:$0xff] }
 0x3cf   :  { %7436 = vmatprep.mubr.bf16.mxu0 %v10154_v11  ;;  %7569 = vmatpush1.bf16.msra.mxu1 %v9049_v44  ;;  %v9106_v44 = vcombine.high %v4108_v40, %v4112_v41  ;;  %v9105_v51 = vcombine.low %v4108_v40, %v4112_v41  ;;  %v4152_v29 = vld [vmem:[#allocation6 + $0x738] sm:$0xff] }
 0x3d0   :  { %7600 = vmatprep.mubr.bf16.mxu1 %v10154_v11  ;;  %7406 = vmatprep.subr.bf16.mxu0 %v9056_v45  ;;  %v9071_v11 = vcombine.low %v4075_v61, %v4079_v62  ;;  %v4115_v45 = vld [vmem:[#allocation6 + $0x610] sm:$0xff]  ;;  %v4124_v61 = vld [vmem:[#allocation6 + $0x658] sm:$0xff]  ;;  %v9145_v41 = vcombine.low %v4148_v8, %v4152_v29 }
 0x3d1   :  { %7570 = vmatprep.subr.bf16.mxu1 %v9058_v9  ;;  %v4120_v9 = vld [vmem:[#allocation6 + $0x638] sm:$0xff]  ;;  %v9111_v59 = vcombine.low %v4115_v45, %v4119_v46 }
 0x3d2   :  { %7407 = vmatpush1.bf16.msra.mxu0 %v9055_v52  ;;  %v9112_v52 = vcombine.high %v4115_v45, %v4119_v46  ;;  %v4128_v62 = vld [vmem:[#allocation6 + $0x678] sm:$0xff]  ;;  %v9113_v4 = vcombine.low %v4116_v50, %v4120_v9 }
 0x3d3   :  { %7571 = vmatpush1.bf16.msra.mxu1 %v9057_v56  ;;  %7408 = vmatprep.subr.bf16.mxu0 %v9064_v58  ;;  %v9114_v56 = vcombine.high %v4116_v50, %v4120_v9  ;;  %v4123_v58 = vld [vmem:[#allocation6 + $0x650] sm:$0xff]  ;;  %v9121_v6 = vcombine.low %v4124_v61, %v4128_v62  ;;  %v4156_v23 = vld [vmem:[#allocation6 + $0x758] sm:$0xff] }
 0x3d4   :  { %7572 = vmatprep.subr.bf16.mxu1 %v9066_v60  ;;  %v4127_v60 = vld [vmem:[#allocation6 + $0x670] sm:$0xff]  ;;  %v4160_v38 = vld [vmem:[#allocation6 + $0x778] sm:$0xff] }
 0x3d5   :  { %v9119_v13 = vcombine.low %v4123_v58, %v4127_v60  ;;  %v4164_v45 = vld [vmem:[#allocation6 + $0x798] sm:$0xff]  ;;  %v9153_v9 = vcombine.low %v4156_v23, %v4160_v38 }
 0x3d6   :  { %7409 = vmatpush1.bf16.msra.mxu0 %v9063_v63  ;;  %v9120_v63 = vcombine.high %v4123_v58, %v4127_v60  ;;  %v4168_v46 = vld [vmem:[#allocation6 + $0x7b8] sm:$0xff] }
 0x3d7   :  { %7573 = vmatpush1.bf16.msra.mxu1 %v9065_v5  ;;  %7410 = vmatprep.subr.bf16.mxu0 %v9072_v0  ;;  %v9122_v5 = vcombine.high %v4124_v61, %v4128_v62  ;;  %v4131_v0 = vld [vmem:[#allocation6 + $0x690] sm:$0xff]  ;;  %v4172_v58 = vld [vmem:[#allocation6 + $0x7d8] sm:$0xff]  ;;  %v9161_v62 = vcombine.low %v4164_v45, %v4168_v46 }
 0x3d8   :  { %7574 = vmatprep.subr.bf16.mxu1 %v9074_v1  ;;  %v4135_v1 = vld [vmem:[#allocation6 + $0x6b0] sm:$0xff]  ;;  %v4176_v60 = vld [vmem:[#allocation6 + $0x7f8] sm:$0xff] }
 0x3d9   :  { %v9127_v21 = vcombine.low %v4131_v0, %v4135_v1 }
 0x3da   :  { %7411 = vmatpush1.bf16.msra.mxu0 %v9071_v11  ;;  %v9128_v11 = vcombine.high %v4131_v0, %v4135_v1  ;;  %v4180_v0 = vld [vmem:[#allocation6 + $0x818] sm:$0xff] }
 0x3db   :  { %7575 = vmatpush1.bf16.msra.mxu1 %v9073_v7  ;;  %7412 = vmatprep.subr.bf16.mxu0 %v9080_v10  ;;  %v9130_v7 = vcombine.high %v4132_v39, %v4136_v3  ;;  %v4139_v10 = vld [vmem:[#allocation6 + $0x6d0] sm:$0xff]  ;;  %v4184_v1 = vld [vmem:[#allocation6 + $0x838] sm:$0xff]  ;;  %v9169_v3 = vcombine.low %v4172_v58, %v4176_v60 }
 0x3dc   :  { %7576 = vmatprep.subr.bf16.mxu1 %v9082_v14  ;;  %v4143_v14 = vld [vmem:[#allocation6 + $0x6f0] sm:$0xff] }
 0x3dd   :  { %v9135_v31 = vcombine.low %v4139_v10, %v4143_v14 }
 0x3de   :  { %7413 = vmatpush1.bf16.msra.mxu0 %v9079_v53  ;;  %v9136_v53 = vcombine.high %v4139_v10, %v4143_v14  ;;  %v4188_v14 = vld [vmem:[#allocation6 + $0x858] sm:$0xff] }
 0x3df   :  { %7577 = vmatpush1.bf16.msra.mxu1 %v9081_v26  ;;  %7414 = vmatprep.subr.bf16.mxu0 %v9088_v27  ;;  %v9138_v26 = vcombine.high %v4140_v18, %v4144_v19  ;;  %v4147_v27 = vld [vmem:[#allocation6 + $0x710] sm:$0xff]  ;;  %v4192_v18 = vld [vmem:[#allocation6 + $0x878] sm:$0xff]  ;;  %v9177_v19 = vcombine.low %v4180_v0, %v4184_v1 }
 0x3e0   :  { %7578 = vmatprep.subr.bf16.mxu1 %v9090_v28  ;;  %v4151_v28 = vld [vmem:[#allocation6 + $0x730] sm:$0xff] }
 0x3e1   :  { %v9143_v40 = vcombine.low %v4147_v27, %v4151_v28 }
 0x3e2   :  { %7415 = vmatpush1.bf16.msra.mxu0 %v9087_v49  ;;  %v9144_v49 = vcombine.high %v4147_v27, %v4151_v28  ;;  %v4196_v27 = vld [vmem:[#allocation6 + $0x898] sm:$0xff] }
 0x3e3   :  { %7579 = vmatpush1.bf16.msra.mxu1 %v9089_v34  ;;  %7416 = vmatprep.subr.bf16.mxu0 %v9096_v35  ;;  %v9146_v34 = vcombine.high %v4148_v8, %v4152_v29  ;;  %v4155_v35 = vld [vmem:[#allocation6 + $0x750] sm:$0xff]  ;;  %v4200_v28 = vld [vmem:[#allocation6 + $0x8b8] sm:$0xff]  ;;  %v9185_v29 = vcombine.low %v4188_v14, %v4192_v18 }
 0x3e4   :  { %7580 = vmatprep.subr.bf16.mxu1 %v9098_v25  ;;  %v4159_v25 = vld [vmem:[#allocation6 + $0x770] sm:$0xff] }
 0x3e5   :  { %v9151_v50 = vcombine.low %v4155_v35, %v4159_v25 }
 0x3e6   :  { %7417 = vmatpush1.bf16.msra.mxu0 %v9095_v42  ;;  %v9152_v42 = vcombine.high %v4155_v35, %v4159_v25  ;;  %v4204_v35 = vld [vmem:[#allocation6 + $0x8d8] sm:$0xff] }
 0x3e7   :  { %7581 = vmatpush1.bf16.msra.mxu1 %v9097_v36  ;;  %7418 = vmatprep.subr.bf16.mxu0 %v9104_v43  ;;  %v9154_v36 = vcombine.high %v4156_v23, %v4160_v38  ;;  %v4163_v43 = vld [vmem:[#allocation6 + $0x790] sm:$0xff]  ;;  %v4208_v25 = vld [vmem:[#allocation6 + $0x8f8] sm:$0xff] }
 0x3e8   :  { %7582 = vmatprep.subr.bf16.mxu1 %v9106_v44  ;;  %v4167_v44 = vld [vmem:[#allocation6 + $0x7b0] sm:$0xff] }
 0x3e9   :  { %v9159_v61 = vcombine.low %v4163_v43, %v4167_v44 }
 0x3ea   :  { %7419 = vmatpush1.bf16.msra.mxu0 %v9103_v24  ;;  %v9160_v24 = vcombine.high %v4163_v43, %v4167_v44  ;;  %v4216_v43 = vld [vmem:[#allocation6 + $0x938] sm:$0xff]  ;;  %v9201_v44 = vcombine.low %v4204_v35, %v4208_v25 }
 0x3eb   :  { %7583 = vmatpush1.bf16.msra.mxu1 %v9105_v51  ;;  %7420 = vmatprep.subr.bf16.mxu0 %v9112_v52  ;;  %v9162_v51 = vcombine.high %v4164_v45, %v4168_v46  ;;  %v4171_v52 = vld [vmem:[#allocation6 + $0x7d0] sm:$0xff] }
 0x3ec   :  { %7584 = vmatprep.subr.bf16.mxu1 %v9114_v56  ;;  %v4175_v56 = vld [vmem:[#allocation6 + $0x7f0] sm:$0xff] }
 0x3ed   :  { %v9167_v39 = vcombine.low %v4171_v52, %v4175_v56 }
 0x3ee   :  { %7421 = vmatpush1.bf16.msra.mxu0 %v9111_v59  ;;  %v9168_v59 = vcombine.high %v4171_v52, %v4175_v56 }
 0x3ef   :  { %7585 = vmatpush1.bf16.msra.mxu1 %v9113_v4  ;;  %7422 = vmatprep.subr.bf16.mxu0 %v9120_v63  ;;  %v9170_v4 = vcombine.high %v4172_v58, %v4176_v60  ;;  %v4179_v63 = vld [vmem:[#allocation6 + $0x810] sm:$0xff] }
 0x3f0   :  { %7586 = vmatprep.subr.bf16.mxu1 %v9122_v5  ;;  %v4183_v5 = vld [vmem:[#allocation6 + $0x830] sm:$0xff] }
 0x3f1   :  { %v9175_v10 = vcombine.low %v4179_v63, %v4183_v5 }
 0x3f2   :  { %7423 = vmatpush1.bf16.msra.mxu0 %v9119_v13  ;;  %v9176_v13 = vcombine.high %v4179_v63, %v4183_v5 }
 0x3f3   :  { %7587 = vmatpush1.bf16.msra.mxu1 %v9121_v6  ;;  %7424 = vmatprep.subr.bf16.mxu0 %v9128_v11  ;;  %v9178_v6 = vcombine.high %v4180_v0, %v4184_v1  ;;  %v4187_v11 = vld [vmem:[#allocation6 + $0x850] sm:$0xff] }
 0x3f4   :  { %7588 = vmatprep.subr.bf16.mxu1 %v9130_v7  ;;  %v4191_v7 = vld [vmem:[#allocation6 + $0x870] sm:$0xff] }
 0x3f5   :  { %v9183_v8 = vcombine.low %v4187_v11, %v4191_v7 }
 0x3f6   :  { %7425 = vmatpush1.bf16.msra.mxu0 %v9127_v21  ;;  %v9184_v21 = vcombine.high %v4187_v11, %v4191_v7 }
 0x3f7   :  { %7589 = vmatpush1.bf16.msra.mxu1 %v9129_v22  ;;  %7426 = vmatprep.subr.bf16.mxu0 %v9136_v53  ;;  %v4195_v22 = vld [vmem:[#allocation6 + $0x890] sm:$0xff] }
 0x3f8   :  { %7590 = vmatprep.subr.bf16.mxu1 %v9138_v26  ;;  %v4199_v53 = vld [vmem:[#allocation6 + $0x8b0] sm:$0xff]  ;;  %v9186_v26 = vcombine.high %v4188_v14, %v4192_v18 }
 0x3f9   :  { %v9191_v23 = vcombine.low %v4195_v22, %v4199_v53  ;;  %v4243_v18 = vld [vmem:[#allocation6 + $0xa10] sm:$0xff] }
 0x3fa   :  { %7427 = vmatpush1.bf16.msra.mxu0 %v9135_v31  ;;  %v9192_v31 = vcombine.high %v4195_v22, %v4199_v53  ;;  %v4248_v22 = vld [vmem:[#allocation6 + $0xa38] sm:$0xff] }
 0x3fb   :  { %7591 = vmatpush1.bf16.msra.mxu1 %v9137_v33  ;;  %7428 = vmatprep.subr.bf16.mxu0 %v9144_v49  ;;  %v9194_v33 = vcombine.high %v4196_v27, %v4200_v28  ;;  %v4203_v49 = vld [vmem:[#allocation6 + $0x8d0] sm:$0xff] }
 0x3fc   :  { %7592 = vmatprep.subr.bf16.mxu1 %v9146_v34  ;;  %v4207_v34 = vld [vmem:[#allocation6 + $0x8f0] sm:$0xff] }
 0x3fd   :  { %v9200_v38 = vcombine.high %v4203_v49, %v4207_v34 }
 0x3fe   :  { %7429 = vmatpush1.bf16.msra.mxu0 %v9143_v40  ;;  %v9202_v40 = vcombine.high %v4204_v35, %v4208_v25 }
 0x3ff   :  { %7593 = vmatpush1.bf16.msra.mxu1 %v9145_v41  ;;  %7430 = vmatprep.subr.bf16.mxu0 %v9152_v42  ;;  %v4211_v41 = vld [vmem:[#allocation6 + $0x910] sm:$0xff] }
 0x400   :  { %7594 = vmatprep.subr.bf16.mxu1 %v9154_v36  ;;  %v4215_v42 = vld [vmem:[#allocation6 + $0x930] sm:$0xff]  ;;  %v4212_v36 = vld [vmem:[#allocation6 + $0x918] sm:$0xff] }
 0x401   :  { %v9208_v45 = vcombine.high %v4211_v41, %v4215_v42  ;;  %v9210_v46 = vcombine.high %v4212_v36, %v4216_v43  ;;  %v9207_v52 = vcombine.low %v4211_v41, %v4215_v42  ;;  %v9209_v56 = vcombine.low %v4212_v36, %v4216_v43 }
 0x402   :  { %7431 = vmatpush1.bf16.msra.mxu0 %v9151_v50  ;;  %v4219_v50 = vld [vmem:[#allocation6 + $0x950] sm:$0xff] }
 0x403   :  { %7595 = vmatpush1.bf16.msra.mxu1 %v9153_v9  ;;  %7432 = vmatprep.subr.bf16.mxu0 %v9160_v24  ;;  %v4223_v9 = vld [vmem:[#allocation6 + $0x970] sm:$0xff]  ;;  %v4220_v24 = vld [vmem:[#allocation6 + $0x958] sm:$0xff] }
 0x404   :  { %7596 = vmatprep.subr.bf16.mxu1 %v9162_v51  ;;  %v4224_v51 = vld [vmem:[#allocation6 + $0x978] sm:$0xff]  ;;  %v9216_v58 = vcombine.high %v4219_v50, %v4223_v9  ;;  %v9215_v63 = vcombine.low %v4219_v50, %v4223_v9 }
 0x405   :  { %v9218_v60 = vcombine.high %v4220_v24, %v4224_v51  ;;  %v9217_v5 = vcombine.low %v4220_v24, %v4224_v51 }
 0x406   :  { %7433 = vmatpush1.bf16.msra.mxu0 %v9159_v61  ;;  %v4227_v61 = vld [vmem:[#allocation6 + $0x990] sm:$0xff] }
 0x407   :  { %7597 = vmatpush1.bf16.msra.mxu1 %v9161_v62  ;;  %7434 = vmatprep.subr.bf16.mxu0 %v9168_v59  ;;  %v4231_v62 = vld [vmem:[#allocation6 + $0x9b0] sm:$0xff]  ;;  %v4228_v59 = vld [vmem:[#allocation6 + $0x998] sm:$0xff] }
 0x408   :  { %7598 = vmatprep.subr.bf16.mxu1 %v9170_v4  ;;  %v4232_v4 = vld [vmem:[#allocation6 + $0x9b8] sm:$0xff]  ;;  %v9224_v0 = vcombine.high %v4227_v61, %v4231_v62  ;;  %v9223_v11 = vcombine.low %v4227_v61, %v4231_v62 }
 0x409   :  { %v9226_v1 = vcombine.high %v4228_v59, %v4232_v4  ;;  %v9225_v7 = vcombine.low %v4228_v59, %v4232_v4 }
 0x40a   :  { %7435 = vmatpush1.bf16.msra.mxu0 %v9167_v39  ;;  %v4235_v39 = vld [vmem:[#allocation6 + $0x9d0] sm:$0xff] }
 0x40b   :  { %7599 = vmatpush1.bf16.msra.mxu1 %v9169_v3  ;;  %7445 = vmatprep.subr.bf16.mxu0 %v9176_v13  ;;  %v4239_v3 = vld [vmem:[#allocation6 + $0x9f0] sm:$0xff]  ;;  %v4236_v13 = vld [vmem:[#allocation6 + $0x9d8] sm:$0xff] }
 0x40c   :  { %7609 = vmatprep.subr.bf16.mxu1 %v9178_v6  ;;  %v4240_v6 = vld [vmem:[#allocation6 + $0x9f8] sm:$0xff]  ;;  %v9231_v53 = vcombine.low %v4235_v39, %v4239_v3 }
 0x40d   :  { %7437 = vmatmul.mubr.bf16.vlgmr.msra.gmra.mrb[12].mxu0 %v10165_v15  ;;  %v9234_v14 = vcombine.high %v4236_v13, %v4240_v6 }
 0x40e   :  { %7601 = vmatmul.mubr.bf16.vlgmr.msra.gmra.mrb[12].mxu1 %v10165_v15  ;;  %7446 = vmatpush1.bf16.msra.mxu0 %v9175_v10  ;;  %v9193_v15 = vcombine.low %v4196_v27, %v4200_v28  ;;  %v9232_v10 = vcombine.high %v4235_v39, %v4239_v3 }
 0x40f   :  { %7477 = vmatprep.mubr.bf16.mxu0 %v10185_v17  ;;  %7610 = vmatpush1.bf16.msra.mxu1 %v9177_v19  ;;  %v4247_v19 = vld [vmem:[#allocation6 + $0xa30] sm:$0xff] }
 0x410   :  { %7641 = vmatprep.mubr.bf16.mxu1 %v10185_v17  ;;  %7447 = vmatprep.subr.bf16.mxu0 %v9184_v21  ;;  %v9199_v17 = vcombine.low %v4203_v49, %v4207_v34  ;;  %v4244_v21 = vld [vmem:[#allocation6 + $0xa18] sm:$0xff]  ;;  %v9240_v27 = vcombine.high %v4243_v18, %v4247_v19  ;;  %v9239_v49 = vcombine.low %v4243_v18, %v4247_v19 }
 0x411   :  { %7611 = vmatprep.subr.bf16.mxu1 %v9186_v26  ;;  %v9233_v26 = vcombine.low %v4236_v13, %v4240_v6  ;;  %v9242_v28 = vcombine.high %v4244_v21, %v4248_v22  ;;  %v9241_v34 = vcombine.low %v4244_v21, %v4248_v22 }
 0x412   :  { %7448 = vmatpush1.bf16.msra.mxu0 %v9183_v8  ;;  %v4251_v8 = vld [vmem:[#allocation6 + $0xa50] sm:$0xff] }
 0x413   :  { %7612 = vmatpush1.bf16.msra.mxu1 %v9185_v29  ;;  %7449 = vmatprep.subr.bf16.mxu0 %v9192_v31  ;;  %v4255_v29 = vld [vmem:[#allocation6 + $0xa70] sm:$0xff]  ;;  %v4252_v31 = vld [vmem:[#allocation6 + $0xa58] sm:$0xff] }
 0x414   :  { %7613 = vmatprep.subr.bf16.mxu1 %v9194_v33  ;;  %v4256_v33 = vld [vmem:[#allocation6 + $0xa78] sm:$0xff]  ;;  %v9248_v35 = vcombine.high %v4251_v8, %v4255_v29  ;;  %v9247_v41 = vcombine.low %v4251_v8, %v4255_v29 }
 0x415   :  { %v9250_v25 = vcombine.high %v4252_v31, %v4256_v33  ;;  %v9249_v42 = vcombine.low %v4252_v31, %v4256_v33 }
 0x416   :  { %7450 = vmatpush1.bf16.msra.mxu0 %v9191_v23  ;;  %v4259_v23 = vld [vmem:[#allocation6 + $0xa90] sm:$0xff] }
 0x417   :  { %7614 = vmatpush1.bf16.msra.mxu1 %v9193_v15  ;;  %7451 = vmatprep.subr.bf16.mxu0 %v9200_v38  ;;  %v4263_v15 = vld [vmem:[#allocation6 + $0xab0] sm:$0xff]  ;;  %v4260_v38 = vld [vmem:[#allocation6 + $0xa98] sm:$0xff] }
 0x418   :  { %7615 = vmatprep.subr.bf16.mxu1 %v9202_v40  ;;  %v4264_v40 = vld [vmem:[#allocation6 + $0xab8] sm:$0xff]  ;;  %v9256_v36 = vcombine.high %v4259_v23, %v4263_v15  ;;  %v9255_v50 = vcombine.low %v4259_v23, %v4263_v15 }
 0x419   :  { %v9258_v43 = vcombine.high %v4260_v38, %v4264_v40  ;;  %v9257_v9 = vcombine.low %v4260_v38, %v4264_v40 }
 0x41a   :  { %7452 = vmatpush1.bf16.msra.mxu0 %v9199_v17  ;;  %v4267_v17 = vld [vmem:[#allocation6 + $0xad0] sm:$0xff] }
 0x41b   :  { %7616 = vmatpush1.bf16.msra.mxu1 %v9201_v44  ;;  %7453 = vmatprep.subr.bf16.mxu0 %v9208_v45  ;;  %v4271_v44 = vld [vmem:[#allocation6 + $0xaf0] sm:$0xff]  ;;  %v4268_v45 = vld [vmem:[#allocation6 + $0xad8] sm:$0xff] }
 0x41c   :  { %7617 = vmatprep.subr.bf16.mxu1 %v9210_v46  ;;  %v4272_v46 = vld [vmem:[#allocation6 + $0xaf8] sm:$0xff]  ;;  %v9264_v24 = vcombine.high %v4267_v17, %v4271_v44  ;;  %v9263_v61 = vcombine.low %v4267_v17, %v4271_v44 }
 0x41d   :  { %v9266_v51 = vcombine.high %v4268_v45, %v4272_v46  ;;  %v9265_v62 = vcombine.low %v4268_v45, %v4272_v46  ;;  %v4320_v17 = vld [vmem:[#allocation6 + $0xc78] sm:$0xff]  ;;  %v4323_v46 = vld [vmem:[#allocation6 + $0xc90] sm:$0xff] }
 0x41e   :  { %7454 = vmatpush1.bf16.msra.mxu0 %v9207_v52  ;;  %v4275_v52 = vld [vmem:[#allocation6 + $0xb10] sm:$0xff] }
 0x41f   :  { %7618 = vmatpush1.bf16.msra.mxu1 %v9209_v56  ;;  %7455 = vmatprep.subr.bf16.mxu0 %v9216_v58  ;;  %v4279_v56 = vld [vmem:[#allocation6 + $0xb30] sm:$0xff]  ;;  %v4276_v58 = vld [vmem:[#allocation6 + $0xb18] sm:$0xff] }
 0x420   :  { %7619 = vmatprep.subr.bf16.mxu1 %v9218_v60  ;;  %v4280_v60 = vld [vmem:[#allocation6 + $0xb38] sm:$0xff]  ;;  %v9272_v59 = vcombine.high %v4275_v52, %v4279_v56  ;;  %v9271_v39 = vcombine.low %v4275_v52, %v4279_v56 }
 0x421   :  { %v9274_v4 = vcombine.high %v4276_v58, %v4280_v60  ;;  %v9273_v3 = vcombine.low %v4276_v58, %v4280_v60 }
 0x422   :  { %7456 = vmatpush1.bf16.msra.mxu0 %v9215_v63  ;;  %v4283_v63 = vld [vmem:[#allocation6 + $0xb50] sm:$0xff] }
 0x423   :  { %7620 = vmatpush1.bf16.msra.mxu1 %v9217_v5  ;;  %7457 = vmatprep.subr.bf16.mxu0 %v9224_v0  ;;  %v4287_v5 = vld [vmem:[#allocation6 + $0xb70] sm:$0xff]  ;;  %v4284_v0 = vld [vmem:[#allocation6 + $0xb58] sm:$0xff] }
 0x424   :  { %7621 = vmatprep.subr.bf16.mxu1 %v9226_v1  ;;  %v4288_v1 = vld [vmem:[#allocation6 + $0xb78] sm:$0xff]  ;;  %v9280_v13 = vcombine.high %v4283_v63, %v4287_v5  ;;  %v9279_v18 = vcombine.low %v4283_v63, %v4287_v5 }
 0x425   :  { %v9282_v6 = vcombine.high %v4284_v0, %v4288_v1  ;;  %v9281_v19 = vcombine.low %v4284_v0, %v4288_v1  ;;  %v4339_v1 = vld [vmem:[#allocation6 + $0xd10] sm:$0xff] }
 0x426   :  { %7458 = vmatpush1.bf16.msra.mxu0 %v9223_v11  ;;  %v4291_v11 = vld [vmem:[#allocation6 + $0xb90] sm:$0xff] }
 0x427   :  { %7622 = vmatpush1.bf16.msra.mxu1 %v9225_v7  ;;  %7459 = vmatprep.subr.bf16.mxu0 %v9232_v10  ;;  %v4295_v7 = vld [vmem:[#allocation6 + $0xbb0] sm:$0xff]  ;;  %v4292_v10 = vld [vmem:[#allocation6 + $0xb98] sm:$0xff] }
 0x428   :  { %7623 = vmatprep.subr.bf16.mxu1 %v9234_v14  ;;  %v4296_v14 = vld [vmem:[#allocation6 + $0xbb8] sm:$0xff]  ;;  %v9288_v21 = vcombine.high %v4291_v11, %v4295_v7  ;;  %v9287_v8 = vcombine.low %v4291_v11, %v4295_v7 }
 0x429   :  { %v9290_v22 = vcombine.high %v4292_v10, %v4296_v14  ;;  %v9289_v29 = vcombine.low %v4292_v10, %v4296_v14  ;;  %v4347_v10 = vld [vmem:[#allocation6 + $0xd50] sm:$0xff] }
 0x42a   :  { %7460 = vmatpush1.bf16.msra.mxu0 %v9231_v53  ;;  %v4299_v53 = vld [vmem:[#allocation6 + $0xbd0] sm:$0xff] }
 0x42b   :  { %7624 = vmatpush1.bf16.msra.mxu1 %v9233_v26  ;;  %7461 = vmatprep.subr.bf16.mxu0 %v9240_v27  ;;  %v4303_v26 = vld [vmem:[#allocation6 + $0xbf0] sm:$0xff]  ;;  %v4300_v27 = vld [vmem:[#allocation6 + $0xbd8] sm:$0xff] }
 0x42c   :  { %7625 = vmatprep.subr.bf16.mxu1 %v9242_v28  ;;  %v4304_v28 = vld [vmem:[#allocation6 + $0xbf8] sm:$0xff]  ;;  %v9296_v31 = vcombine.high %v4299_v53, %v4303_v26  ;;  %v9295_v23 = vcombine.low %v4299_v53, %v4303_v26  ;;  %v4351_v14 = vld [vmem:[#allocation6 + $0xd70] sm:$0xff] }
 0x42d   :  { %v9298_v33 = vcombine.high %v4300_v27, %v4304_v28  ;;  %v9297_v15 = vcombine.low %v4300_v27, %v4304_v28  ;;  %v9344_v53 = vcombine.high %v4347_v10, %v4351_v14  ;;  %v4355_v27 = vld [vmem:[#allocation6 + $0xd90] sm:$0xff] }
 0x42e   :  { %7462 = vmatpush1.bf16.msra.mxu0 %v9239_v49  ;;  %v4307_v49 = vld [vmem:[#allocation6 + $0xc10] sm:$0xff] }
 0x42f   :  { %7626 = vmatpush1.bf16.msra.mxu1 %v9241_v34  ;;  %7463 = vmatprep.subr.bf16.mxu0 %v9248_v35  ;;  %v4311_v34 = vld [vmem:[#allocation6 + $0xc30] sm:$0xff]  ;;  %v4308_v35 = vld [vmem:[#allocation6 + $0xc18] sm:$0xff] }
 0x430   :  { %7627 = vmatprep.subr.bf16.mxu1 %v9250_v25  ;;  %v4312_v25 = vld [vmem:[#allocation6 + $0xc38] sm:$0xff]  ;;  %v9304_v38 = vcombine.high %v4307_v49, %v4311_v34  ;;  %v4359_v28 = vld [vmem:[#allocation6 + $0xdb0] sm:$0xff] }
 0x431   :  { %v9306_v40 = vcombine.high %v4308_v35, %v4312_v25  ;;  %v9305_v44 = vcombine.low %v4308_v35, %v4312_v25 }
 0x432   :  { %7464 = vmatpush1.bf16.msra.mxu0 %v9247_v41  ;;  %v4315_v41 = vld [vmem:[#allocation6 + $0xc50] sm:$0xff] }
 0x433   :  { %7628 = vmatpush1.bf16.msra.mxu1 %v9249_v42  ;;  %7465 = vmatprep.subr.bf16.mxu0 %v9256_v36  ;;  %v4319_v42 = vld [vmem:[#allocation6 + $0xc70] sm:$0xff]  ;;  %v9303_v36 = vcombine.low %v4307_v49, %v4311_v34  ;;  %v9352_v49 = vcombine.high %v4355_v27, %v4359_v28 }
 0x434   :  { %7629 = vmatprep.subr.bf16.mxu1 %v9258_v43  ;;  %v4316_v43 = vld [vmem:[#allocation6 + $0xc58] sm:$0xff]  ;;  %v9312_v45 = vcombine.high %v4315_v41, %v4319_v42  ;;  %v9311_v52 = vcombine.low %v4315_v41, %v4319_v42 }
 0x435   :  { %v9313_v56 = vcombine.low %v4316_v43, %v4320_v17  ;;  %v4364_v41 = vld [vmem:[#allocation6 + $0xdd8] sm:$0xff] }
 0x436   :  { %7466 = vmatpush1.bf16.msra.mxu0 %v9255_v50  ;;  %v4327_v50 = vld [vmem:[#allocation6 + $0xcb0] sm:$0xff]  ;;  %v4368_v42 = vld [vmem:[#allocation6 + $0xdf8] sm:$0xff] }
 0x437   :  { %7630 = vmatpush1.bf16.msra.mxu1 %v9257_v9  ;;  %7467 = vmatprep.subr.bf16.mxu0 %v9264_v24  ;;  %v9314_v9 = vcombine.high %v4316_v43, %v4320_v17  ;;  %v4324_v24 = vld [vmem:[#allocation6 + $0xc98] sm:$0xff]  ;;  %v9320_v58 = vcombine.high %v4323_v46, %v4327_v50  ;;  %v9319_v63 = vcombine.low %v4323_v46, %v4327_v50 }
 0x438   :  { %7631 = vmatprep.subr.bf16.mxu1 %v9266_v51  ;;  %v4328_v51 = vld [vmem:[#allocation6 + $0xcb8] sm:$0xff]  ;;  %v9351_v17 = vcombine.low %v4355_v27, %v4359_v28 }
 0x439   :  { %v9322_v60 = vcombine.high %v4324_v24, %v4328_v51 }
 0x43a   :  { %7468 = vmatpush1.bf16.msra.mxu0 %v9263_v61  ;;  %v4331_v61 = vld [vmem:[#allocation6 + $0xcd0] sm:$0xff] }
 0x43b   :  { %7632 = vmatpush1.bf16.msra.mxu1 %v9265_v62  ;;  %7469 = vmatprep.subr.bf16.mxu0 %v9272_v59  ;;  %v4335_v62 = vld [vmem:[#allocation6 + $0xcf0] sm:$0xff]  ;;  %v4332_v59 = vld [vmem:[#allocation6 + $0xcd8] sm:$0xff] }
 0x43c   :  { %7633 = vmatprep.subr.bf16.mxu1 %v9274_v4  ;;  %v4336_v4 = vld [vmem:[#allocation6 + $0xcf8] sm:$0xff]  ;;  %v9328_v5 = vcombine.high %v4331_v61, %v4335_v62 }
 0x43d   :  { %v9330_v0 = vcombine.high %v4332_v59, %v4336_v4 }
 0x43e   :  { %7470 = vmatpush1.bf16.msra.mxu0 %v9271_v39  ;;  %v4343_v39 = vld [vmem:[#allocation6 + $0xd30] sm:$0xff] }
 0x43f   :  { %7634 = vmatpush1.bf16.msra.mxu1 %v9273_v3  ;;  %7471 = vmatprep.subr.bf16.mxu0 %v9280_v13  ;;  %v4340_v3 = vld [vmem:[#allocation6 + $0xd18] sm:$0xff]  ;;  %v9336_v11 = vcombine.high %v4339_v1, %v4343_v39 }
 0x440   :  { %7635 = vmatprep.subr.bf16.mxu1 %v9282_v6  ;;  %v4344_v13 = vld [vmem:[#allocation6 + $0xd38] sm:$0xff]  ;;  %v9329_v6 = vcombine.low %v4332_v59, %v4336_v4  ;;  %v4379_v59 = vld [vmem:[#allocation6 + $0xe50] sm:$0xff] }
 0x441   :  { %v9338_v7 = vcombine.high %v4340_v3, %v4344_v13  ;;  %v4383_v4 = vld [vmem:[#allocation6 + $0xe70] sm:$0xff] }
 0x442   :  { %7472 = vmatpush1.bf16.msra.mxu0 %v9279_v18  ;;  %v4348_v18 = vld [vmem:[#allocation6 + $0xd58] sm:$0xff] }
 0x443   :  { %7636 = vmatpush1.bf16.msra.mxu1 %v9281_v19  ;;  %7473 = vmatprep.subr.bf16.mxu0 %v9288_v21  ;;  %v4352_v19 = vld [vmem:[#allocation6 + $0xd78] sm:$0xff]  ;;  %v9335_v21 = vcombine.low %v4339_v1, %v4343_v39  ;;  %v9376_v1 = vcombine.high %v4379_v59, %v4383_v4 }
 0x444   :  { %7637 = vmatprep.subr.bf16.mxu1 %v9290_v22  ;;  %v9337_v22 = vcombine.low %v4340_v3, %v4344_v13  ;;  %v9346_v26 = vcombine.high %v4348_v18, %v4352_v19  ;;  %v4387_v3 = vld [vmem:[#allocation6 + $0xe90] sm:$0xff] }
 0x445   :  { %v4391_v13 = vld [vmem:[#allocation6 + $0xeb0] sm:$0xff] }
 0x446   :  { %7474 = vmatpush1.bf16.msra.mxu0 %v9287_v8  ;;  %v4356_v8 = vld [vmem:[#allocation6 + $0xd98] sm:$0xff] }
 0x447   :  { %7638 = vmatpush1.bf16.msra.mxu1 %v9289_v29  ;;  %7475 = vmatprep.subr.bf16.mxu0 %v9296_v31  ;;  %v4360_v29 = vld [vmem:[#allocation6 + $0xdb8] sm:$0xff]  ;;  %v9343_v31 = vcombine.low %v4347_v10, %v4351_v14  ;;  %v9384_v10 = vcombine.high %v4387_v3, %v4391_v13 }
 0x448   :  { %7639 = vmatprep.subr.bf16.mxu1 %v9298_v33  ;;  %v9345_v33 = vcombine.low %v4348_v18, %v4352_v19  ;;  %v9354_v25 = vcombine.high %v4356_v8, %v4360_v29  ;;  %v9353_v46 = vcombine.low %v4356_v8, %v4360_v29  ;;  %v4395_v18 = vld [vmem:[#allocation6 + $0xed0] sm:$0xff] }
 0x449   :  { %v4399_v19 = vld [vmem:[#allocation6 + $0xef0] sm:$0xff] }
 0x44a   :  { %7476 = vmatpush1.bf16.msra.mxu0 %v9295_v23  ;;  %v4363_v23 = vld [vmem:[#allocation6 + $0xdd0] sm:$0xff]  ;;  %v9392_v27 = vcombine.high %v4395_v18, %v4399_v19 }
 0x44b   :  { %7640 = vmatpush1.bf16.msra.mxu1 %v9297_v15  ;;  %7486 = vmatprep.subr.bf16.mxu0 %v9304_v38  ;;  %v4367_v15 = vld [vmem:[#allocation6 + $0xdf0] sm:$0xff] }
 0x44c   :  { %7650 = vmatprep.subr.bf16.mxu1 %v9306_v40  ;;  %v9360_v50 = vcombine.high %v4363_v23, %v4367_v15  ;;  %v4403_v8 = vld [vmem:[#allocation6 + $0xf10] sm:$0xff] }
 0x44d   :  { %7478 = vmatmul.mubr.bf16.vlgmr.msra.gmra.mrb[12].mxu0 %v10187_v20  ;;  %v4407_v29 = vld [vmem:[#allocation6 + $0xf30] sm:$0xff] }
 0x44e   :  { %7642 = vmatmul.mubr.bf16.vlgmr.msra.gmra.mrb[12].mxu1 %v10187_v20  ;;  %7487 = vmatpush1.bf16.msra.mxu0 %v9303_v36  ;;  %v9321_v20 = vcombine.low %v4324_v24, %v4328_v51  ;;  %v4371_v24 = vld [vmem:[#allocation6 + $0xe10] sm:$0xff] }
 0x44f   :  { %7518 = vmatprep.mubr.bf16.mxu0 %v10191_v12  ;;  %7651 = vmatpush1.bf16.msra.mxu1 %v9305_v44  ;;  %v4375_v51 = vld [vmem:[#allocation6 + $0xe30] sm:$0xff] }
 0x450   :  { %7682 = vmatprep.mubr.bf16.mxu1 %v10191_v12  ;;  %7488 = vmatprep.subr.bf16.mxu0 %v9312_v45  ;;  %v9327_v12 = vcombine.low %v4331_v61, %v4335_v62  ;;  %v9368_v61 = vcombine.high %v4371_v24, %v4375_v51 }
 0x451   :  { %7652 = vmatprep.subr.bf16.mxu1 %v9314_v9  ;;  %v9362_v9 = vcombine.high %v4364_v41, %v4368_v42 }
 0x452   :  { %7489 = vmatpush1.bf16.msra.mxu0 %v9311_v52  ;;  %v4372_v52 = vld [vmem:[#allocation6 + $0xe18] sm:$0xff] }
 0x453   :  { %7653 = vmatpush1.bf16.msra.mxu1 %v9313_v56  ;;  %7490 = vmatprep.subr.bf16.mxu0 %v9320_v58  ;;  %v4376_v56 = vld [vmem:[#allocation6 + $0xe38] sm:$0xff]  ;;  %v9359_v58 = vcombine.low %v4363_v23, %v4367_v15  ;;  %v9400_v23 = vcombine.high %v4403_v8, %v4407_v29 }
 0x454   :  { %7654 = vmatprep.subr.bf16.mxu1 %v9322_v60  ;;  %v9361_v60 = vcombine.low %v4364_v41, %v4368_v42  ;;  %v9370_v62 = vcombine.high %v4372_v52, %v4376_v56  ;;  %v4411_v41 = vld [vmem:[#allocation6 + $0xf50] sm:$0xff] }
 0x455   :  { %v4415_v42 = vld [vmem:[#allocation6 + $0xf70] sm:$0xff] }
 0x456   :  { %7491 = vmatpush1.bf16.msra.mxu0 %v9319_v63  ;;  %v4380_v63 = vld [vmem:[#allocation6 + $0xe58] sm:$0xff] }
 0x457   :  { %7655 = vmatpush1.bf16.msra.mxu1 %v9321_v20  ;;  %7492 = vmatprep.subr.bf16.mxu0 %v9328_v5  ;;  %v4384_v20 = vld [vmem:[#allocation6 + $0xe78] sm:$0xff]  ;;  %v9367_v5 = vcombine.low %v4371_v24, %v4375_v51 }
 0x458   :  { %7656 = vmatprep.subr.bf16.mxu1 %v9330_v0  ;;  %v9369_v0 = vcombine.low %v4372_v52, %v4376_v56  ;;  %v9378_v39 = vcombine.high %v4380_v63, %v4384_v20  ;;  %v4420_v24 = vld [vmem:[#allocation6 + $0xf98] sm:$0xff]  ;;  %v10228_v52 = vld [vmem:[#allocation7] sm:$0xff]  ;;  %v9407_v56 = vcombine.low %v4411_v41, %v4415_v42 }
 0x459   :  { %v4424_v51 = vld [vmem:[#allocation6 + $0xfb8] sm:$0xff] }
 0x45a   :  { %7493 = vmatpush1.bf16.msra.mxu0 %v9327_v12  ;;  %v4388_v12 = vld [vmem:[#allocation6 + $0xe98] sm:$0xff] }
 0x45b   :  { %7657 = vmatpush1.bf16.msra.mxu1 %v9329_v6  ;;  %7494 = vmatprep.subr.bf16.mxu0 %v9336_v11  ;;  %v4392_v6 = vld [vmem:[#allocation6 + $0xeb8] sm:$0xff]  ;;  %v9375_v11 = vcombine.low %v4379_v59, %v4383_v4  ;;  %v4431_v59 = vld [vmem:[#allocation6 + $0xff0] sm:$0xff]  ;;  %v4442_v4 = vrot.slane %v10228_v52, %v627_v16 }
 0x45c   :  { %7658 = vmatprep.subr.bf16.mxu1 %v9338_v7  ;;  %v9377_v7 = vcombine.low %v4380_v63, %v4384_v20  ;;  %v9386_v14 = vcombine.high %v4388_v12, %v4392_v6  ;;  %v4428_v63 = vld [vmem:[#allocation6 + $0xfd8] sm:$0xff] }
 0x45d   :  { %v4432_v20 = vld [vmem:[#allocation6 + $0xff8] sm:$0xff] }
 0x45e   :  { %7495 = vmatpush1.bf16.msra.mxu0 %v9335_v21  ;;  %v4396_v21 = vld [vmem:[#allocation6 + $0xed8] sm:$0xff] }
 0x45f   :  { %7659 = vmatpush1.bf16.msra.mxu1 %v9337_v22  ;;  %7496 = vmatprep.subr.bf16.mxu0 %v9344_v53  ;;  %v4400_v22 = vld [vmem:[#allocation6 + $0xef8] sm:$0xff]  ;;  %v9383_v53 = vcombine.low %v4387_v3, %v4391_v13  ;;  %v9426_v3 = vcombine.high %v4428_v63, %v4432_v20 }
 0x460   :  { %v10220_v34 = vpop.f32.mrb[8].mxu0  ;;  %v10222_v35 = vpop.f32.mrb[8].mxu1  ;;  %7660 = vmatprep.subr.bf16.mxu1 %v9346_v26  ;;  %v9385_v26 = vcombine.low %v4388_v12, %v4392_v6  ;;  %v9394_v28 = vcombine.high %v4396_v21, %v4400_v22  ;;  %v9425_v6 = vcombine.low %v4428_v63, %v4432_v20  ;;  %v9745_v63 = vld [vmem:[#allocation9 + $0x180] sm:$0xff]   ;;  %v9746_v20 = vld [vmem:[#allocation9 + $0x148] sm:$0xff]  }
 0x461   :  { %v10224_v38 = vpop.f32.mrb[9].mxu0  ;;  %v10226_v40 = vpop.f32.mrb[9].mxu1 }
 0x462   :  { %v7196_v36 = vpop.f32.mrb[10].mxu0  ;;  %v7360_v43 = vpop.f32.mrb[10].mxu1  ;;  %7497 = vmatpush1.bf16.msra.mxu0 %v9343_v31  ;;  %v4404_v31 = vld [vmem:[#allocation6 + $0xf18] sm:$0xff]  ;;  %v9589_v13 = vadd.f32 %v10224_v38, %v4442_v4 }
 0x463   :  { %7661 = vmatpush1.bf16.msra.mxu1 %v9345_v33  ;;  %v7197_v44 = vpop.f32.mrb[11].mxu0  ;;  %v7361_v45 = vpop.f32.mrb[11].mxu1  ;;  %7498 = vmatprep.subr.bf16.mxu0 %v9352_v49  ;;  %v4408_v33 = vld [vmem:[#allocation6 + $0xf38] sm:$0xff]  ;;  %v9391_v49 = vcombine.low %v4395_v18, %v4399_v19  ;;  %v9713_v18 = vld [vmem:[#allocation9 + $0x80] sm:$0xff]   ;;  %v9714_v19 = vld [vmem:[#allocation9 + $0x48] sm:$0xff]  }
 0x464   :  { %7662 = vmatprep.subr.bf16.mxu1 %v9354_v25  ;;  %v9393_v25 = vcombine.low %v4396_v21, %v4400_v22  ;;  %v9402_v15 = vcombine.high %v4404_v31, %v4408_v33  ;;  %v4412_v36 = vld [vmem:[#allocation6 + $0xf58] sm:$0xff]  ;;  %v9401_v44 = vcombine.low %v4404_v31, %v4408_v33  ;;  %v9408_v45 = vcombine.high %v4411_v41, %v4415_v42  ;;  %v9716_v22 = vld [vmem:[#allocation9 + $0x8] sm:$0xff]   ;;  %v9723_v31 = vld [vmem:[#allocation9 + $0xd8] sm:$0xff]  }
 0x465   :  { %v4416_v43 = vld [vmem:[#allocation6 + $0xf78] sm:$0xff]  ;;  %v9725_v33 = vld [vmem:[#allocation9 + $0x98] sm:$0xff]   ;;  %v9730_v41 = vld [vmem:[#allocation9 + $0x68] sm:$0xff]  }
 0x466   :  { %7499 = vmatpush1.bf16.msra.mxu0 %v9351_v17  ;;  %v9399_v17 = vcombine.low %v4403_v8, %v4407_v29  ;;  %v9721_v8 = vld [vmem:[#allocation9 + $0x90] sm:$0xff]   ;;  %v9722_v29 = vld [vmem:[#allocation9 + $0x58] sm:$0xff]   ;;  %v9731_v42 = vld [vmem:[#allocation9 + $0xe8] sm:$0xff]  }
 0x467   :  { %7663 = vmatpush1.bf16.msra.mxu1 %v9353_v46  ;;  %7500 = vmatprep.subr.bf16.mxu0 %v9360_v50  ;;  %v9410_v46 = vcombine.high %v4412_v36, %v4416_v43  ;;  %v4419_v50 = vld [vmem:[#allocation6 + $0xf90] sm:$0xff] }
 0x468   :  { %7664 = vmatprep.subr.bf16.mxu1 %v9362_v9  ;;  %v4423_v9 = vld [vmem:[#allocation6 + $0xfb0] sm:$0xff] }
 0x46a   :  { %7501 = vmatpush1.bf16.msra.mxu0 %v9359_v58  ;;  %v9409_v58 = vcombine.low %v4412_v36, %v4416_v43  ;;  %v9732_v36 = vld [vmem:[#allocation9 + $0x28] sm:$0xff]   ;;  %v4438_v43 = vrot.slane %v10228_v52, %v623_v30 }
 0x46b   :  { %7665 = vmatpush1.bf16.msra.mxu1 %v9361_v60  ;;  %7502 = vmatprep.subr.bf16.mxu0 %v9368_v61  ;;  %v9416_v60 = vcombine.high %v4419_v50, %v4423_v9  ;;  %v9418_v61 = vcombine.high %v4420_v24, %v4424_v51 }
 0x46c   :  { %7666 = vmatprep.subr.bf16.mxu1 %v9370_v62  ;;  %v4427_v62 = vld [vmem:[#allocation6 + $0xfd0] sm:$0xff] }
 0x46d   :  { %v9423_v16 = vcombine.low %v4427_v62, %v4431_v59 }
 0x46e   :  { %7503 = vmatpush1.bf16.msra.mxu0 %v9367_v5  ;;  %v4450_v5 = vrot.slane %v10228_v52, %v635_v37  ;;  %v9711_v37 = vld [vmem:[#allocation9 + $0xc0] sm:$0xff]  }
 0x46f   :  { %7667 = vmatpush1.bf16.msra.mxu1 %v9369_v0  ;;  %7504 = vmatprep.subr.bf16.mxu0 %v9376_v1  ;;  %v9415_v0 = vcombine.low %v4419_v50, %v4423_v9  ;;  %v9417_v1 = vcombine.low %v4420_v24, %v4424_v51  ;;  %v9736_v50 = vld [vmem:[#allocation9 + $0x30] sm:$0xff]   ;;  %v9588_v9 = vadd.f32 %v10220_v34, %v4438_v43  ;;  %v9738_v51 = vld [vmem:[#allocation9 + $0x78] sm:$0xff]   ;;  %v9744_v34 = vld [vmem:[#allocation9 + $0x100] sm:$0xff]  }
 0x470   :  { %7668 = vmatprep.subr.bf16.mxu1 %v9378_v39  ;;  %v9424_v39 = vcombine.high %v4427_v62, %v4431_v59  ;;  %v9591_v12 = vadd.f32 %v10226_v40, %v4450_v5  ;;  %v9715_v40 = vld [vmem:[#allocation9 + $0xc8] sm:$0xff]   ;;  %v9737_v24 = vld [vmem:[#allocation9 + $0xb0] sm:$0xff]   ;;  %v9743_v59 = vld [vmem:[#allocation9 + $0x1c0] sm:$0xff]  }
 0x471   :  { %v9747_v5 = vld [vmem:[#allocation9 + $0x1c8] sm:$0xff]  }
 0x472   :  { %7505 = vmatpush1.bf16.msra.mxu0 %v9375_v11  ;;  %v9710_v11 = vld [vmem:[#allocation9 + $0x40] sm:$0xff]  }
 0x473   :  { %7669 = vmatpush1.bf16.msra.mxu1 %v9377_v7  ;;  %7506 = vmatprep.subr.bf16.mxu0 %v9384_v10  ;;  %v7692_v7 = vmax.f32 %v9589_v13, 0.0  ;;  %v7694_v10 = vmax.f32 %v9591_v12, 0.0  ;;  %v9752_v13 = vld [vmem:[#allocation9 + $0x110] sm:$0xff]  }
 0x474   :  { %7670 = vmatprep.subr.bf16.mxu1 %v9386_v14  ;;  %v9712_v14 = vld [vmem:[#allocation9] sm:$0xff]   ;;  %v9753_v12 = vld [vmem:[#allocation9 + $0x190] sm:$0xff]  }
 0x475   :  { %v7700_v38 = vpack.c.bf16 %v7692_v7, %v7692_v7  ;;  %v7702_v21 = vpack.c.bf16 %v7694_v10, %v7694_v10  ;;  %v9758_v7 = vld [vmem:[#allocation9 + $0x160] sm:$0xff]  }
 0x476   :  { %7507 = vmatpush1.bf16.msra.mxu0 %v9383_v53  ;;  %v9717_v53 = vld [vmem:[#allocation9 + $0x88] sm:$0xff]   ;;  %v9759_v10 = vld [vmem:[#allocation9 + $0x1e0] sm:$0xff]  }
 0x477   :  { %7671 = vmatpush1.bf16.msra.mxu1 %v9385_v26  ;;  %7508 = vmatprep.subr.bf16.mxu0 %v9392_v27  ;;  %v9718_v26 = vld [vmem:[#allocation9 + $0x50] sm:$0xff]  }
 0x478   :  { %7672 = vmatprep.subr.bf16.mxu1 %v9394_v28  ;;  %v9719_v27 = vld [vmem:[#allocation9 + $0xd0] sm:$0xff]  }
 0x479   :  { %v9720_v28 = vld [vmem:[#allocation9 + $0x10] sm:$0xff]  }
 0x47a   :  { %7509 = vmatpush1.bf16.msra.mxu0 %v9391_v49  ;;  %v9726_v49 = vld [vmem:[#allocation9 + $0x60] sm:$0xff]  }
 0x47b   :  { %7673 = vmatpush1.bf16.msra.mxu1 %v9393_v25  ;;  %7510 = vmatprep.subr.bf16.mxu0 %v9400_v23  ;;  %v9727_v25 = vld [vmem:[#allocation9 + $0xe0] sm:$0xff]  }
 0x47c   :  { %7674 = vmatprep.subr.bf16.mxu1 %v9402_v15  ;;  %v9728_v23 = vld [vmem:[#allocation9 + $0x20] sm:$0xff]  }
 0x47d   :  { %v9729_v15 = vld [vmem:[#allocation9 + $0xa0] sm:$0xff]  }
 0x47e   :  { %7511 = vmatpush1.bf16.msra.mxu0 %v9399_v17  ;;  %v9733_v17 = vld [vmem:[#allocation9 + $0xa8] sm:$0xff]  }
 0x47f   :  { %7675 = vmatpush1.bf16.msra.mxu1 %v9401_v44  ;;  %7512 = vmatprep.subr.bf16.mxu0 %v9408_v45  ;;  %v9734_v44 = vld [vmem:[#allocation9 + $0x70] sm:$0xff]   ;;  %v4446_v45 = vrot.slane %v10228_v52, %v631_v54  ;;  %v9741_v54 = vld [vmem:[#allocation9 + $0xb8] sm:$0xff]  }
 0x480   :  { %7676 = vmatprep.subr.bf16.mxu1 %v9410_v46  ;;  %v9735_v46 = vld [vmem:[#allocation9 + $0xf0] sm:$0xff]  }
 0x481   :  { %v9590_v30 = vadd.f32 %v10222_v35, %v4446_v45 }
 0x482   :  { %7513 = vmatpush1.bf16.msra.mxu0 %v9407_v56  ;;  %v9739_v56 = vld [vmem:[#allocation9 + $0xf8] sm:$0xff]  }
 0x483   :  { %7677 = vmatpush1.bf16.msra.mxu1 %v9409_v58  ;;  %7514 = vmatprep.subr.bf16.mxu0 %v9416_v60  ;;  %v9740_v58 = vld [vmem:[#allocation9 + $0x38] sm:$0xff]   ;;  %v7691_v60 = vmax.f32 %v9588_v9, 0.0  ;;  %v7693_v62 = vmax.f32 %v9590_v30, 0.0 }
 0x484   :  { %7678 = vmatprep.subr.bf16.mxu1 %v9418_v61  ;;  %v9742_v61 = vld [vmem:[#allocation9 + $0x140] sm:$0xff]  }
 0x485   :  { %v7699_v4 = vpack.c.bf16 %v7691_v60, %v7691_v60  ;;  %v7701_v35 = vpack.c.bf16 %v7693_v62, %v7693_v62 }
 0x486   :  { %7515 = vmatpush1.bf16.msra.mxu0 %v9415_v0  ;;  %v9748_v0 = vld [vmem:[#allocation9 + $0x108] sm:$0xff]  }
 0x487   :  { %7679 = vmatpush1.bf16.msra.mxu1 %v9417_v1  ;;  %7516 = vmatprep.subr.bf16.mxu0 %v9424_v39  ;;  %v9749_v1 = vld [vmem:[#allocation9 + $0x188] sm:$0xff]   ;;  %v9750_v39 = vld [vmem:[#allocation9 + $0x150] sm:$0xff]  }
 0x488   :  { %7680 = vmatprep.subr.bf16.mxu1 %v9426_v3  ;;  %v9751_v3 = vld [vmem:[#allocation9 + $0x1d0] sm:$0xff]  }
 0x48a   :  { %7517 = vmatpush1.bf16.msra.mxu0 %v9423_v16  ;;  %v9754_v16 = vld [vmem:[#allocation9 + $0x158] sm:$0xff]  }
 0x48b   :  { %7681 = vmatpush1.bf16.msra.mxu1 %v9425_v6  ;;  %9492 = vmatprep.subr.bf16.mxu0 %v9710_v11  ;;  %v9755_v6 = vld [vmem:[#allocation9 + $0x1d8] sm:$0xff]  }
 0x48c   :  { %9514 = vmatprep.subr.bf16.mxu1 %v9711_v37  ;;  %v9756_v11 = vld [vmem:[#allocation9 + $0x118] sm:$0xff]  }
 0x48d   :  { %7519 = vmatmul.mubr.bf16.vlgmr.msra.gmra.mrb[12].mxu0 %v10202_v55  ;;  %v9757_v37 = vld [vmem:[#allocation9 + $0x198] sm:$0xff]  }
 0x48e   :  { %7683 = vmatmul.mubr.bf16.vlgmr.msra.gmra.mrb[12].mxu1 %v10202_v55  ;;  %9493 = vmatpush3.bf16.msra.mxu0 %v9712_v14  ;;  %v9724_v55 = vld [vmem:[#allocation9 + $0x18] sm:$0xff]   ;;  %v9760_v14 = vld [vmem:[#allocation9 + $0x120] sm:$0xff]  }
 0x48f   :  { %8258 = vmatprep.mubr.bf16.mxu0 %v7700_v38  ;;  %9515 = vmatpush3.bf16.msra.mxu1 %v9713_v18  ;;  %v9761_v18 = vld [vmem:[#allocation9 + $0x1a0] sm:$0xff]   ;;  %v9763_v38 = vld [vmem:[#allocation9 + $0x1e8] sm:$0xff]  }
 0x490   :  { %8298 = vmatprep.mubr.bf16.mxu1 %v7702_v21  ;;  %9494 = vmatprep.subr.bf16.mxu0 %v9714_v19  ;;  %v9762_v19 = vld [vmem:[#allocation9 + $0x168] sm:$0xff]  }
 0x491   :  { %9516 = vmatprep.subr.bf16.mxu1 %v9715_v40  ;;  %v9764_v40 = vld [vmem:[#allocation9 + $0x128] sm:$0xff]  }
 0x492   :  { %9495 = vmatpush3.bf16.msra.mxu0 %v9716_v22  ;;  %v9765_v21 = vld [vmem:[#allocation9 + $0x1a8] sm:$0xff]   ;;  %v9766_v22 = vld [vmem:[#allocation9 + $0x170] sm:$0xff]  }
 0x493   :  { %9517 = vmatpush3.bf16.msra.mxu1 %v9717_v53  ;;  %9496 = vmatprep.subr.bf16.mxu0 %v9718_v26  ;;  %v9767_v53 = vld [vmem:[#allocation9 + $0x1f0] sm:$0xff]  }
 0x494   :  { %9518 = vmatprep.subr.bf16.mxu1 %v9719_v27  ;;  %v9768_v26 = vld [vmem:[#allocation9 + $0x130] sm:$0xff]  }
 0x495   :  { %v9769_v27 = vld [vmem:[#allocation9 + $0x1b0] sm:$0xff]  }
 0x496   :  { %9497 = vmatpush3.bf16.msra.mxu0 %v9720_v28  ;;  %v9770_v28 = vld [vmem:[#allocation9 + $0x178] sm:$0xff]  }
 0x497   :  { %9519 = vmatpush3.bf16.msra.mxu1 %v9721_v8  ;;  %9498 = vmatprep.subr.bf16.mxu0 %v9722_v29  ;;  %v9771_v8 = vld [vmem:[#allocation9 + $0x1f8] sm:$0xff]  }
 0x498   :  { %9520 = vmatprep.subr.bf16.mxu1 %v9723_v31  ;;  %v9772_v29 = vld [vmem:[#allocation9 + $0x138] sm:$0xff]  }
 0x499   :  { %v9773_v31 = vld [vmem:[#allocation9 + $0x1b8] sm:$0xff]  }
 0x49a   :  { %9499 = vmatpush3.bf16.msra.mxu0 %v9724_v55  ;;  %v4454_v55 = vrot.slane %v10228_v52, %v639_v32 }
 0x49b   :  { %9521 = vmatpush3.bf16.msra.mxu1 %v9725_v33  ;;  %9500 = vmatprep.subr.bf16.mxu0 %v9726_v49  ;;  %v4462_v33 = vrot.slane %v10228_v52, %v647_v57  ;;  %v4458_v49 = vrot.slane %v10228_v52, %v643_v47 }
 0x49c   :  { %9522 = vmatprep.subr.bf16.mxu1 %v9727_v25  ;;  %v4466_v25 = vrot.slane %v10228_v52, %v651_v48 }
 0x49e   :  { %9501 = vmatpush3.bf16.msra.mxu0 %v9728_v23 }
 0x49f   :  { %9523 = vmatpush3.bf16.msra.mxu1 %v9729_v15  ;;  %9502 = vmatprep.subr.bf16.mxu0 %v9730_v41 }
 0x4a0   :  { %9524 = vmatprep.subr.bf16.mxu1 %v9731_v42 }
 0x4a2   :  { %9503 = vmatpush3.bf16.msra.mxu0 %v9732_v36 }
 0x4a3   :  { %9525 = vmatpush3.bf16.msra.mxu1 %v9733_v17  ;;  %9504 = vmatprep.subr.bf16.mxu0 %v9734_v44 }
 0x4a4   :  { %9526 = vmatprep.subr.bf16.mxu1 %v9735_v46 }
 0x4a6   :  { %9505 = vmatpush3.bf16.msra.mxu0 %v9736_v50 }
 0x4a7   :  { %9527 = vmatpush3.bf16.msra.mxu1 %v9737_v24  ;;  %9506 = vmatprep.subr.bf16.mxu0 %v9738_v51 }
 0x4a8   :  { %9528 = vmatprep.subr.bf16.mxu1 %v9739_v56 }
 0x4aa   :  { %9507 = vmatpush3.bf16.msra.mxu0 %v9740_v58  ;;  %v9427_v58 = vld [vmem:[#allocation10] ss:$0 sm:$0xff] }
 0x4ab   :  { %9529 = vmatpush3.bf16.msra.mxu1 %v9741_v54  ;;  %9536 = vmatprep.subr.bf16.mxu0 %v9742_v61 }
 0x4ac   :  { %9558 = vmatprep.subr.bf16.mxu1 %v9743_v59 }
 0x4ad   :  { %8259 = vmatmul.mubr.bf16.vlgmr.msra.gmra.mrb[16].mxu0 %v7699_v4 }
 0x4ae   :  { %8299 = vmatmul.mubr.bf16.vlgmr.msra.gmra.mrb[16].mxu1 %v7701_v35  ;;  %9537 = vmatpush3.bf16.msra.mxu0 %v9744_v34 }
 0x4af   :  { %9559 = vmatpush3.bf16.msra.mxu1 %v9745_v63  ;;  %9538 = vmatprep.subr.bf16.mxu0 %v9746_v20 }
 0x4b0   :  { %9560 = vmatprep.subr.bf16.mxu1 %v9747_v5 }
 0x4b2   :  { %9539 = vmatpush3.bf16.msra.mxu0 %v9748_v0 }
 0x4b3   :  { %9561 = vmatpush3.bf16.msra.mxu1 %v9749_v1  ;;  %9540 = vmatprep.subr.bf16.mxu0 %v9750_v39 }
 0x4b4   :  { %9562 = vmatprep.subr.bf16.mxu1 %v9751_v3 }
 0x4b6   :  { %9541 = vmatpush3.bf16.msra.mxu0 %v9752_v13 }
 0x4b7   :  { %9563 = vmatpush3.bf16.msra.mxu1 %v9753_v12  ;;  %9542 = vmatprep.subr.bf16.mxu0 %v9754_v16 }
 0x4b8   :  { %9564 = vmatprep.subr.bf16.mxu1 %v9755_v6 }
 0x4ba   :  { %9543 = vmatpush3.bf16.msra.mxu0 %v9756_v11 }
 0x4bb   :  { %9565 = vmatpush3.bf16.msra.mxu1 %v9757_v37  ;;  %9544 = vmatprep.subr.bf16.mxu0 %v9758_v7 }
 0x4bc   :  { %9566 = vmatprep.subr.bf16.mxu1 %v9759_v10 }
 0x4be   :  { %9545 = vmatpush3.bf16.msra.mxu0 %v9760_v14 }
 0x4bf   :  { %9567 = vmatpush3.bf16.msra.mxu1 %v9761_v18  ;;  %9546 = vmatprep.subr.bf16.mxu0 %v9762_v19 }
 0x4c0   :  { %9568 = vmatprep.subr.bf16.mxu1 %v9763_v38 }
 0x4c2   :  { %9547 = vmatpush3.bf16.msra.mxu0 %v9764_v40 }
 0x4c3   :  { %9569 = vmatpush3.bf16.msra.mxu1 %v9765_v21  ;;  %9548 = vmatprep.subr.bf16.mxu0 %v9766_v22 }
 0x4c4   :  { %9570 = vmatprep.subr.bf16.mxu1 %v9767_v53 }
 0x4c6   :  { %9549 = vmatpush3.bf16.msra.mxu0 %v9768_v26 }
 0x4c7   :  { %9571 = vmatpush3.bf16.msra.mxu1 %v9769_v27  ;;  %9550 = vmatprep.subr.bf16.mxu0 %v9770_v28 }
 0x4c8   :  { %9572 = vmatprep.subr.bf16.mxu1 %v9771_v8 }
 0x4ca   :  { %9551 = vmatpush3.bf16.msra.mxu0 %v9772_v29 }
 0x4cb   :  { %9573 = vmatpush3.bf16.msra.mxu1 %v9773_v31 }
 0x560   :  { %v7520_v23 = vpop.f32.mrb[12].mxu0 }
 0x561   :  { %v9592_v15 = vadd.f32 %v7520_v23, %v4454_v55  ;;  %v7684_v41 = vpop.f32.mrb[12].mxu1  ;;  %v7522_v42 = vpop.f32.mrb[13].mxu0 }
 0x562   :  { %v9594_v36 = vadd.f32 %v7684_v41, %v4462_v33  ;;  %v9593_v43 = vadd.f32 %v7522_v42, %v4458_v49  ;;  %v7686_v17 = vpop.f32.mrb[13].mxu1  ;;  %v7524_v32 = vpop.f32.mrb[14].mxu0 }
 0x563   :  { %v7695_v44 = vmax.f32 %v9592_v15, 0.0  ;;  %v9595_v45 = vadd.f32 %v7686_v17, %v4466_v25  ;;  %v7688_v46 = vpop.f32.mrb[14].mxu1  ;;  %v7525_v57 = vpop.f32.mrb[15].mxu0 }
 0x564   :  { %v7697_v50 = vmax.f32 %v9594_v36, 0.0  ;;  %v7696_v9 = vmax.f32 %v9593_v43, 0.0  ;;  %v7689_v24 = vpop.f32.mrb[15].mxu1 }
 0x565   :  { %v7698_v47 = vmax.f32 %v9595_v45, 0.0  ;;  %v7703_v2 = vpack.c.bf16 %v7695_v44, %v7695_v44 }
 0x566   :  { %v7704_v51 = vpack.c.bf16 %v7696_v9, %v7696_v9  ;;  %v7705_v48 = vpack.c.bf16 %v7697_v50, %v7697_v50 }
 0x567   :  { %v7706_v30 = vpack.c.bf16 %v7698_v47, %v7698_v47 }
 0x568   :  { %8338 = vmatprep.mubr.bf16.mxu0 %v7704_v51 }
 0x569   :  { %8378 = vmatprep.mubr.bf16.mxu1 %v7706_v30  ;;  %8339 = vmatmul.mubr.bf16.vlgmr.msra.gmra.mrb[20].mxu0 %v7703_v2 }
 0x56a   :  { %8379 = vmatmul.mubr.bf16.vlgmr.msra.gmra.mrb[20].mxu1 %v7705_v48 }
 0x580   :  { %v9508_v52 = vpop.f32.mrb[16].mxu0 }
 0x581   :  { %v9530_v56 = vpop.f32.mrb[16].mxu1  ;;  %v9509_v60 = vpop.f32.mrb[17].mxu0 }
 0x582   :  { %v9510_v54 = vadd.f32 %v9509_v60, %v9508_v52  ;;  %v9531_v61 = vpop.f32.mrb[17].mxu1  ;;  %v9511_v62 = vpop.f32.mrb[18].mxu0 }
 0x583   :  { %v9532_v59 = vadd.f32 %v9531_v61, %v9530_v56  ;;  %v9533_v34 = vpop.f32.mrb[18].mxu1  ;;  %v9512_v4 = vpop.f32.mrb[19].mxu0 }
 0x584   :  { %v8261_v63 = vadd.f32 %v9510_v54, %v9427_v58  ;;  %v9534_v20 = vpop.f32.mrb[19].mxu1 }
 0x586   :  { %v8301_v35 = vadd.f32 %v9532_v59, %v8261_v63 }
 0x63c   :  { %v9552_v5 = vpop.f32.mrb[20].mxu0 }
 0x63d   :  { %v9574_v0 = vpop.f32.mrb[20].mxu1  ;;  %v9553_v1 = vpop.f32.mrb[21].mxu0 }
 0x63e   :  { %v9554_v39 = vadd.f32 %v9553_v1, %v9552_v5  ;;  %v9575_v3 = vpop.f32.mrb[21].mxu1  ;;  %v9555_v13 = vpop.f32.mrb[22].mxu0 }
 0x63f   :  { %v9576_v12 = vadd.f32 %v9575_v3, %v9574_v0  ;;  %v9577_v16 = vpop.f32.mrb[22].mxu1  ;;  %v9556_v6 = vpop.f32.mrb[23].mxu0 }
 0x640   :  { %v8341_v11 = vadd.f32 %v9554_v39, %v8301_v35  ;;  %v9578_v37 = vpop.f32.mrb[23].mxu1 }
 0x642   :  { %v8381_v7 = vadd.f32 %v9576_v12, %v8341_v11 }
 0x644   :  { %8386 = vst [vmem:[%s10270_s7] sm:$0xff] %v8381_v7 }
 0x645   :  { %8391 = vsyncpa [#allocation3], 1 }
 0x646   :  { %8392 = vsyncpa [#allocation5], 1 }
 0x647   :  { %8393 = vsyncpa [#allocation8], 1 }
 0x648   :  { %8394 = vsyncpa [#allocation11], 1 }

</bundles_post_ra>
